<compile_context>
chip_gen: v6e
topology: v6e:2x2x1
jax: 0.10.0
libtpu: 0.0.40
codegen_flags: <defaults>
</compile_context>

<pallas_src>
import functools

import numpy as np
import jax
import jax.numpy as jnp
from jax import lax
from jax.experimental import pallas as pl
from jax.experimental.pallas import tpu as pltpu

LANES = 128                 # channel padding target (TPU lane width)
CDTYPE = jnp.bfloat16       # storage / MXU dtype for activations & weights
NCLS_PAD = 128              # FC output padded to a full lane width
VMEM_LIMIT = 48 * 1024 * 1024   # leaves headroom on v7x (64 MiB physical)


def _rup(x, m=LANES):
    return ((x + m - 1) // m) * m


def geom(H, W):
    """Padded-grid geometry: Hp x Wp grid flattened to P rows + halo rows.
    Wp and halo are multiples of 8 so dy window offsets stay sublane-aligned."""
    Hp = H + 2
    Wp = _rup(W + 2, 8)
    P = Hp * Wp
    halo = _rup(Wp + 1, 8)
    Rext = P + 2 * halo
    return Hp, Wp, P, halo, Rext


def interior_mask(H, W):
    """(Rext, 1) f32 mask: 1.0 on interior (non-padding) grid rows."""
    Hp, Wp, P, halo, Rext = geom(H, W)
    g = np.zeros((Hp, Wp), np.float32)
    g[1:H + 1, 1:W + 1] = 1.0
    m = np.zeros((Rext, 1), np.float32)
    m[halo:halo + P, 0] = g.reshape(-1)
    return jnp.asarray(m)


def to_layout(x_nhwc):
    """NHWC -> (N, Rext, Cpad) bf16 padded-grid slab (borders / halo zero)."""
    N, H, W, C = x_nhwc.shape
    Hp, Wp, P, halo, Rext = geom(H, W)
    Cp = _rup(C)
    x = jnp.pad(x_nhwc, ((0, 0), (1, 1), (1, Wp - W - 1), (0, Cp - C)))
    x = x.reshape(N, P, Cp)
    x = jnp.pad(x, ((0, 0), (halo, halo), (0, 0)))
    return x.astype(CDTYPE)


def _pick_bb(N, cap=8):
    """Images per conv grid step: big blocks for DMA pipelining, small enough
    for v7x VMEM, and >= 2 grid steps when N > 1 so both TCs get work."""
    limit = max(1, min(cap, N if N == 1 else N // 2))
    for b in range(limit, 0, -1):
        if N % b == 0:
            return b
    return 1


# ---------------------------------------------------------------------------
# Kernel 1: fused [BN+ReLU preact] -> im2col -> ONE 3x3-conv matmul -> bias
#           [-> identity residual / 1x1 projection residual].
# ---------------------------------------------------------------------------
def _conv3x3_kernel(x_ref, w_ref, scale_ref, shift_ref, bias_ref, mask_ref,
                    *rest, preact, res_mode, Wp, P, halo, Cin):
    if res_mode == "proj":
        res_ref, scw_ref, scb_ref, o_ref, xp_ref, col_ref = rest
    elif res_mode == "identity":
        res_ref, o_ref, xp_ref, col_ref = rest
        scw_ref = scb_ref = None
    else:
        o_ref, xp_ref, col_ref = rest
        res_ref = scw_ref = scb_ref = None

    B = x_ref.shape[0]
    Cout = o_ref.shape[2]
    halo_zeros = jnp.zeros((halo, Cout), o_ref.dtype)

    for b in range(B):
        # Prologue: BN(eval)+ReLU pre-activation, re-zero spatial padding.
        x = x_ref[b].astype(jnp.float32)                      # (Rext, Cin)
        if preact:
            x = jnp.maximum(x * scale_ref[...] + shift_ref[...], 0.0)
            x = x * mask_ref[...]
        xp_ref[...] = x

        # (P, 9*Cin) bf16 im2col: 9 row-shifted windows of the padded grid.
        # dy offsets are multiples of 8 (Wp, halo padded); dx=+-1 are not.
        for t in range(9):
            dy, dx = t // 3, t % 3
            off = halo + (dy - 1) * Wp + (dx - 1)
            col_ref[:, pl.ds(t * Cin, Cin)] = (
                xp_ref[pl.ds(off, P), :].astype(CDTYPE))

        # One MXU matmul over all 9 taps (K = 9*Cin), f32 accumulation.
        y = jnp.dot(col_ref[...], w_ref[...],
                    preferred_element_type=jnp.float32)
        y = y + bias_ref[...]
        if res_mode == "identity":
            y = y + res_ref[b, pl.ds(halo, P), :].astype(jnp.float32)
        elif res_mode == "proj":
            y = y + jnp.dot(res_ref[b, pl.ds(halo, P), :], scw_ref[...],
                            preferred_element_type=jnp.float32) + scb_ref[...]

        # Halo rows zeroed (keeps slabs finite); border rows hold finite
        # garbage and are re-masked by every consumer.
        o_ref[b, pl.ds(0, halo), :] = halo_zeros
        o_ref[b, pl.ds(halo, P), :] = y.astype(o_ref.dtype)
        o_ref[b, pl.ds(halo + P, halo), :] = halo_zeros


def conv3x3(x_l, w9, scale, shift, bias, mask, H, W, B,
            res_l=None, res_proj=None, preact=True):
    """x_l: (N, Rext, Cin) slab; w9: (9*Cin, Cout); returns (N, Rext, Cout)."""
    N, Rext, Cin = x_l.shape
    Cout = w9.shape[1]
    Hp, Wp, P, halo, Rext_g = geom(H, W)
    assert Rext == Rext_g and w9.shape[0] == 9 * Cin and N % B == 0

    res_mode = None
    if res_l is not None:
        res_mode = "proj" if res_proj is not None else "identity"

    kern = functools.partial(_conv3x3_kernel, preact=preact, res_mode=res_mode,
                             Wp=Wp, P=P, halo=halo, Cin=Cin)
    in_specs = [
        pl.BlockSpec((B, Rext, Cin), lambda n: (n, 0, 0)),
        pl.BlockSpec((9 * Cin, Cout), lambda n: (0, 0)),
        pl.BlockSpec((1, Cin), lambda n: (0, 0)),
        pl.BlockSpec((1, Cin), lambda n: (0, 0)),
        pl.BlockSpec((1, Cout), lambda n: (0, 0)),
        pl.BlockSpec((Rext, 1), lambda n: (0, 0)),
    ]
    args = [x_l, w9, scale.reshape(1, Cin), shift.reshape(1, Cin),
            bias.reshape(1, Cout), mask]
    if res_l is not None:
        Cres = res_l.shape[2]
        in_specs.append(pl.BlockSpec((B, Rext, Cres), lambda n: (n, 0, 0)))
        args.append(res_l)
        if res_proj is not None:
            scw, scb = res_proj
            in_specs += [pl.BlockSpec((Cres, Cout), lambda n: (0, 0)),
                         pl.BlockSpec((1, Cout), lambda n: (0, 0))]
            args += [scw, scb.reshape(1, Cout)]

    return pl.pallas_call(
        kern,
        out_shape=jax.ShapeDtypeStruct((N, Rext, Cout), CDTYPE),
        grid=(N // B,),
        in_specs=in_specs,
        out_specs=pl.BlockSpec((B, Rext, Cout), lambda n: (n, 0, 0)),
        scratch_shapes=[pltpu.VMEM((Rext, Cin), jnp.float32),
                        pltpu.VMEM((P, 9 * Cin), CDTYPE)],
        compiler_params=pltpu.CompilerParams(
            dimension_semantics=("parallel",),
            vmem_limit_bytes=VMEM_LIMIT),
    )(*args)


# ---------------------------------------------------------------------------
# Kernel 2: stride-2 block tail, fully fused:
#   preact -> conv2 (3x3, dense) -> bias -> + 1x1 projection shortcut of the
#   raw block input -> ::2 subsample -> half-res output slab.
# ---------------------------------------------------------------------------
def _conv3x3_s2_kernel(h1_ref, x_ref, w_ref, scale_ref, shift_ref, bias_ref,
                       scw_ref, scb_ref, mask_ref, o_ref,
                       xp_ref, col_ref, yfull_ref,
                       *, Wp, P, halo, Cin, W, H2, Wp2, halo2, Rext2):
    B = h1_ref.shape[0]
    Cout = o_ref.shape[2]

    # Selection matrix (built once from iota): padded half-res slab row r picks
    # full-res chunk column k when k is even and r == k/2 + 1.
    r_idx = lax.broadcasted_iota(jnp.int32, (Wp2, W), 0)
    k_idx = lax.broadcasted_iota(jnp.int32, (Wp2, W), 1)
    sel = jnp.where((k_idx % 2 == 0) & (r_idx == k_idx // 2 + 1),
                    1.0, 0.0).astype(CDTYPE)

    bot = halo2 + (1 + H2) * Wp2
    top_zeros = jnp.zeros((halo2 + Wp2, Cout), o_ref.dtype)
    bot_zeros = jnp.zeros((Rext2 - bot, Cout), o_ref.dtype)

    for b in range(B):
        # conv2 pre-activation + im2col (identical to the stride-1 kernel).
        xh = h1_ref[b].astype(jnp.float32)
        xh = jnp.maximum(xh * scale_ref[...] + shift_ref[...], 0.0)
        xp_ref[...] = xh * mask_ref[...]
        for t in range(9):
            dy, dx = t // 3, t % 3
            off = halo + (dy - 1) * Wp + (dx - 1)
            col_ref[:, pl.ds(t * Cin, Cin)] = (
                xp_ref[pl.ds(off, P), :].astype(CDTYPE))

        y = jnp.dot(col_ref[...], w_ref[...],
                    preferred_element_type=jnp.float32) + bias_ref[...]
        # Dense 1x1 projection of the raw block input; a 1x1 has no spatial
        # mixing, so the subsampled rows equal the stride-2 projection exactly.
        y = y + jnp.dot(x_ref[b, pl.ds(halo, P), :], scw_ref[...],
                        preferred_element_type=jnp.float32) + scb_ref[...]
        yfull_ref[...] = y

        # ::2 subsample fused into the epilogue: one tiny selection matmul per
        # output row produces a full, aligned, zero-padded half-res slab row.
        o_ref[b, pl.ds(0, halo2 + Wp2), :] = top_zeros
        for i in range(H2):
            src = halo + (1 + 2 * i) * Wp + 1
            chunk = yfull_ref[pl.ds(src, W), :].astype(CDTYPE)   # (W, Cout)
            row = jnp.dot(sel, chunk, preferred_element_type=jnp.float32)
            o_ref[b, pl.ds(halo2 + (1 + i) * Wp2, Wp2), :] = (
                row.astype(o_ref.dtype))
        o_ref[b, pl.ds(bot, Rext2 - bot), :] = bot_zeros


def conv3x3_s2_proj(h1_l, x_l, w9, scale, shift, bias, scw, scb, mask, H, W, B):
    N, Rext, Cin = h1_l.shape
    Cin_x = x_l.shape[2]
    Cout = w9.shape[1]
    Hp, Wp, P, halo, Rext_g = geom(H, W)
    H2, W2 = H // 2, W // 2
    Hp2, Wp2, P2, halo2, Rext2 = geom(H2, W2)
    assert Rext == Rext_g and w9.shape[0] == 9 * Cin and N % B == 0

    kern = functools.partial(
        _conv3x3_s2_kernel, Wp=Wp, P=P, halo=halo, Cin=Cin, W=W,
        H2=H2, Wp2=Wp2, halo2=halo2, Rext2=Rext2)
    return pl.pallas_call(
        kern,
        out_shape=jax.ShapeDtypeStruct((N, Rext2, Cout), CDTYPE),
        grid=(N // B,),
        in_specs=[
            pl.BlockSpec((B, Rext, Cin), lambda n: (n, 0, 0)),
            pl.BlockSpec((B, Rext, Cin_x), lambda n: (n, 0, 0)),
            pl.BlockSpec((9 * Cin, Cout), lambda n: (0, 0)),
            pl.BlockSpec((1, Cin), lambda n: (0, 0)),
            pl.BlockSpec((1, Cin), lambda n: (0, 0)),
            pl.BlockSpec((1, Cout), lambda n: (0, 0)),
            pl.BlockSpec((Cin_x, Cout), lambda n: (0, 0)),
            pl.BlockSpec((1, Cout), lambda n: (0, 0)),
            pl.BlockSpec((Rext, 1), lambda n: (0, 0)),
        ],
        out_specs=pl.BlockSpec((B, Rext2, Cout), lambda n: (n, 0, 0)),
        scratch_shapes=[pltpu.VMEM((Rext, Cin), jnp.float32),
                        pltpu.VMEM((P, 9 * Cin), CDTYPE),
                        pltpu.VMEM((P, Cout), jnp.float32)],
        compiler_params=pltpu.CompilerParams(
            dimension_semantics=("parallel",),
            vmem_limit_bytes=VMEM_LIMIT),
    )(h1_l, x_l, w9, scale.reshape(1, Cin), shift.reshape(1, Cin),
      bias.reshape(1, Cout), scw, scb.reshape(1, Cout), mask)


# ---------------------------------------------------------------------------
# Kernel 3: fused final BN + ReLU + global average pool + linear head,
#           tiled over the batch.
# ---------------------------------------------------------------------------
def _head_kernel(x_ref, scale_ref, shift_ref, mask_ref, wfc_ref, bfc_ref,
                 o_ref, *, inv_hw):
    x = x_ref[...].astype(jnp.float32)                       # (Bh, Rext, C)
    y = jnp.maximum(x * scale_ref[...] + shift_ref[...], 0.0)
    y = y * mask_ref[...]
    pooled = jnp.sum(y, axis=1) * inv_hw                     # (Bh, C)
    logits = jnp.dot(pooled, wfc_ref[...],
                     preferred_element_type=jnp.float32) + bfc_ref[...]
    o_ref[...] = logits.astype(o_ref.dtype)


def head_forward(o_l, bn, fc_w, fc_b, mask, H, W):
    N, Rext, Cp = o_l.shape
    scale, shift = bn_scale_shift(bn)
    Bh = 8 if (N % 8 == 0) else N
    return pl.pallas_call(
        functools.partial(_head_kernel, inv_hw=1.0 / float(H * W)),
        out_shape=jax.ShapeDtypeStruct((N, NCLS_PAD), jnp.float32),
        grid=(N // Bh,),
        in_specs=[
            pl.BlockSpec((Bh, Rext, Cp), lambda n: (n, 0, 0)),
            pl.BlockSpec((1, 1, Cp), lambda n: (0, 0, 0)),
            pl.BlockSpec((1, 1, Cp), lambda n: (0, 0, 0)),
            pl.BlockSpec((1, Rext, 1), lambda n: (0, 0, 0)),
            pl.BlockSpec((Cp, NCLS_PAD), lambda n: (0, 0)),
            pl.BlockSpec((1, NCLS_PAD), lambda n: (0, 0)),
        ],
        out_specs=pl.BlockSpec((Bh, NCLS_PAD), lambda n: (n, 0)),
        compiler_params=pltpu.CompilerParams(
            dimension_semantics=("parallel",),
            vmem_limit_bytes=VMEM_LIMIT),
    )(o_l, scale.reshape(1, 1, Cp), shift.reshape(1, 1, Cp),
      mask.reshape(1, Rext, 1), fc_w, fc_b.reshape(1, NCLS_PAD))


# ---------------------------------------------------------------------------
# Parameter init (kaiming_normal like _weights_init), padded to lane width.
# ---------------------------------------------------------------------------
def _kaiming_conv(key, kh, kw, cin, cout):
    std = (2.0 / (cin * kh * kw)) ** 0.5
    return jax.random.normal(key, (kh, kw, cin, cout), jnp.float32) * std


def _kaiming_linear(key, cin, cout):
    std = (2.0 / cin) ** 0.5
    return jax.random.normal(key, (cin, cout), jnp.float32) * std


def _pad_conv_w(w):
    kh, kw, cin, cout = w.shape
    ci, co = _rup(cin), _rup(cout)
    w = jnp.pad(w, ((0, 0), (0, 0), (0, ci - cin), (0, co - cout)))
    return w.reshape(kh * kw * ci, co).astype(CDTYPE)     # tap-major rows


def _pad_vec(v):
    c = v.shape[0]
    return jnp.pad(v, (0, _rup(c) - c))


def _bn_params(c):
    cp = _rup(c)
    return {"gamma": jnp.ones((cp,), jnp.float32),
            "beta": jnp.zeros((cp,), jnp.float32),
            "mean": jnp.zeros((cp,), jnp.float32),
            "var": jnp.ones((cp,), jnp.float32)}


def bn_scale_shift(bn, eps=1e-5):
    scale = bn["gamma"] * jax.lax.rsqrt(bn["var"] + eps)
    shift = bn["beta"] - bn["mean"] * scale
    return scale, shift


def init_wrn_params(key, num_blocks=(1, 1, 1), widen=1, num_cls=10):
    keys = iter(jax.random.split(key, 256))
    params = {
        "conv1_w": _pad_conv_w(_kaiming_conv(next(keys), 3, 3, 3, 16)),
        "conv1_b": _pad_vec(jnp.zeros((16,), jnp.float32)),
    }
    in_planes = 16
    stages = []
    for planes, nb, stride in ((16 * widen, num_blocks[0], 1),
                               (32 * widen, num_blocks[1], 2),
                               (64 * widen, num_blocks[2], 2)):
        blocks = []
        for s in [stride] + [1] * (int(nb) - 1):
            blk = {
                "stride": s,
                "bn1": _bn_params(in_planes),
                "conv1_w": _pad_conv_w(_kaiming_conv(next(keys), 3, 3, in_planes, planes)),
                "conv1_b": _pad_vec(jnp.zeros((planes,), jnp.float32)),
                "bn2": _bn_params(planes),
                "conv2_w": _pad_conv_w(_kaiming_conv(next(keys), 3, 3, planes, planes)),
                "conv2_b": _pad_vec(jnp.zeros((planes,), jnp.float32)),
            }
            if s != 1 or in_planes != planes:
                w = _kaiming_conv(next(keys), 1, 1, in_planes, planes)[0, 0]
                blk["sc_w"] = jnp.pad(
                    w, ((0, _rup(in_planes) - in_planes),
                        (0, _rup(planes) - planes))).astype(CDTYPE)
                blk["sc_b"] = _pad_vec(jnp.zeros((planes,), jnp.float32))
            blocks.append(blk)
            in_planes = planes
        stages.append(blocks)
    params["stages"] = stages
    params["bn_final"] = _bn_params(64 * widen)
    fcw = _kaiming_linear(next(keys), 64 * widen, num_cls)
    params["fc_w"] = jnp.pad(fcw, ((0, _rup(64 * widen) - 64 * widen),
                                   (0, NCLS_PAD - num_cls)))
    params["fc_b"] = jnp.zeros((NCLS_PAD,), jnp.float32)
    params["num_cls"] = num_cls
    return params


# ---------------------------------------------------------------------------
# Forward pass
# ---------------------------------------------------------------------------
def wide_basic_forward(x_l, blk, H, W, mask, B):
    s1, t1 = bn_scale_shift(blk["bn1"])
    s2, t2 = bn_scale_shift(blk["bn2"])
    h1 = conv3x3(x_l, blk["conv1_w"], s1, t1, blk["conv1_b"], mask, H, W, B,
                 preact=True)
    # TODO(synk): dropout between conv1 and conv2 is identity in eval mode.
    if blk["stride"] == 1:
        if "sc_w" in blk:
            out = conv3x3(h1, blk["conv2_w"], s2, t2, blk["conv2_b"], mask,
                          H, W, B, res_l=x_l,
                          res_proj=(blk["sc_w"], blk["sc_b"]), preact=True)
        else:
            out = conv3x3(h1, blk["conv2_w"], s2, t2, blk["conv2_b"], mask,
                          H, W, B, res_l=x_l, preact=True)
        return out, H, W, mask
    # stride-2: conv2 + 1x1 projection shortcut + subsample in one kernel
    out = conv3x3_s2_proj(h1, x_l, blk["conv2_w"], s2, t2, blk["conv2_b"],
                          blk["sc_w"], blk["sc_b"], mask, H, W, B)
    H2, W2 = H // 2, W // 2
    return out, H2, W2, interior_mask(H2, W2)


def wrn_forward(params, x_nchw):
    x = jnp.transpose(x_nchw, (0, 2, 3, 1)).astype(jnp.float32)  # NCHW -> NHWC
    N, H, W, _ = x.shape
    B = _pick_bb(N)
    x_l = to_layout(x)
    mask = interior_mask(H, W)

    cin_p = x_l.shape[2]
    ones = jnp.ones((cin_p,), jnp.float32)
    zeros = jnp.zeros((cin_p,), jnp.float32)
    o_l = conv3x3(x_l, params["conv1_w"], ones, zeros, params["conv1_b"],
                  mask, H, W, B, preact=False)

    for stage in params["stages"]:
        for blk in stage:
            o_l, H, W, mask = wide_basic_forward(o_l, blk, H, W, mask, B)

    logits_pad = head_forward(o_l, params["bn_final"], params["fc_w"],
                              params["fc_b"], mask, H, W)
    return logits_pad[:, :params["num_cls"]]


if __name__ == "__main__":
    key = jax.random.PRNGKey(0)
    pkey, xkey = jax.random.split(key)
    params = init_wrn_params(pkey, num_blocks=(1, 1, 1), widen=1, num_cls=10)
    # Small CIFAR-like input, NCHW as in PyTorch.
    x = jax.random.normal(xkey, (2, 3, 16, 16), jnp.float32)
    out = wrn_forward(params, x)
    out = jax.block_until_ready(out)
    assert out.shape == (2, 10) and out.dtype == jnp.float32
    assert bool(jnp.all(jnp.isfinite(out)))
    print("KERNEL_OK")
</pallas_src>

<mosaic_0001>
module attributes {stable_mosaic.version = 11 : i64} {
  func.func @_conv3x3_kernel(%arg0: i32, %arg1: memref<1x496x128xbf16, #tpu.memory_space<vmem>>, %arg2: memref<1152x128xbf16, #tpu.memory_space<vmem>>, %arg3: memref<1x128xf32, #tpu.memory_space<vmem>>, %arg4: memref<1x128xf32, #tpu.memory_space<vmem>>, %arg5: memref<1x128xf32, #tpu.memory_space<vmem>>, %arg6: memref<496x1xf32, #tpu.memory_space<vmem>>, %arg7: memref<1x496x128xbf16, #tpu.memory_space<vmem>>, %arg8: memref<496x128xf32, #tpu.memory_space<vmem>>, %arg9: memref<432x1152xbf16, #tpu.memory_space<vmem>>) attributes {dimension_semantics = [#tpu.dimension_semantics<parallel>], iteration_bounds = array<i64: 2>, scalar_prefetch = 0 : i64, scratch_operands = 2 : i64, tpu.core_type = #tpu.core_type<tc>, window_params = [{transform_indices = @transform_0, window_bounds = array<i64: 1, 496, 128>}, {pipeline_mode = #tpu.pipeline_mode<synchronous>, transform_indices = @transform_1, window_bounds = array<i64: 1152, 128>}, {pipeline_mode = #tpu.pipeline_mode<synchronous>, transform_indices = @transform_2, window_bounds = array<i64: 1, 128>}, {pipeline_mode = #tpu.pipeline_mode<synchronous>, transform_indices = @transform_3, window_bounds = array<i64: 1, 128>}, {pipeline_mode = #tpu.pipeline_mode<synchronous>, transform_indices = @transform_4, window_bounds = array<i64: 1, 128>}, {pipeline_mode = #tpu.pipeline_mode<synchronous>, transform_indices = @transform_5, window_bounds = array<i64: 496, 1>}, {transform_indices = @transform_6, window_bounds = array<i64: 1, 496, 128>}]} {
    %cst = arith.constant 0.000000e+00 : bf16
    %0 = vector.broadcast %cst : bf16 to vector<32x128xbf16>
    %c0 = arith.constant 0 : index
    %c0_0 = arith.constant 0 : index
    %c0_1 = arith.constant 0 : index
    %1 = vector.load %arg1[%c0, %c0_0, %c0_1] : memref<1x496x128xbf16, #tpu.memory_space<vmem>>, vector<1x496x128xbf16>
    %2 = vector.shape_cast %1 : vector<1x496x128xbf16> to vector<496x128xbf16>
    %3 = arith.extf %2 : vector<496x128xbf16> to vector<496x128xf32>
    %c0_2 = arith.constant 0 : index
    %c0_3 = arith.constant 0 : index
    %4 = vector.load %arg8[%c0_2, %c0_3] : memref<496x128xf32, #tpu.memory_space<vmem>>, vector<496x128xf32>
    tpu.vector_store %arg8[%c0_2, %c0_3], %3 {strides = array<i32>} : memref<496x128xf32, #tpu.memory_space<vmem>>, vector<496x128xf32>,
    %c7 = arith.constant 7 : index
    %c0_4 = arith.constant 0 : index
    %5 = vector.load %arg8[%c7, %c0_4] : memref<496x128xf32, #tpu.memory_space<vmem>>, vector<432x128xf32>
    %6 = arith.truncf %5 : vector<432x128xf32> to vector<432x128xbf16>
    %c0_5 = arith.constant 0 : index
    %c0_6 = arith.constant 0 : index
    %7 = vector.load %arg9[%c0_5, %c0_6] : memref<432x1152xbf16, #tpu.memory_space<vmem>>, vector<432x128xbf16>
    tpu.vector_store %arg9[%c0_5, %c0_6], %6 {strides = array<i32>} : memref<432x1152xbf16, #tpu.memory_space<vmem>>, vector<432x128xbf16>,
    %c8 = arith.constant 8 : index
    %c0_7 = arith.constant 0 : index
    %8 = vector.load %arg8[%c8, %c0_7] : memref<496x128xf32, #tpu.memory_space<vmem>>, vector<432x128xf32>
    %9 = arith.truncf %8 : vector<432x128xf32> to vector<432x128xbf16>
    %c0_8 = arith.constant 0 : index
    %c128 = arith.constant 128 : index
    %10 = vector.load %arg9[%c0_8, %c128] : memref<432x1152xbf16, #tpu.memory_space<vmem>>, vector<432x128xbf16>
    tpu.vector_store %arg9[%c0_8, %c128], %9 {strides = array<i32>} : memref<432x1152xbf16, #tpu.memory_space<vmem>>, vector<432x128xbf16>,
    %c9 = arith.constant 9 : index
    %c0_9 = arith.constant 0 : index
    %11 = vector.load %arg8[%c9, %c0_9] : memref<496x128xf32, #tpu.memory_space<vmem>>, vector<432x128xf32>
    %12 = arith.truncf %11 : vector<432x128xf32> to vector<432x128xbf16>
    %c0_10 = arith.constant 0 : index
    %c256 = arith.constant 256 : index
    %13 = vector.load %arg9[%c0_10, %c256] : memref<432x1152xbf16, #tpu.memory_space<vmem>>, vector<432x128xbf16>
    tpu.vector_store %arg9[%c0_10, %c256], %12 {strides = array<i32>} : memref<432x1152xbf16, #tpu.memory_space<vmem>>, vector<432x128xbf16>,
    %c31 = arith.constant 31 : index
    %c0_11 = arith.constant 0 : index
    %14 = vector.load %arg8[%c31, %c0_11] : memref<496x128xf32, #tpu.memory_space<vmem>>, vector<432x128xf32>
    %15 = arith.truncf %14 : vector<432x128xf32> to vector<432x128xbf16>
    %c0_12 = arith.constant 0 : index
    %c384 = arith.constant 384 : index
    %16 = vector.load %arg9[%c0_12, %c384] : memref<432x1152xbf16, #tpu.memory_space<vmem>>, vector<432x128xbf16>
    tpu.vector_store %arg9[%c0_12, %c384], %15 {strides = array<i32>} : memref<432x1152xbf16, #tpu.memory_space<vmem>>, vector<432x128xbf16>,
    %c32 = arith.constant 32 : index
    %c0_13 = arith.constant 0 : index
    %17 = vector.load %arg8[%c32, %c0_13] : memref<496x128xf32, #tpu.memory_space<vmem>>, vector<432x128xf32>
    %18 = arith.truncf %17 : vector<432x128xf32> to vector<432x128xbf16>
    %c0_14 = arith.constant 0 : index
    %c512 = arith.constant 512 : index
    %19 = vector.load %arg9[%c0_14, %c512] : memref<432x1152xbf16, #tpu.memory_space<vmem>>, vector<432x128xbf16>
    tpu.vector_store %arg9[%c0_14, %c512], %18 {strides = array<i32>} : memref<432x1152xbf16, #tpu.memory_space<vmem>>, vector<432x128xbf16>,
    %c33 = arith.constant 33 : index
    %c0_15 = arith.constant 0 : index
    %20 = vector.load %arg8[%c33, %c0_15] : memref<496x128xf32, #tpu.memory_space<vmem>>, vector<432x128xf32>
    %21 = arith.truncf %20 : vector<432x128xf32> to vector<432x128xbf16>
    %c0_16 = arith.constant 0 : index
    %c640 = arith.constant 640 : index
    %22 = vector.load %arg9[%c0_16, %c640] : memref<432x1152xbf16, #tpu.memory_space<vmem>>, vector<432x128xbf16>
    tpu.vector_store %arg9[%c0_16, %c640], %21 {strides = array<i32>} : memref<432x1152xbf16, #tpu.memory_space<vmem>>, vector<432x128xbf16>,
    %c55 = arith.constant 55 : index
    %c0_17 = arith.constant 0 : index
    %23 = vector.load %arg8[%c55, %c0_17] : memref<496x128xf32, #tpu.memory_space<vmem>>, vector<432x128xf32>
    %24 = arith.truncf %23 : vector<432x128xf32> to vector<432x128xbf16>
    %c0_18 = arith.constant 0 : index
    %c768 = arith.constant 768 : index
    %25 = vector.load %arg9[%c0_18, %c768] : memref<432x1152xbf16, #tpu.memory_space<vmem>>, vector<432x128xbf16>
    tpu.vector_store %arg9[%c0_18, %c768], %24 {strides = array<i32>} : memref<432x1152xbf16, #tpu.memory_space<vmem>>, vector<432x128xbf16>,
    %c56 = arith.constant 56 : index
    %c0_19 = arith.constant 0 : index
    %26 = vector.load %arg8[%c56, %c0_19] : memref<496x128xf32, #tpu.memory_space<vmem>>, vector<432x128xf32>
    %27 = arith.truncf %26 : vector<432x128xf32> to vector<432x128xbf16>
    %c0_20 = arith.constant 0 : index
    %c896 = arith.constant 896 : index
    %28 = vector.load %arg9[%c0_20, %c896] : memref<432x1152xbf16, #tpu.memory_space<vmem>>, vector<432x128xbf16>
    tpu.vector_store %arg9[%c0_20, %c896], %27 {strides = array<i32>} : memref<432x1152xbf16, #tpu.memory_space<vmem>>, vector<432x128xbf16>,
    %c57 = arith.constant 57 : index
    %c0_21 = arith.constant 0 : index
    %29 = vector.load %arg8[%c57, %c0_21] : memref<496x128xf32, #tpu.memory_space<vmem>>, vector<432x128xf32>
    %30 = arith.truncf %29 : vector<432x128xf32> to vector<432x128xbf16>
    %c0_22 = arith.constant 0 : index
    %c1024 = arith.constant 1024 : index
    %31 = vector.load %arg9[%c0_22, %c1024] : memref<432x1152xbf16, #tpu.memory_space<vmem>>, vector<432x128xbf16>
    tpu.vector_store %arg9[%c0_22, %c1024], %30 {strides = array<i32>} : memref<432x1152xbf16, #tpu.memory_space<vmem>>, vector<432x128xbf16>,
    %c0_23 = arith.constant 0 : index
    %c0_24 = arith.constant 0 : index
    %32 = vector.load %arg9[%c0_23, %c0_24] : memref<432x1152xbf16, #tpu.memory_space<vmem>>, vector<432x1152xbf16>
    %c0_25 = arith.constant 0 : index
    %c0_26 = arith.constant 0 : index
    %33 = vector.load %arg2[%c0_25, %c0_26] : memref<1152x128xbf16, #tpu.memory_space<vmem>>, vector<1152x128xbf16>
    %cst_27 = arith.constant dense<0.000000e+00> : vector<432x128xf32>
    %34 = tpu.matmul %32, %33, %cst_27 {dimension_numbers = #tpu.dot_dimension_numbers<[1], [0], [0], [1], [0, 0, 1, 1], [], []>} : vector<432x1152xbf16>, vector<1152x128xbf16>, vector<432x128xf32> -> vector<432x128xf32>
    %c0_28 = arith.constant 0 : index
    %c0_29 = arith.constant 0 : index
    %35 = vector.load %arg5[%c0_28, %c0_29] : memref<1x128xf32, #tpu.memory_space<vmem>>, vector<1x128xf32>
    %36 = vector.broadcast %35 : vector<1x128xf32> to vector<432x128xf32>
    %37 = arith.addf %34, %36 : vector<432x128xf32>
    %c0_30 = arith.constant 0 : index
    %c0_31 = arith.constant 0 : index
    %c0_32 = arith.constant 0 : index
    %38 = vector.load %arg7[%c0_30, %c0_31, %c0_32] : memref<1x496x128xbf16, #tpu.memory_space<vmem>>, vector<1x32x128xbf16>
    %39 = vector.shape_cast %38 : vector<1x32x128xbf16> to vector<32x128xbf16>
    %40 = vector.shape_cast %0 : vector<32x128xbf16> to vector<1x32x128xbf16>
    tpu.vector_store %arg7[%c0_30, %c0_31, %c0_32], %40 {strides = array<i32>} : memref<1x496x128xbf16, #tpu.memory_space<vmem>>, vector<1x32x128xbf16>,
    %41 = arith.truncf %37 : vector<432x128xf32> to vector<432x128xbf16>
    %c0_33 = arith.constant 0 : index
    %c32_34 = arith.constant 32 : index
    %c0_35 = arith.constant 0 : index
    %42 = vector.load %arg7[%c0_33, %c32_34, %c0_35] : memref<1x496x128xbf16, #tpu.memory_space<vmem>>, vector<1x432x128xbf16>
    %43 = vector.shape_cast %42 : vector<1x432x128xbf16> to vector<432x128xbf16>
    %44 = vector.shape_cast %41 : vector<432x128xbf16> to vector<1x432x128xbf16>
    tpu.vector_store %arg7[%c0_33, %c32_34, %c0_35], %44 {strides = array<i32>} : memref<1x496x128xbf16, #tpu.memory_space<vmem>>, vector<1x432x128xbf16>,
    %c0_36 = arith.constant 0 : index
    %c464 = arith.constant 464 : index
    %c0_37 = arith.constant 0 : index
    %45 = vector.load %arg7[%c0_36, %c464, %c0_37] : memref<1x496x128xbf16, #tpu.memory_space<vmem>>, vector<1x32x128xbf16>
    %46 = vector.shape_cast %45 : vector<1x32x128xbf16> to vector<32x128xbf16>
    %47 = vector.shape_cast %0 : vector<32x128xbf16> to vector<1x32x128xbf16>
    tpu.vector_store %arg7[%c0_36, %c464, %c0_37], %47 {strides = array<i32>} : memref<1x496x128xbf16, #tpu.memory_space<vmem>>, vector<1x32x128xbf16>,
    return
  }
  func.func @transform_0(%arg0: i32) -> (i32, i32, i32) {
    %c0_i32 = arith.constant 0 : i32
    %c0_i32_0 = arith.constant 0 : i32
    %c0_i32_1 = arith.constant 0 : i32
    return %arg0, %c0_i32, %c0_i32_0 : i32, i32, i32
  }
  func.func @transform_1(%arg0: i32) -> (i32, i32) {
    %c0_i32 = arith.constant 0 : i32
    %c0_i32_0 = arith.constant 0 : i32
    %c0_i32_1 = arith.constant 0 : i32
    return %c0_i32, %c0_i32_0 : i32, i32
  }
  func.func @transform_2(%arg0: i32) -> (i32, i32) {
    %c0_i32 = arith.constant 0 : i32
    %c0_i32_0 = arith.constant 0 : i32
    %c0_i32_1 = arith.constant 0 : i32
    return %c0_i32, %c0_i32_0 : i32, i32
  }
  func.func @transform_3(%arg0: i32) -> (i32, i32) {
    %c0_i32 = arith.constant 0 : i32
    %c0_i32_0 = arith.constant 0 : i32
    %c0_i32_1 = arith.constant 0 : i32
    return %c0_i32, %c0_i32_0 : i32, i32
  }
  func.func @transform_4(%arg0: i32) -> (i32, i32) {
    %c0_i32 = arith.constant 0 : i32
    %c0_i32_0 = arith.constant 0 : i32
    %c0_i32_1 = arith.constant 0 : i32
    return %c0_i32, %c0_i32_0 : i32, i32
  }
  func.func @transform_5(%arg0: i32) -> (i32, i32) {
    %c0_i32 = arith.constant 0 : i32
    %c0_i32_0 = arith.constant 0 : i32
    %c0_i32_1 = arith.constant 0 : i32
    return %c0_i32, %c0_i32_0 : i32, i32
  }
  func.func @transform_6(%arg0: i32) -> (i32, i32, i32) {
    %c0_i32 = arith.constant 0 : i32
    %c0_i32_0 = arith.constant 0 : i32
    %c0_i32_1 = arith.constant 0 : i32
    return %arg0, %c0_i32, %c0_i32_0 : i32, i32, i32
  }
}

</mosaic_0001>

<bundles_post_ra>
// kernel: tpu_custom_call.1
= control target key start
LH: loop header
LB: loop body
LE: loop exit
PB: predicated region body
PF: predicated region fallthrough
CT: control target
= control target key end

     0   :  { %11 = vsyncpa [#allocation5], 0  ;;  %s10464_s0 = inlined_call_operand.vmem [shape: bf16[2,496,128], index: 0, kind: input, shape index: {}]   ;;  %s10465_s1 = inlined_call_operand.hbm [shape: bf16[1152,128], index: 1, kind: input, shape index: {}]   ;;  %s10466_s2 = inlined_call_operand.vmem [shape: f32[1,128], index: 2, kind: input, shape index: {}]   ;;  %s10467_s3 = inlined_call_operand.vmem [shape: f32[1,128], index: 3, kind: input, shape index: {}]   ;;  %s10468_s4 = inlined_call_operand.vmem [shape: f32[1,128], index: 4, kind: input, shape index: {}]   ;;  %s10469_s5 = inlined_call_operand.vmem [shape: f32[496,1], index: 5, kind: input, shape index: {}]   ;;  %s10470_s6 = inlined_call_operand.hbm [shape: bf16[2,496,128], index: 6, kind: output, shape index: {}]  }
   0x1   :  { %12 = vsyncpa [#allocation6], 0 }
   0x2   :  { %14 = vsyncpa [#allocation6 + $0x1], 0  ;;  %s9667_s21 = smov 0   ;;  %s9669_s22 = smov 0  }
   0x3   :  { %s9671_s2 = smov 0   ;;  %s9673_s23 = smov 0  }
   0x4 LB: > { %s9688_s3 = sadd.s32 4294967295, %s9621_s23   ;;  %s7074_s5 = sadd.s32 4294967294, %s9621_s23   ;;  %s9621_s23 = sphi %s9673_s23, %s10530_s23   ;;  %s9617_s2 = sphi %s9671_s2, %s10529_s2   ;;  %s9613_s22 = sphi %s9669_s22, %s10528_s22   ;;  %s9609_s21 = sphi %s9667_s21, %s10527_s21  }
   0x5   : > { %s9692_s24 = sadd.s32 1, %s9621_s23   ;;  %s158_s25 = sadd.s32 1, %s9617_s2 }
   0x6   : > { %s155_s26 = ssub.s32 %s9621_s23, %s9692_s24  ;;  %p168_p0 = scmp.ne.s32.totalorder %s9617_s2, %s9613_s22 }
   0x7   : > { %p156_p1 = scmp.eq.s32.totalorder %s155_s26, 0  ;;  %p169_p2 = scmp.eq.s32.totalorder %s9688_s3, 1 }
   0x8   : > { %p174_p3 = scmp.ne.s32.totalorder %s9613_s22, %s9609_s21  ;;  %p175_p4 = scmp.eq.s32.totalorder %s7074_s5, 1 }
   0x9   : > { %s9703_s27 = scalar_select %p156_p1, %s9617_s2, %s158_s25  }
   0xa   : > { %p9705_p5 = por %p169_p2, %p168_p0  ;;  %p9709_p6 = por %p175_p4, %p174_p3 }
   0xb   : > { %p7075_p7 = scmp.ge.s32.totalorder %s9621_s23, 1  ;;  %p182_p8 = scmp.lt.s32.totalorder %s9621_s23, 3 }
   0xc   : > { %s10476_s29 = scalar_select %p9709_p6, 1, 0 }
   0xd   : > { %p9004_p9 = scmp.eq.s32.totalorder %s9688_s3, 0  ;;  %p9716_p10 = pnand %p7075_p7, %p182_p8 }
   0xe   : > { %s9623_s7 = smov [#allocation4]  }
   0xf   : > { %s194_s8 = sshll.u32 %s9623_s7, 4  ;;  %p8996_p11 = pneg %p9716_p10  ;;  %s195_s8 = int_to_ptr.vmem [resolvable:$true] %s194_s8 }
  0x10   : > { %s9542_s9 = scalar_lea.vmem %s195_s8, 9216  ;;  %p9550_p3 = scmp.lt.s32.totalorder %s195_s8, %s195_s8 }
  0x11   : > { %p8997_p12 = pnand %p9004_p9, %p8996_p11  ;;  %p9543_p0 = scmp.ne.s32.totalorder %s195_s8, %s9542_s9 }
  0x12   : > { %p9551_p4 = scmp.lt.s32.totalorder %s9542_s9, %s9542_s9 }
  0x13   : > { %p9533_p13 = pneg %p8997_p12 }
  0x14   : > { %p9552_p6 = por %p9551_p4, %p9550_p3 }
  0x15   : > { %p9545_p1 = pnand %p9543_p0, %p9533_p13 }
  0x17   : > { %p9546_p2 = pneg %p9545_p1 }
  0x19   : > { %p9553_p7 = pnand %p9552_p6, %p9546_p2 }
  0x1b   : > { %9556 = shalt.err (!%p9553_p7)
}
  0x1c   : > { %s9624_s10 = smov 64   ;;  %s9625_s11 = smov 4  }
  0x1d   : > { %8999 = dma.hbm_to_vmem [thread:$0]  (!%p8997_p12), %s10465_s1, 9216, %s195_s8, [#allocation5], %s9624_s10, %s9624_s10, %s9625_s11  }
  0x1e   : > { %230 = sbr.rel (%p9716_p10) target bundleno = 852 (0x354), region = 44 }
  0x23   : > { %9600 = dma.done.wait (%p9004_p9), [#allocation5], 9216  }
  0x24   : > { %9602 = vsyncadd (%p9004_p9), [#allocation5], 4294958080  ;;  %v10471_v0 = vmov 0   ;;  %v9047_v1 = vld [vmem:[#allocation4 + $0x38] sm:$0xff]   ;;  %p260_p6 = scmp.lt.s32.totalorder %s9688_s3, 1  ;;  %v9048_v2 = vld [vmem:[#allocation4 + $0x30] sm:$0xff]  }
  0x25   : > { %5463 = vmatprep.subr.bf16.mxu0 %v10471_v0  ;;  %8955 = vmatprep.subr.bf16.mxu1 %v10471_v0  ;;  %v9049_v3 = vld [vmem:[#allocation4 + $0x28] sm:$0xff]   ;;  %v9050_v4 = vld [vmem:[#allocation4 + $0x20] sm:$0xff]   ;;  %v9051_v5 = vld [vmem:[#allocation4 + $0x18] sm:$0xff]   ;;  %vm9628_vm0 = vmmov 0   ;;  %s257_s26 = sand.u32 1, %s9613_s22   ;;  %s8989_s8 = smul.u32 3968, %s9688_s3 }
  0x26   : > { %5464 = vmatpush1.bf16.msra.mxu0 %v9047_v1  ;;  %8971 = vmatpush1.bf16.msra.mxu1 %v9047_v1  ;;  %s261_s14 = scalar_select %p260_p6, %s9688_s3, 1  ;;  %v9052_v6 = vld [vmem:[#allocation4 + $0x10] sm:$0xff]   ;;  %v9053_v33 = vld [vmem:[#allocation4 + $0x8] sm:$0xff]   ;;  %v9054_v34 = vld [vmem:[#allocation4] sm:$0xff]  }
  0x27   : > { %5465 = vmatprep.subr.bf16.mxu0 %v10471_v0  ;;  %8956 = vmatprep.subr.bf16.mxu1 %v10471_v0  ;;  %v9055_v59 = vld [vmem:[#allocation4 + $0x78] sm:$0xff]   ;;  %s8987_s30 = smul.u32 248, %s257_s26  ;;  %s10417_s12 = scalar_lea.hbm %s10470_s6, %s8989_s8 }
  0x28   : > { %s8988_s15 = smul.u32 248, %s261_s14  ;;  %s10424_s3 = scalar_lea.sflag [#allocation6], %s257_s26 }
  0x29   : > { %s10170_s7 = scalar_lea.vmem [#allocation7], %s8987_s30  ;;  %s9629_s14 = smov [#allocation7]  }
  0x2a   : > { %5466 = vmatpush1.bf16.msra.mxu0 %v9048_v2  ;;  %8972 = vmatpush1.bf16.msra.mxu1 %v9048_v2  ;;  %s9746_s18 = scalar_lea.vmem %s10464_s0, %s8988_s15  ;;  %s7000_s9 = sshll.u32 %s10170_s7, 4  ;;  %s10419_s9 = int_to_ptr.vmem [resolvable:$true] %s7000_s9 }
  0x2b   : > { %5467 = vmatprep.subr.bf16.mxu0 %v10471_v0  ;;  %8957 = vmatprep.subr.bf16.mxu1 %v10471_v0  ;;  %v8481_v7 = vld [vmem:[%s9746_s18] sm:$0xff]   ;;  %v8739_v8 = vld [vmem:[%s9746_s18 + $0x8] sm:$0xff]   ;;  %v8752_v15 = vld [vmem:[%s9746_s18 + $0x70] sm:$0xff]   ;;  %s9557_s13 = scalar_lea.vmem %s10419_s9, 3968  ;;  %s9561_s15 = sshll.u32 %s9629_s14, 4  ;;  %s9562_s15 = int_to_ptr.vmem [resolvable:$false] %s9561_s15 }
  0x2c   : > { %v9063_v9 = vld [vmem:[%s9746_s18 + $0x4] ss:$0 sps:$4 sm:$0xff]   ;;  %v8482_v10 = vunpack.c.l.bf16 %v8481_v7  ;;  %v8483_v11 = vunpack.c.h.bf16 %v8481_v7  ;;  %v8486_v12 = vunpack.c.l.bf16 %v8739_v8  ;;  %v8487_v13 = vunpack.c.h.bf16 %v8739_v8  ;;  %v9064_v14 = vld [vmem:[%s9746_s18 + $0x8] ss:$0 sps:$4 sm:$0xff]   ;;  %v8753_v16 = vld [vmem:[%s9746_s18 + $0x78] sm:$0xff]   ;;  %p9558_p8 = scmp.ne.s32.totalorder %s10419_s9, %s9557_s13  ;;  %s9563_s16 = scalar_lea.vmem %s9562_s15, 7936 }
  0x2d   : > { %1046 = vst [vmem:[#allocation3 + $0x4] sm:$0xf] %v9063_v9  ;;  %v8538_v17 = vunpack.c.l.bf16 %v8752_v15  ;;  %v8539_v18 = vunpack.c.h.bf16 %v8752_v15  ;;  %v8542_v19 = vunpack.c.l.bf16 %v8753_v16  ;;  %v8543_v20 = vunpack.c.h.bf16 %v8753_v16  ;;  %v9068_v21 = vld [vmem:[%s9746_s18 + $0x74] ss:$0 sps:$4 sm:$0xff]   ;;  %v9069_v22 = vld [vmem:[%s9746_s18 + $0x78] ss:$0 sps:$4 sm:$0xff]   ;;  %p9564_p11 = scmp.lt.s32.totalorder %s10419_s9, %s9562_s15  ;;  %p9565_p12 = scmp.lt.s32.totalorder %s9563_s16, %s9557_s13 }
  0x2e   : > { %5468 = vmatpush1.bf16.msra.mxu0 %v9049_v3  ;;  %8973 = vmatpush1.bf16.msra.mxu1 %v9049_v3  ;;  %390 = vst [vmem:[#allocation2] sm:$0xff] %v8482_v10  ;;  %391 = vst [vmem:[#allocation2 + $0x8] sm:$0xff] %v8483_v11  ;;  %v8740_v23 = vld [vmem:[%s9746_s18 + $0x10] sm:$0xff]   ;;  %v9074_v25 = vld [vmem:[%s9746_s18 + $0xc] ss:$0 sps:$4 sm:$0xff]   ;;  %p9559_p9 = pnand %p9558_p8, %p9705_p5 }
  0x2f   : > { %5469 = vmatprep.subr.bf16.mxu0 %v10471_v0  ;;  %8958 = vmatprep.subr.bf16.mxu1 %v10471_v0  ;;  %392 = vst [vmem:[#allocation2 + $0x10] sm:$0xff] %v8486_v12  ;;  %1047 = vst [vmem:[#allocation3 + $0x28] sm:$0xf] %v9064_v14  ;;  %v8490_v24 = vunpack.c.l.bf16 %v8740_v23  ;;  %v9075_v26 = vld [vmem:[%s9746_s18 + $0x10] ss:$0 sps:$4 sm:$0xff]   ;;  %v8754_v27 = vld [vmem:[%s9746_s18 + $0x80] sm:$0xff]   ;;  %v8491_v28 = vunpack.c.h.bf16 %v8740_v23  ;;  %p9566_p13 = por %p9565_p12, %p9564_p11 }
  0x30   : > { %393 = vst [vmem:[#allocation2 + $0x18] sm:$0xff] %v8487_v13  ;;  %418 = vst [vmem:[#allocation2 + $0xe0] sm:$0xff] %v8538_v17  ;;  %v8546_v29 = vunpack.c.l.bf16 %v8754_v27  ;;  %v9078_v30 = vld [vmem:[%s9746_s18 + $0x7c] ss:$0 sps:$4 sm:$0xff]   ;;  %v9079_v31 = vld [vmem:[%s9746_s18 + $0x80] ss:$0 sps:$4 sm:$0xff]   ;;  %v8547_v32 = vunpack.c.h.bf16 %v8754_v27  ;;  %p9560_p10 = pneg %p9559_p9 }
  0x31   : > { %419 = vst [vmem:[#allocation2 + $0xe8] sm:$0xff] %v8539_v18  ;;  %420 = vst [vmem:[#allocation2 + $0xf0] sm:$0xff] %v8542_v19  ;;  %v8741_v35 = vld [vmem:[%s9746_s18 + $0x18] sm:$0xff]   ;;  %v9087_v37 = vld [vmem:[%s9746_s18 + $0x14] ss:$0 sps:$4 sm:$0xff]  }
  0x32   : > { %5470 = vmatpush1.bf16.msra.mxu0 %v9050_v4  ;;  %8974 = vmatpush1.bf16.msra.mxu1 %v9050_v4  ;;  %1074 = vst [vmem:[#allocation3 + $0x3f4] sm:$0xf] %v9068_v21  ;;  %1075 = vst [vmem:[#allocation3 + $0x418] sm:$0xf] %v9069_v22  ;;  %v8494_v36 = vunpack.c.l.bf16 %v8741_v35  ;;  %v9088_v38 = vld [vmem:[%s9746_s18 + $0x18] ss:$0 sps:$4 sm:$0xff]   ;;  %v8495_v40 = vunpack.c.h.bf16 %v8741_v35  ;;  %p9567_p0 = pnand %p9566_p13, %p9560_p10 }
  0x33   : > { %5471 = vmatprep.subr.bf16.mxu0 %v10471_v0  ;;  %8959 = vmatprep.subr.bf16.mxu1 %v10471_v0  ;;  %421 = vst [vmem:[#allocation2 + $0xf8] sm:$0xff] %v8543_v20  ;;  %394 = vst [vmem:[#allocation2 + $0x20] sm:$0xff] %v8490_v24  ;;  %v8755_v39 = vld [vmem:[%s9746_s18 + $0x88] sm:$0xff]   ;;  %v9091_v55 = vld [vmem:[%s9746_s18 + $0x84] ss:$0 sps:$4 sm:$0xff]  }
  0x34   : > { %1048 = vst [vmem:[#allocation3 + $0x4c] sm:$0xf] %v9074_v25  ;;  %1049 = vst [vmem:[#allocation3 + $0x70] sm:$0xf] %v9075_v26  ;;  %v8550_v44 = vunpack.c.l.bf16 %v8755_v39  ;;  %v8551_v45 = vunpack.c.h.bf16 %v8755_v39  ;;  %v9092_v56 = vld [vmem:[%s9746_s18 + $0x88] ss:$0 sps:$4 sm:$0xff]  }
  0x35   : > { %395 = vst [vmem:[#allocation2 + $0x28] sm:$0xff] %v8491_v28  ;;  %422 = vst [vmem:[#allocation2 + $0x100] sm:$0xff] %v8546_v29  ;;  %v452_v41 = vld [vmem:[#allocation2 + $0x7] sm:$0xff]  ;;  %v9056_v3 = vld [vmem:[#allocation4 + $0x70] sm:$0xff]  }
  0x36   : > { %5472 = vmatpush1.bf16.msra.mxu0 %v9051_v5  ;;  %8975 = vmatpush1.bf16.msra.mxu1 %v9051_v5  ;;  %1076 = vst [vmem:[#allocation3 + $0x43c] sm:$0xf] %v9078_v30  ;;  %1077 = vst [vmem:[#allocation3 + $0x460] sm:$0xf] %v9079_v31  ;;  %v453_v42 = vld [vmem:[#allocation2 + $0xf] sm:$0xff]  ;;  %v7940_v46 = vpack.c.bf16 %v452_v41, %v452_v41  ;;  %v8742_v4 = vld [vmem:[%s9746_s18 + $0x20] sm:$0xff]  }
  0x37   : > { %5473 = vmatprep.subr.bf16.mxu0 %v10471_v0  ;;  %8960 = vmatprep.subr.bf16.mxu1 %v10471_v0  ;;  %423 = vst [vmem:[#allocation2 + $0x108] sm:$0xff] %v8547_v32  ;;  %v454_v43 = vld [vmem:[#allocation2 + $0x17] sm:$0xff]  ;;  %v7941_v47 = vpack.c.bf16 %v453_v42, %v453_v42  ;;  %396 = vst [vmem:[#allocation2 + $0x30] sm:$0xff] %v8494_v36  ;;  %v8498_v8 = vunpack.c.l.bf16 %v8742_v4  ;;  %v8499_v11 = vunpack.c.h.bf16 %v8742_v4  ;;  %v9104_v17 = vld [vmem:[%s9746_s18 + $0x8c] ss:$0 sps:$4 sm:$0xff]  }
  0x38   : > { %v480_v48 = vld [vmem:[#allocation2 + $0xe7] sm:$0xff]  ;;  %v481_v49 = vld [vmem:[#allocation2 + $0xef] sm:$0xff]  ;;  %v7942_v50 = vpack.c.bf16 %v454_v43, %v454_v43  ;;  %1050 = vst [vmem:[#allocation3 + $0x94] sm:$0xf] %v9087_v37  ;;  %1051 = vst [vmem:[#allocation3 + $0xb8] sm:$0xf] %v9088_v38 }
  0x39   : > { %397 = vst [vmem:[#allocation2 + $0x38] sm:$0xff] %v8495_v40  ;;  %v7968_v52 = vpack.c.bf16 %v480_v48, %v480_v48  ;;  %v7969_v53 = vpack.c.bf16 %v481_v49, %v481_v49  ;;  %424 = vst [vmem:[#allocation2 + $0x110] sm:$0xff] %v8550_v44  ;;  %v9100_v5 = vld [vmem:[%s9746_s18 + $0x1c] ss:$0 sps:$4 sm:$0xff]   ;;  %v8756_v10 = vld [vmem:[%s9746_s18 + $0x90] sm:$0xff]  }
  0x3a   : > { %5474 = vmatpush1.bf16.msra.mxu0 %v9052_v6  ;;  %8976 = vmatpush1.bf16.msra.mxu1 %v9052_v6  ;;  %v482_v51 = vld [vmem:[#allocation2 + $0xf7] sm:$0xff]  ;;  %425 = vst [vmem:[#allocation2 + $0x118] sm:$0xff] %v8551_v45  ;;  %722 = vst [vmem:[#allocation3] sm:$0xf] %v7940_v46  ;;  %v455_v57 = vld [vmem:[#allocation2 + $0x1f] sm:$0xff]  ;;  %v8554_v15 = vunpack.c.l.bf16 %v8756_v10  ;;  %v8555_v18 = vunpack.c.h.bf16 %v8756_v10 }
  0x3b   : > { %5475 = vmatprep.subr.bf16.mxu0 %v10471_v0  ;;  %8961 = vmatprep.subr.bf16.mxu1 %v10471_v0  ;;  %v7970_v54 = vpack.c.bf16 %v482_v51, %v482_v51  ;;  %723 = vst [vmem:[#allocation3 + $0x24] sm:$0xf] %v7941_v47  ;;  %724 = vst [vmem:[#allocation3 + $0x48] sm:$0xf] %v7942_v50  ;;  %v7943_v60 = vpack.c.bf16 %v455_v57, %v455_v57  ;;  %v9101_v6 = vld [vmem:[%s9746_s18 + $0x20] ss:$0 sps:$4 sm:$0xff]  }
  0x3c   : > { %v456_v58 = vld [vmem:[#allocation2 + $0x27] sm:$0xff]  ;;  %750 = vst [vmem:[#allocation3 + $0x3f0] sm:$0xf] %v7968_v52  ;;  %751 = vst [vmem:[#allocation3 + $0x414] sm:$0xf] %v7969_v53  ;;  %v483_v61 = vld [vmem:[#allocation2 + $0xff] sm:$0xff] }
  0x3d   : > { %752 = vst [vmem:[#allocation3 + $0x438] sm:$0xf] %v7970_v54  ;;  %v7944_v62 = vpack.c.bf16 %v456_v58, %v456_v58  ;;  %1078 = vst [vmem:[#allocation3 + $0x484] sm:$0xf] %v9091_v55  ;;  %v7971_v1 = vpack.c.bf16 %v483_v61, %v483_v61  ;;  %v9067_v21 = vld [vmem:[#allocation3 + $0x4] ss:$36 sps:$4 sm:$0xff]  }
  0x3e   : > { %5476 = vmatpush1.bf16.msra.mxu0 %v9053_v33  ;;  %8977 = vmatpush1.bf16.msra.mxu1 %v9053_v33  ;;  %v484_v63 = vld [vmem:[#allocation2 + $0x107] sm:$0xff]  ;;  %1079 = vst [vmem:[#allocation3 + $0x4a8] sm:$0xf] %v9092_v56  ;;  %725 = vst [vmem:[#allocation3 + $0x6c] sm:$0xf] %v7943_v60  ;;  %v457_v7 = vld [vmem:[#allocation2 + $0x2f] sm:$0xff] }
  0x3f   : > { %5477 = vmatprep.subr.bf16.mxu0 %v10471_v0  ;;  %8962 = vmatprep.subr.bf16.mxu1 %v10471_v0  ;;  %v7972_v2 = vpack.c.bf16 %v484_v63, %v484_v63  ;;  %726 = vst [vmem:[#allocation3 + $0x90] sm:$0xf] %v7944_v62  ;;  %753 = vst [vmem:[#allocation3 + $0x45c] sm:$0xf] %v7971_v1  ;;  %v7945_v12 = vpack.c.bf16 %v457_v7, %v457_v7  ;;  %v9057_v22 = vld [vmem:[#allocation4 + $0x68] sm:$0xff]   ;;  %v9058_v24 = vld [vmem:[#allocation4 + $0x60] sm:$0xff]  }
  0x40   : > { %v458_v9 = vld [vmem:[#allocation2 + $0x37] sm:$0xff]  ;;  %v485_v13 = vld [vmem:[#allocation2 + $0x10f] sm:$0xff]  ;;  %1052 = vst [vmem:[#allocation3 + $0xdc] sm:$0xf] %v9100_v5  ;;  %1053 = vst [vmem:[#allocation3 + $0x100] sm:$0xf] %v9101_v6  ;;  %5495 = vmatprep.mubr.bf16.mxu0 %v9067_v21 }
  0x41   : > { %754 = vst [vmem:[#allocation3 + $0x480] sm:$0xf] %v7972_v2  ;;  %v7946_v14 = vpack.c.bf16 %v458_v9, %v458_v9  ;;  %v486_v16 = vld [vmem:[#allocation2 + $0x117] sm:$0xff]  ;;  %v7973_v19 = vpack.c.bf16 %v485_v13, %v485_v13  ;;  %398 = vst [vmem:[#allocation2 + $0x40] sm:$0xff] %v8498_v8  ;;  %v9072_v23 = vld [vmem:[#allocation3 + $0x3f4] ss:$36 sps:$4 sm:$0xff]  }
  0x42   : > { %5478 = vmatpush1.bf16.msra.mxu0 %v9054_v34  ;;  %8978 = vmatpush1.bf16.msra.mxu1 %v9054_v34  ;;  %v7974_v20 = vpack.c.bf16 %v486_v16, %v486_v16  ;;  %399 = vst [vmem:[#allocation2 + $0x48] sm:$0xff] %v8499_v11  ;;  %727 = vst [vmem:[#allocation3 + $0xb4] sm:$0xf] %v7945_v12  ;;  %v9105_v25 = vld [vmem:[%s9746_s18 + $0x90] ss:$0 sps:$4 sm:$0xff]   ;;  %v9059_v28 = vld [vmem:[#allocation4 + $0x58] sm:$0xff]  }
  0x43   : > { %5479 = vmatprep.subr.bf16.mxu0 %v10471_v0  ;;  %8963 = vmatprep.subr.bf16.mxu1 %v10471_v0  ;;  %728 = vst [vmem:[#allocation3 + $0xd8] sm:$0xf] %v7946_v14  ;;  %426 = vst [vmem:[#allocation2 + $0x120] sm:$0xff] %v8554_v15  ;;  %v8743_v31 = vld [vmem:[%s9746_s18 + $0x28] sm:$0xff]   ;;  %v9060_v32 = vld [vmem:[#allocation4 + $0x50] sm:$0xff]  }
  0x44   : > { %1080 = vst [vmem:[#allocation3 + $0x4cc] sm:$0xf] %v9104_v17  ;;  %427 = vst [vmem:[#allocation2 + $0x128] sm:$0xff] %v8555_v18  ;;  %5607 = vmatprep.mubr.bf16.mxu1 %v9072_v23  ;;  %v8502_v33 = vunpack.c.l.bf16 %v8743_v31  ;;  %v9112_v35 = vld [vmem:[%s9746_s18 + $0x24] ss:$0 sps:$4 sm:$0xff]   ;;  %v8503_v37 = vunpack.c.h.bf16 %v8743_v31  ;;  %v8757_v39 = vld [vmem:[%s9746_s18 + $0x98] sm:$0xff]  }
  0x45   : > { %755 = vst [vmem:[#allocation3 + $0x4a4] sm:$0xf] %v7973_v19  ;;  %756 = vst [vmem:[#allocation3 + $0x4c8] sm:$0xf] %v7974_v20  ;;  %v9113_v36 = vld [vmem:[%s9746_s18 + $0x28] ss:$0 sps:$4 sm:$0xff]   ;;  %v8558_v42 = vunpack.c.l.bf16 %v8757_v39  ;;  %v8559_v45 = vunpack.c.h.bf16 %v8757_v39 }
  0x46   : > { %5480 = vmatpush2.bf16.msra.mxu0 %v9055_v59  ;;  %8979 = vmatpush2.bf16.msra.mxu1 %v9055_v59  ;;  %1081 = vst [vmem:[#allocation3 + $0x4f0] sm:$0xf] %v9105_v25  ;;  %v9116_v41 = vld [vmem:[%s9746_s18 + $0x94] ss:$0 sps:$4 sm:$0xff]   ;;  %400 = vst [vmem:[#allocation2 + $0x50] sm:$0xff] %v8502_v33  ;;  %v8758_v52 = vld [vmem:[%s9746_s18 + $0xa0] sm:$0xff]  }
  0x47   : > { %5481 = vmatprep.subr.bf16.mxu0 %v10471_v0  ;;  %8964 = vmatprep.subr.bf16.mxu1 %v10471_v0  ;;  %1054 = vst [vmem:[#allocation3 + $0x124] sm:$0xf] %v9112_v35  ;;  %1055 = vst [vmem:[#allocation3 + $0x148] sm:$0xf] %v9113_v36  ;;  %v9117_v44 = vld [vmem:[%s9746_s18 + $0x98] ss:$0 sps:$4 sm:$0xff]   ;;  %v8562_v54 = vunpack.c.l.bf16 %v8758_v52  ;;  %v8563_v56 = vunpack.c.h.bf16 %v8758_v52 }
  0x48   : > { %v459_v26 = vld [vmem:[#allocation2 + $0x3f] sm:$0xff]  ;;  %401 = vst [vmem:[#allocation2 + $0x58] sm:$0xff] %v8503_v37  ;;  %1082 = vst [vmem:[#allocation3 + $0x514] sm:$0xf] %v9116_v41  ;;  %v8744_v46 = vld [vmem:[%s9746_s18 + $0x30] sm:$0xff]  }
  0x49   : > { %v7947_v27 = vpack.c.bf16 %v459_v26, %v459_v26  ;;  %v460_v34 = vld [vmem:[#allocation2 + $0x47] sm:$0xff]  ;;  %428 = vst [vmem:[#allocation2 + $0x130] sm:$0xff] %v8558_v42  ;;  %1083 = vst [vmem:[#allocation3 + $0x538] sm:$0xf] %v9117_v44  ;;  %v9061_v48 = vld [vmem:[#allocation4 + $0x48] sm:$0xff]   ;;  %v8506_v49 = vunpack.c.l.bf16 %v8744_v46  ;;  %v8507_v50 = vunpack.c.h.bf16 %v8744_v46 }
  0x4a   : > { %5482 = vmatpush2.bf16.msra.mxu0 %v9056_v3  ;;  %8980 = vmatpush2.bf16.msra.mxu1 %v9056_v3  ;;  %v487_v29 = vld [vmem:[#allocation2 + $0x11f] sm:$0xff]  ;;  %v7948_v38 = vpack.c.bf16 %v460_v34, %v460_v34  ;;  %v9124_v47 = vld [vmem:[%s9746_s18 + $0x2c] ss:$0 sps:$4 sm:$0xff]   ;;  %429 = vst [vmem:[#allocation2 + $0x138] sm:$0xff] %v8559_v45  ;;  %v9125_v51 = vld [vmem:[%s9746_s18 + $0x30] ss:$0 sps:$4 sm:$0xff]  }
  0x4b   : > { %5483 = vmatprep.subr.bf16.mxu0 %v10471_v0  ;;  %8965 = vmatprep.subr.bf16.mxu1 %v10471_v0  ;;  %729 = vst [vmem:[#allocation3 + $0xfc] sm:$0xf] %v7947_v27  ;;  %v7975_v30 = vpack.c.bf16 %v487_v29, %v487_v29  ;;  %v488_v40 = vld [vmem:[#allocation2 + $0x127] sm:$0xff]  ;;  %1056 = vst [vmem:[#allocation3 + $0x16c] sm:$0xf] %v9124_v47  ;;  %v8745_v9 = vld [vmem:[%s9746_s18 + $0x38] sm:$0xff]  }
  0x4c   : > { %v7976_v43 = vpack.c.bf16 %v488_v40, %v488_v40  ;;  %730 = vst [vmem:[#allocation3 + $0x120] sm:$0xf] %v7948_v38  ;;  %v9128_v53 = vld [vmem:[%s9746_s18 + $0x9c] ss:$0 sps:$4 sm:$0xff]   ;;  %402 = vst [vmem:[#allocation2 + $0x60] sm:$0xff] %v8506_v49  ;;  %v9062_v57 = vld [vmem:[#allocation4 + $0x40] sm:$0xff]   ;;  %v8510_v12 = vunpack.c.l.bf16 %v8745_v9  ;;  %v8511_v15 = vunpack.c.h.bf16 %v8745_v9 }
  0x4d   : > { %757 = vst [vmem:[#allocation3 + $0x4ec] sm:$0xf] %v7975_v30  ;;  %v9129_v55 = vld [vmem:[%s9746_s18 + $0xa0] ss:$0 sps:$4 sm:$0xff]   ;;  %403 = vst [vmem:[#allocation2 + $0x68] sm:$0xff] %v8507_v50  ;;  %v461_v58 = vld [vmem:[#allocation2 + $0x4f] sm:$0xff] }
  0x4e   : > { %5484 = vmatpush2.bf16.msra.mxu0 %v9057_v22  ;;  %8981 = vmatpush2.bf16.msra.mxu1 %v9057_v22  ;;  %758 = vst [vmem:[#allocation3 + $0x510] sm:$0xf] %v7976_v43  ;;  %1057 = vst [vmem:[#allocation3 + $0x190] sm:$0xf] %v9125_v51  ;;  %v7949_v60 = vpack.c.bf16 %v461_v58, %v461_v58  ;;  %v9065_v62 = vld [vmem:[#allocation3] ss:$36 sps:$4 sm:$0xff]  }
  0x4f   : > { %5485 = vmatprep.subr.bf16.mxu0 %v10471_v0  ;;  %8966 = vmatprep.subr.bf16.mxu1 %v10471_v0  ;;  %1084 = vst [vmem:[#allocation3 + $0x55c] sm:$0xf] %v9128_v53  ;;  %v462_v59 = vld [vmem:[#allocation2 + $0x57] sm:$0xff]  ;;  %430 = vst [vmem:[#allocation2 + $0x140] sm:$0xff] %v8562_v54  ;;  %v9070_v63 = vld [vmem:[#allocation3 + $0x3f0] ss:$36 sps:$4 sm:$0xff]  }
  0x50   : > { %1085 = vst [vmem:[#allocation3 + $0x580] sm:$0xf] %v9129_v55  ;;  %431 = vst [vmem:[#allocation2 + $0x148] sm:$0xff] %v8563_v56  ;;  %v7950_v61 = vpack.c.bf16 %v462_v59, %v462_v59  ;;  %v489_v1 = vld [vmem:[#allocation2 + $0x12f] sm:$0xff]  ;;  %v9073_v3 = vld [vmem:[#allocation4 + $0x138] sm:$0xff]  }
  0x51   : > { %v490_v2 = vld [vmem:[#allocation2 + $0x137] sm:$0xff]  ;;  %731 = vst [vmem:[#allocation3 + $0x144] sm:$0xf] %v7949_v60  ;;  %v7977_v5 = vpack.c.bf16 %v489_v1, %v489_v1  ;;  %v9080_v7 = vld [vmem:[#allocation3 + $0x43c] ss:$36 sps:$4 sm:$0xff]   ;;  %v9082_v8 = vld [vmem:[#allocation4 + $0xb8] sm:$0xff]  }
  0x52   : > { %5486 = vmatpush2.bf16.msra.mxu0 %v9058_v24  ;;  %8982 = vmatpush2.bf16.msra.mxu1 %v9058_v24  ;;  %v9076_v4 = vld [vmem:[#allocation3 + $0x4c] ss:$36 sps:$4 sm:$0xff]   ;;  %732 = vst [vmem:[#allocation3 + $0x168] sm:$0xf] %v7950_v61  ;;  %v7978_v6 = vpack.c.bf16 %v490_v2, %v490_v2  ;;  %v9137_v10 = vld [vmem:[%s9746_s18 + $0x34] ss:$0 sps:$4 sm:$0xff]  }
  0x53   : > { %5487 = vmatprep.subr.bf16.mxu0 %v10471_v0  ;;  %8967 = vmatprep.subr.bf16.mxu1 %v10471_v0  ;;  %759 = vst [vmem:[#allocation3 + $0x534] sm:$0xf] %v7977_v5  ;;  %v463_v11 = vld [vmem:[#allocation2 + $0x5f] sm:$0xff]  ;;  %v9138_v14 = vld [vmem:[%s9746_s18 + $0x38] ss:$0 sps:$4 sm:$0xff]   ;;  %v8759_v18 = vld [vmem:[%s9746_s18 + $0xa8] sm:$0xff]  }
  0x54   : > { %760 = vst [vmem:[#allocation3 + $0x558] sm:$0xf] %v7978_v6  ;;  %v464_v13 = vld [vmem:[#allocation2 + $0x67] sm:$0xff]  ;;  %v7951_v16 = vpack.c.bf16 %v463_v11, %v463_v11  ;;  %1058 = vst [vmem:[#allocation3 + $0x1b4] sm:$0xf] %v9137_v10  ;;  %v8566_v22 = vunpack.c.l.bf16 %v8759_v18  ;;  %v8567_v24 = vunpack.c.h.bf16 %v8759_v18  ;;  %v9085_v25 = vld [vmem:[#allocation4 + $0x130] sm:$0xff]  }
  0x55   : > { %v7952_v17 = vpack.c.bf16 %v464_v13, %v464_v13  ;;  %v9141_v19 = vld [vmem:[%s9746_s18 + $0xa4] ss:$0 sps:$4 sm:$0xff]   ;;  %v9142_v20 = vld [vmem:[%s9746_s18 + $0xa8] ss:$0 sps:$4 sm:$0xff]   ;;  %404 = vst [vmem:[#allocation2 + $0x70] sm:$0xff] %v8510_v12  ;;  %405 = vst [vmem:[#allocation2 + $0x78] sm:$0xff] %v8511_v15 }
  0x56   : > { %5488 = vmatpush2.bf16.msra.mxu0 %v9059_v28  ;;  %8983 = vmatpush2.bf16.msra.mxu1 %v9059_v28  ;;  %v491_v21 = vld [vmem:[#allocation2 + $0x13f] sm:$0xff]  ;;  %1059 = vst [vmem:[#allocation3 + $0x1d8] sm:$0xf] %v9138_v14  ;;  %733 = vst [vmem:[#allocation3 + $0x18c] sm:$0xf] %v7951_v16  ;;  %v9095_v38 = vld [vmem:[#allocation4 + $0x128] sm:$0xff]  }
  0x57   : > { %5489 = vmatprep.subr.bf16.mxu0 %v10471_v0  ;;  %8968 = vmatprep.subr.bf16.mxu1 %v10471_v0  ;;  %v492_v23 = vld [vmem:[#allocation2 + $0x147] sm:$0xff]  ;;  %v7979_v26 = vpack.c.bf16 %v491_v21, %v491_v21  ;;  %734 = vst [vmem:[#allocation3 + $0x1b0] sm:$0xf] %v7952_v17  ;;  %1086 = vst [vmem:[#allocation3 + $0x5a4] sm:$0xf] %v9141_v19  ;;  %v9086_v28 = vld [vmem:[#allocation4 + $0xb0] sm:$0xff]  }
  0x58   : > { %v7980_v27 = vpack.c.bf16 %v492_v23, %v492_v23  ;;  %1087 = vst [vmem:[#allocation3 + $0x5c8] sm:$0xf] %v9142_v20  ;;  %432 = vst [vmem:[#allocation2 + $0x150] sm:$0xff] %v8566_v22  ;;  %v8746_v29 = vld [vmem:[%s9746_s18 + $0x40] sm:$0xff]   ;;  %v9083_v30 = vld [vmem:[#allocation3 + $0x48] ss:$36 sps:$4 sm:$0xff]  }
  0x59   : > { %433 = vst [vmem:[#allocation2 + $0x158] sm:$0xff] %v8567_v24  ;;  %v9084_v31 = vld [vmem:[#allocation3 + $0x438] ss:$36 sps:$4 sm:$0xff]   ;;  %761 = vst [vmem:[#allocation3 + $0x57c] sm:$0xf] %v7979_v26  ;;  %v8515_v33 = vunpack.c.h.bf16 %v8746_v29  ;;  %v9098_v39 = vld [vmem:[#allocation4 + $0xa8] sm:$0xff]  }
  0x5a   : > { %5490 = vmatpush2.bf16.msra.mxu0 %v9060_v32  ;;  %8984 = vmatpush2.bf16.msra.mxu1 %v9060_v32  ;;  %762 = vst [vmem:[#allocation3 + $0x5a0] sm:$0xf] %v7980_v27  ;;  %v8514_v32 = vunpack.c.l.bf16 %v8746_v29  ;;  %v9149_v34 = vld [vmem:[%s9746_s18 + $0x3c] ss:$0 sps:$4 sm:$0xff]   ;;  %v9150_v35 = vld [vmem:[%s9746_s18 + $0x40] ss:$0 sps:$4 sm:$0xff]  }
  0x5b   : > { %5491 = vmatprep.subr.bf16.mxu0 %v10471_v0  ;;  %8969 = vmatprep.subr.bf16.mxu1 %v10471_v0  ;;  %v9089_v36 = vld [vmem:[#allocation3 + $0x94] ss:$36 sps:$4 sm:$0xff]   ;;  %v9093_v37 = vld [vmem:[#allocation3 + $0x484] ss:$36 sps:$4 sm:$0xff]   ;;  %407 = vst [vmem:[#allocation2 + $0x88] sm:$0xff] %v8515_v33 }
  0x5c   : > { %406 = vst [vmem:[#allocation2 + $0x80] sm:$0xff] %v8514_v32  ;;  %1060 = vst [vmem:[#allocation3 + $0x1fc] sm:$0xf] %v9149_v34  ;;  %v8760_v40 = vld [vmem:[%s9746_s18 + $0xb0] sm:$0xff]   ;;  %v9153_v41 = vld [vmem:[%s9746_s18 + $0xac] ss:$0 sps:$4 sm:$0xff]  }
  0x5d   : > { %1061 = vst [vmem:[#allocation3 + $0x220] sm:$0xf] %v9150_v35  ;;  %v465_v42 = vld [vmem:[#allocation2 + $0x6f] sm:$0xff]  ;;  %v466_v43 = vld [vmem:[#allocation2 + $0x77] sm:$0xff]  ;;  %v8570_v44 = vunpack.c.l.bf16 %v8760_v40  ;;  %v8571_v46 = vunpack.c.h.bf16 %v8760_v40  ;;  %1088 = vst [vmem:[#allocation3 + $0x5ec] sm:$0xf] %v9153_v41 }
  0x5e   : > { %5492 = vmatpush2.bf16.msra.mxu0 %v9061_v48  ;;  %8985 = vmatpush2.bf16.msra.mxu1 %v9061_v48  ;;  %v9154_v45 = vld [vmem:[%s9746_s18 + $0xb0] ss:$0 sps:$4 sm:$0xff]   ;;  %v7953_v47 = vpack.c.bf16 %v465_v42, %v465_v42  ;;  %v7954_v48 = vpack.c.bf16 %v466_v43, %v466_v43  ;;  %v9099_v51 = vld [vmem:[#allocation4 + $0x120] sm:$0xff]   ;;  %v9096_v55 = vld [vmem:[#allocation3 + $0x90] ss:$36 sps:$4 sm:$0xff]  }
  0x5f   : > { %5493 = vmatprep.subr.bf16.mxu0 %v10471_v0  ;;  %8970 = vmatprep.subr.bf16.mxu1 %v10471_v0  ;;  %v493_v49 = vld [vmem:[#allocation2 + $0x14f] sm:$0xff]  ;;  %434 = vst [vmem:[#allocation2 + $0x160] sm:$0xff] %v8570_v44  ;;  %1089 = vst [vmem:[#allocation3 + $0x610] sm:$0xf] %v9154_v45  ;;  %v9106_v59 = vld [vmem:[#allocation3 + $0x4cc] ss:$36 sps:$4 sm:$0xff]  }
  0x60   : > { %v494_v50 = vld [vmem:[#allocation2 + $0x157] sm:$0xff]  ;;  %435 = vst [vmem:[#allocation2 + $0x168] sm:$0xff] %v8571_v46  ;;  %v9110_v52 = vld [vmem:[#allocation4 + $0xa0] sm:$0xff]   ;;  %735 = vst [vmem:[#allocation3 + $0x1d4] sm:$0xf] %v7953_v47  ;;  %v7981_v53 = vpack.c.bf16 %v493_v49, %v493_v49 }
  0x61   : > { %736 = vst [vmem:[#allocation3 + $0x1f8] sm:$0xf] %v7954_v48  ;;  %v7982_v54 = vpack.c.bf16 %v494_v50, %v494_v50  ;;  %v9097_v56 = vld [vmem:[#allocation3 + $0x480] ss:$36 sps:$4 sm:$0xff]   ;;  %v9111_v60 = vld [vmem:[#allocation4 + $0x118] sm:$0xff]   ;;  %v9123_v16 = vld [vmem:[#allocation4 + $0x110] sm:$0xff]  }
  0x62   : > { %5494 = vmatpush2.bf16.msra.mxu0 %v9062_v57  ;;  %8986 = vmatpush2.bf16.msra.mxu1 %v9062_v57  ;;  %v9102_v57 = vld [vmem:[#allocation3 + $0xdc] ss:$36 sps:$4 sm:$0xff]   ;;  %763 = vst [vmem:[#allocation3 + $0x5c4] sm:$0xf] %v7981_v53  ;;  %v9122_v61 = vld [vmem:[#allocation4 + $0x98] sm:$0xff]   ;;  %v9134_v19 = vld [vmem:[#allocation4 + $0x90] sm:$0xff]  }
  0x63   : > { %5961 = vmatprep.subr.bf16.mxu0 %v10471_v0  ;;  %5712 = vmatprep.subr.bf16.mxu1 %v10471_v0  ;;  %v467_v58 = vld [vmem:[#allocation2 + $0x7f] sm:$0xff]  ;;  %764 = vst [vmem:[#allocation3 + $0x5e8] sm:$0xf] %v7982_v54  ;;  %v468_v2 = vld [vmem:[#allocation2 + $0x87] sm:$0xff]  ;;  %v9166_v9 = vld [vmem:[%s9746_s18 + $0xb8] ss:$0 sps:$4 sm:$0xff]  }
  0x64   : > { %v7956_v6 = vpack.c.bf16 %v468_v2, %v468_v2  ;;  %1091 = vst [vmem:[#allocation3 + $0x658] sm:$0xf] %v9166_v9  ;;  %v9108_v17 = vld [vmem:[#allocation3 + $0xd8] ss:$36 sps:$4 sm:$0xff]   ;;  %v9109_v18 = vld [vmem:[#allocation3 + $0x4c8] ss:$36 sps:$4 sm:$0xff]  }
  0x65   : > { %5496 = vmatmul.mubr.bf16.vlgmr.msra.gmra.mxu0 %v9065_v62  ;;  %5608 = vmatmul.mubr.bf16.vlgmr.msra.gmra.mxu1 %v9070_v63  ;;  %v7955_v62 = vpack.c.bf16 %v467_v58, %v467_v58  ;;  %v8747_v63 = vld [vmem:[%s9746_s18 + $0x48] sm:$0xff]   ;;  %v9135_v20 = vld [vmem:[#allocation4 + $0x108] sm:$0xff]   ;;  %v8762_v33 = vld [vmem:[%s9746_s18 + $0xc0] sm:$0xff]  }
  0x66   : > { %5962 = vmatpush1.bf16.msra.mxu0 %v9073_v3  ;;  %5503 = vmatprep.mubr.bf16.mxu0 %v9076_v4  ;;  %v8518_v1 = vunpack.c.l.bf16 %v8747_v63  ;;  %v9161_v3 = vld [vmem:[%s9746_s18 + $0x44] ss:$0 sps:$4 sm:$0xff]   ;;  %v9162_v4 = vld [vmem:[%s9746_s18 + $0x48] ss:$0 sps:$4 sm:$0xff]   ;;  %v8519_v5 = vunpack.c.h.bf16 %v8747_v63  ;;  %738 = vst [vmem:[#allocation3 + $0x240] sm:$0xf] %v7956_v6 }
  0x67   : > { %5615 = vmatprep.mubr.bf16.mxu1 %v9080_v7  ;;  %5713 = vmatpush1.bf16.msra.mxu1 %v9082_v8  ;;  %737 = vst [vmem:[#allocation3 + $0x21c] sm:$0xf] %v7955_v62  ;;  %v8761_v7 = vld [vmem:[%s9746_s18 + $0xb8] sm:$0xff]   ;;  %v9165_v8 = vld [vmem:[%s9746_s18 + $0xb4] ss:$0 sps:$4 sm:$0xff]   ;;  %v496_v12 = vld [vmem:[#allocation2 + $0x167] sm:$0xff] }
  0x68   : > { %5963 = vmatprep.subr.bf16.mxu0 %v10471_v0  ;;  %5714 = vmatprep.subr.bf16.mxu1 %v10471_v0  ;;  %v495_v10 = vld [vmem:[#allocation2 + $0x15f] sm:$0xff]  ;;  %408 = vst [vmem:[#allocation2 + $0x90] sm:$0xff] %v8518_v1  ;;  %1062 = vst [vmem:[#allocation3 + $0x244] sm:$0xf] %v9161_v3  ;;  %v8574_v11 = vunpack.c.l.bf16 %v8761_v7  ;;  %v8575_v13 = vunpack.c.h.bf16 %v8761_v7  ;;  %v7984_v15 = vpack.c.bf16 %v496_v12, %v496_v12  ;;  %v9136_v21 = vld [vmem:[#allocation4 + $0x88] sm:$0xff]  }
  0x69   : > { %1063 = vst [vmem:[#allocation3 + $0x268] sm:$0xf] %v9162_v4  ;;  %409 = vst [vmem:[#allocation2 + $0x98] sm:$0xff] %v8519_v5  ;;  %v7983_v14 = vpack.c.bf16 %v495_v10, %v495_v10  ;;  %v8748_v22 = vld [vmem:[%s9746_s18 + $0x50] sm:$0xff]   ;;  %v9173_v23 = vld [vmem:[%s9746_s18 + $0x4c] ss:$0 sps:$4 sm:$0xff]  }
  0x6a   : > { %5964 = vmatpush1.bf16.msra.mxu0 %v9085_v25  ;;  %1090 = vst [vmem:[#allocation3 + $0x634] sm:$0xf] %v9165_v8  ;;  %436 = vst [vmem:[#allocation2 + $0x170] sm:$0xff] %v8574_v11  ;;  %v9114_v24 = vld [vmem:[#allocation3 + $0x124] ss:$36 sps:$4 sm:$0xff]   ;;  %v8522_v26 = vunpack.c.l.bf16 %v8748_v22  ;;  %v8523_v27 = vunpack.c.h.bf16 %v8748_v22  ;;  %v9147_v40 = vld [vmem:[#allocation4 + $0x100] sm:$0xff]  }
  0x6b   : > { %5715 = vmatpush1.bf16.msra.mxu1 %v9086_v28  ;;  %5965 = vmatprep.subr.bf16.mxu0 %v10471_v0  ;;  %437 = vst [vmem:[#allocation2 + $0x178] sm:$0xff] %v8575_v13  ;;  %765 = vst [vmem:[#allocation3 + $0x60c] sm:$0xf] %v7983_v14  ;;  %v9118_v25 = vld [vmem:[#allocation3 + $0x514] ss:$36 sps:$4 sm:$0xff]   ;;  %v8749_v50 = vld [vmem:[%s9746_s18 + $0x58] sm:$0xff]  }
  0x6c   : > { %5716 = vmatprep.subr.bf16.mxu1 %v10471_v0  ;;  %766 = vst [vmem:[#allocation3 + $0x630] sm:$0xf] %v7984_v15  ;;  %1064 = vst [vmem:[#allocation3 + $0x28c] sm:$0xf] %v9173_v23  ;;  %v9177_v34 = vld [vmem:[%s9746_s18 + $0xbc] ss:$0 sps:$4 sm:$0xff]   ;;  %v8526_v53 = vunpack.c.l.bf16 %v8749_v50 }
  0x6d   : > { %5504 = vmatmul.mubr.bf16.gmra.mxu0 %v9083_v30  ;;  %5616 = vmatmul.mubr.bf16.gmra.mxu1 %v9084_v31  ;;  %v9174_v30 = vld [vmem:[%s9746_s18 + $0x50] ss:$0 sps:$4 sm:$0xff]   ;;  %410 = vst [vmem:[#allocation2 + $0xa0] sm:$0xff] %v8522_v26  ;;  %411 = vst [vmem:[#allocation2 + $0xa8] sm:$0xff] %v8523_v27  ;;  %v9148_v41 = vld [vmem:[#allocation4 + $0x80] sm:$0xff]  }
  0x6e   : > { %5511 = vmatprep.mubr.bf16.mxu0 %v9089_v36  ;;  %5623 = vmatprep.mubr.bf16.mxu1 %v9093_v37  ;;  %1065 = vst [vmem:[#allocation3 + $0x2b0] sm:$0xf] %v9174_v30  ;;  %v8578_v36 = vunpack.c.l.bf16 %v8762_v33  ;;  %1092 = vst [vmem:[#allocation3 + $0x67c] sm:$0xf] %v9177_v34  ;;  %v9120_v44 = vld [vmem:[#allocation3 + $0x120] ss:$36 sps:$4 sm:$0xff]  }
  0x6f   : > { %5966 = vmatpush1.bf16.msra.mxu0 %v9095_v38  ;;  %5717 = vmatpush1.bf16.msra.mxu1 %v9098_v39  ;;  %v469_v28 = vld [vmem:[#allocation2 + $0x8f] sm:$0xff]  ;;  %v9178_v38 = vld [vmem:[%s9746_s18 + $0xc0] ss:$0 sps:$4 sm:$0xff]   ;;  %v8579_v39 = vunpack.c.h.bf16 %v8762_v33  ;;  %412 = vst [vmem:[#allocation2 + $0xb0] sm:$0xff] %v8526_v53  ;;  %v9132_v3 = vld [vmem:[#allocation3 + $0x168] ss:$36 sps:$4 sm:$0xff]  }
  0x70   : > { %5967 = vmatprep.subr.bf16.mxu0 %v10471_v0  ;;  %5718 = vmatprep.subr.bf16.mxu1 %v10471_v0  ;;  %v470_v29 = vld [vmem:[#allocation2 + $0x97] sm:$0xff]  ;;  %v7957_v31 = vpack.c.bf16 %v469_v28, %v469_v28  ;;  %v9121_v45 = vld [vmem:[#allocation3 + $0x510] ss:$36 sps:$4 sm:$0xff]   ;;  %438 = vst [vmem:[#allocation2 + $0x180] sm:$0xff] %v8578_v36  ;;  %1093 = vst [vmem:[#allocation3 + $0x6a0] sm:$0xf] %v9178_v38 }
  0x71   : > { %v7958_v32 = vpack.c.bf16 %v470_v29, %v470_v29  ;;  %v497_v35 = vld [vmem:[#allocation2 + $0x16f] sm:$0xff]  ;;  %439 = vst [vmem:[#allocation2 + $0x188] sm:$0xff] %v8579_v39  ;;  %v9126_v46 = vld [vmem:[#allocation3 + $0x16c] ss:$36 sps:$4 sm:$0xff]   ;;  %v9139_v9 = vld [vmem:[#allocation3 + $0x1b4] ss:$36 sps:$4 sm:$0xff]  }
  0x72   : > { %v498_v37 = vld [vmem:[#allocation2 + $0x177] sm:$0xff]  ;;  %739 = vst [vmem:[#allocation3 + $0x264] sm:$0xf] %v7957_v31  ;;  %v7985_v42 = vpack.c.bf16 %v497_v35, %v497_v35  ;;  %v9130_v47 = vld [vmem:[#allocation3 + $0x55c] ss:$36 sps:$4 sm:$0xff]   ;;  %v9159_v48 = vld [vmem:[#allocation4 + $0x178] sm:$0xff]  }
  0x73   : > { %5968 = vmatpush1.bf16.msra.mxu0 %v9099_v51  ;;  %5719 = vmatpush1.bf16.msra.mxu1 %v9110_v52  ;;  %740 = vst [vmem:[#allocation3 + $0x288] sm:$0xf] %v7958_v32  ;;  %v7986_v43 = vpack.c.bf16 %v498_v37, %v498_v37  ;;  %v9160_v49 = vld [vmem:[#allocation4 + $0xf8] sm:$0xff]   ;;  %v9186_v51 = vld [vmem:[%s9746_s18 + $0x54] ss:$0 sps:$4 sm:$0xff]   ;;  %v9171_v5 = vld [vmem:[#allocation4 + $0x170] sm:$0xff]  }
  0x74   : > { %5969 = vmatprep.subr.bf16.mxu0 %v10471_v0  ;;  %5720 = vmatprep.subr.bf16.mxu1 %v10471_v0  ;;  %767 = vst [vmem:[#allocation3 + $0x654] sm:$0xf] %v7985_v42  ;;  %v471_v52 = vld [vmem:[#allocation2 + $0x9f] sm:$0xff]  ;;  %v472_v54 = vld [vmem:[#allocation2 + $0xa7] sm:$0xff]  ;;  %1066 = vst [vmem:[#allocation3 + $0x2d4] sm:$0xf] %v9186_v51 }
  0x75   : > { %5512 = vmatmul.mubr.bf16.gmra.mxu0 %v9096_v55  ;;  %5624 = vmatmul.mubr.bf16.gmra.mxu1 %v9097_v56  ;;  %768 = vst [vmem:[#allocation3 + $0x678] sm:$0xf] %v7986_v43  ;;  %v9187_v55 = vld [vmem:[%s9746_s18 + $0x58] ss:$0 sps:$4 sm:$0xff]   ;;  %v8527_v56 = vunpack.c.h.bf16 %v8749_v50  ;;  %v7960_v58 = vpack.c.bf16 %v472_v54, %v472_v54  ;;  %v9133_v4 = vld [vmem:[#allocation3 + $0x558] ss:$36 sps:$4 sm:$0xff]  }
  0x76   : > { %5519 = vmatprep.mubr.bf16.mxu0 %v9102_v57  ;;  %5631 = vmatprep.mubr.bf16.mxu1 %v9106_v59  ;;  %v7959_v57 = vpack.c.bf16 %v471_v52, %v471_v52  ;;  %v8763_v59 = vld [vmem:[%s9746_s18 + $0xc8] sm:$0xff]   ;;  %1067 = vst [vmem:[#allocation3 + $0x2f8] sm:$0xf] %v9187_v55  ;;  %v9172_v6 = vld [vmem:[#allocation4 + $0xf0] sm:$0xff]   ;;  %v9181_v11 = vld [vmem:[#allocation4 + $0x168] sm:$0xff]  }
  0x77   : > { %5970 = vmatpush1.bf16.msra.mxu0 %v9111_v60  ;;  %5721 = vmatpush1.bf16.msra.mxu1 %v9122_v61  ;;  %v9190_v60 = vld [vmem:[%s9746_s18 + $0xc4] ss:$0 sps:$4 sm:$0xff]   ;;  %v9191_v61 = vld [vmem:[%s9746_s18 + $0xc8] ss:$0 sps:$4 sm:$0xff]   ;;  %v8582_v62 = vunpack.c.l.bf16 %v8763_v59  ;;  %413 = vst [vmem:[#allocation2 + $0xb8] sm:$0xff] %v8527_v56  ;;  %v8583_v63 = vunpack.c.h.bf16 %v8763_v59  ;;  %v9184_v12 = vld [vmem:[#allocation4 + $0xe8] sm:$0xff]  }
  0x78   : > { %5971 = vmatprep.subr.bf16.mxu0 %v10471_v0  ;;  %5722 = vmatprep.subr.bf16.mxu1 %v10471_v0  ;;  %741 = vst [vmem:[#allocation3 + $0x2ac] sm:$0xf] %v7959_v57  ;;  %v499_v1 = vld [vmem:[#allocation2 + $0x17f] sm:$0xff]  ;;  %742 = vst [vmem:[#allocation3 + $0x2d0] sm:$0xf] %v7960_v58  ;;  %v500_v2 = vld [vmem:[#allocation2 + $0x187] sm:$0xff] }
  0x79   : > { %1094 = vst [vmem:[#allocation3 + $0x6c4] sm:$0xf] %v9190_v60  ;;  %1095 = vst [vmem:[#allocation3 + $0x6e8] sm:$0xf] %v9191_v61  ;;  %v7987_v7 = vpack.c.bf16 %v499_v1, %v499_v1  ;;  %v7988_v8 = vpack.c.bf16 %v500_v2, %v500_v2  ;;  %v9143_v10 = vld [vmem:[#allocation3 + $0x5a4] ss:$36 sps:$4 sm:$0xff]  }
  0x7a   : > { %1711 = vst [vmem:[#allocation3 + $0x270] sm:$0xf] %v7960_v58  ;;  %440 = vst [vmem:[#allocation2 + $0x190] sm:$0xff] %v8582_v62  ;;  %v8750_v13 = vld [vmem:[%s9746_s18 + $0x60] sm:$0xff]   ;;  %v9199_v14 = vld [vmem:[%s9746_s18 + $0x5c] ss:$0 sps:$4 sm:$0xff]  }
  0x7b   : > { %5972 = vmatpush1.bf16.msra.mxu0 %v9123_v16  ;;  %5723 = vmatpush1.bf16.msra.mxu1 %v9134_v19  ;;  %441 = vst [vmem:[#allocation2 + $0x198] sm:$0xff] %v8583_v63  ;;  %769 = vst [vmem:[#allocation3 + $0x69c] sm:$0xf] %v7987_v7  ;;  %v473_v15 = vld [vmem:[#allocation2 + $0xaf] sm:$0xff]  ;;  %v8530_v16 = vunpack.c.l.bf16 %v8750_v13  ;;  %v8531_v19 = vunpack.c.h.bf16 %v8750_v13  ;;  %v9145_v26 = vld [vmem:[#allocation3 + $0x1b0] ss:$36 sps:$4 sm:$0xff]  }
  0x7c   : > { %5973 = vmatprep.subr.bf16.mxu0 %v10471_v0  ;;  %5724 = vmatprep.subr.bf16.mxu1 %v10471_v0  ;;  %770 = vst [vmem:[#allocation3 + $0x6c0] sm:$0xf] %v7988_v8  ;;  %v9194_v22 = vld [vmem:[#allocation4 + $0xe0] sm:$0xff]   ;;  %1068 = vst [vmem:[#allocation3 + $0x31c] sm:$0xf] %v9199_v14  ;;  %v9197_v37 = vld [vmem:[#allocation4 + $0xd8] sm:$0xff]  }
  0x7d   : > { %5520 = vmatmul.mubr.bf16.gmra.mxu0 %v9108_v17  ;;  %5632 = vmatmul.mubr.bf16.gmra.mxu1 %v9109_v18  ;;  %v9200_v18 = vld [vmem:[%s9746_s18 + $0x60] ss:$0 sps:$4 sm:$0xff]   ;;  %414 = vst [vmem:[#allocation2 + $0xc0] sm:$0xff] %v8530_v16  ;;  %415 = vst [vmem:[#allocation2 + $0xc8] sm:$0xff] %v8531_v19  ;;  %v9146_v27 = vld [vmem:[#allocation3 + $0x5a0] ss:$36 sps:$4 sm:$0xff]  }
  0x7e   : > { %5527 = vmatprep.mubr.bf16.mxu0 %v9114_v24  ;;  %5639 = vmatprep.mubr.bf16.mxu1 %v9118_v25  ;;  %v474_v17 = vld [vmem:[#allocation2 + $0xb7] sm:$0xff]  ;;  %1069 = vst [vmem:[#allocation3 + $0x340] sm:$0xf] %v9200_v18  ;;  %v9203_v31 = vld [vmem:[%s9746_s18 + $0xcc] ss:$0 sps:$4 sm:$0xff]   ;;  %v9198_v38 = vld [vmem:[#allocation4 + $0x158] sm:$0xff]  }
  0x7f   : > { %5974 = vmatpush1.bf16.msra.mxu0 %v9135_v20  ;;  %5725 = vmatpush1.bf16.msra.mxu1 %v9136_v21  ;;  %v9185_v20 = vld [vmem:[#allocation4 + $0x160] sm:$0xff]   ;;  %v7961_v21 = vpack.c.bf16 %v473_v15, %v473_v15  ;;  %v7962_v23 = vpack.c.bf16 %v474_v17, %v474_v17  ;;  %v8764_v25 = vld [vmem:[%s9746_s18 + $0xd0] sm:$0xff]   ;;  %v9155_v35 = vld [vmem:[#allocation3 + $0x5ec] ss:$36 sps:$4 sm:$0xff]   ;;  %1096 = vst [vmem:[#allocation3 + $0x70c] sm:$0xf] %v9203_v31 }
  0x80   : > { %5975 = vmatprep.subr.bf16.mxu0 %v10471_v0  ;;  %5726 = vmatprep.subr.bf16.mxu1 %v10471_v0  ;;  %v8586_v29 = vunpack.c.l.bf16 %v8764_v25  ;;  %v9204_v32 = vld [vmem:[%s9746_s18 + $0xd0] ss:$0 sps:$4 sm:$0xff]   ;;  %v8587_v33 = vunpack.c.h.bf16 %v8764_v25  ;;  %v8751_v39 = vld [vmem:[%s9746_s18 + $0x68] sm:$0xff]   ;;  %v8765_v43 = vld [vmem:[%s9746_s18 + $0xd8] sm:$0xff]  }
  0x81   : > { %v501_v24 = vld [vmem:[#allocation2 + $0x18f] sm:$0xff]  ;;  %743 = vst [vmem:[#allocation3 + $0x2f4] sm:$0xf] %v7961_v21  ;;  %744 = vst [vmem:[#allocation3 + $0x318] sm:$0xf] %v7962_v23  ;;  %v9209_v51 = vld [vmem:[#allocation4 + $0xd0] sm:$0xff]  }
  0x82   : > { %v7989_v28 = vpack.c.bf16 %v501_v24, %v501_v24  ;;  %v502_v30 = vld [vmem:[#allocation2 + $0x197] sm:$0xff]  ;;  %1713 = vst [vmem:[#allocation3 + $0x2b8] sm:$0xf] %v7962_v23  ;;  %v9151_v34 = vld [vmem:[#allocation3 + $0x1fc] ss:$36 sps:$4 sm:$0xff]   ;;  %442 = vst [vmem:[#allocation2 + $0x1a0] sm:$0xff] %v8586_v29 }
  0x83   : > { %5976 = vmatpush1.bf16.msra.mxu0 %v9147_v40  ;;  %5727 = vmatpush1.bf16.msra.mxu1 %v9148_v41  ;;  %v7990_v36 = vpack.c.bf16 %v502_v30, %v502_v30  ;;  %1097 = vst [vmem:[#allocation3 + $0x730] sm:$0xf] %v9204_v32  ;;  %443 = vst [vmem:[#allocation2 + $0x1a8] sm:$0xff] %v8587_v33  ;;  %v9211_v40 = vld [vmem:[%s9746_s18 + $0x64] ss:$0 sps:$4 sm:$0xff]   ;;  %v8534_v41 = vunpack.c.l.bf16 %v8751_v39  ;;  %v9210_v52 = vld [vmem:[#allocation4 + $0x150] sm:$0xff]  }
  0x84   : > { %5977 = vmatprep.subr.bf16.mxu0 %v10471_v0  ;;  %5728 = vmatprep.subr.bf16.mxu1 %v10471_v0  ;;  %771 = vst [vmem:[#allocation3 + $0x6e4] sm:$0xf] %v7989_v28  ;;  %v9212_v42 = vld [vmem:[%s9746_s18 + $0x68] ss:$0 sps:$4 sm:$0xff]   ;;  %1070 = vst [vmem:[#allocation3 + $0x364] sm:$0xf] %v9211_v40 }
  0x85   : > { %5528 = vmatmul.mubr.bf16.gmra.mxu0 %v9120_v44  ;;  %5640 = vmatmul.mubr.bf16.gmra.mxu1 %v9121_v45  ;;  %772 = vst [vmem:[#allocation3 + $0x708] sm:$0xf] %v7990_v36  ;;  %v9215_v44 = vld [vmem:[%s9746_s18 + $0xd4] ss:$0 sps:$4 sm:$0xff]   ;;  %v8535_v45 = vunpack.c.h.bf16 %v8751_v39  ;;  %416 = vst [vmem:[#allocation2 + $0xd0] sm:$0xff] %v8534_v41  ;;  %v803_v1 = vld [vmem:[#allocation2 + $0xe0] sm:$0xff] }
  0x86   : > { %5535 = vmatprep.mubr.bf16.mxu0 %v9126_v46  ;;  %5647 = vmatprep.mubr.bf16.mxu1 %v9130_v47  ;;  %v475_v46 = vld [vmem:[#allocation2 + $0xbf] sm:$0xff]  ;;  %v476_v47 = vld [vmem:[#allocation2 + $0xc7] sm:$0xff]  ;;  %1071 = vst [vmem:[#allocation3 + $0x388] sm:$0xf] %v9212_v42  ;;  %1098 = vst [vmem:[#allocation3 + $0x754] sm:$0xf] %v9215_v44 }
  0x87   : > { %5978 = vmatpush2.bf16.msra.mxu0 %v9159_v48  ;;  %5729 = vmatpush2.bf16.msra.mxu1 %v9160_v49  ;;  %v8590_v48 = vunpack.c.l.bf16 %v8765_v43  ;;  %v9216_v49 = vld [vmem:[%s9746_s18 + $0xd8] ss:$0 sps:$4 sm:$0xff]   ;;  %v7963_v50 = vpack.c.bf16 %v475_v46, %v475_v46  ;;  %v7964_v53 = vpack.c.bf16 %v476_v47, %v476_v47  ;;  %417 = vst [vmem:[#allocation2 + $0xd8] sm:$0xff] %v8535_v45  ;;  %v9157_v54 = vld [vmem:[#allocation3 + $0x1f8] ss:$36 sps:$4 sm:$0xff]   ;;  %v9221_v62 = vld [vmem:[#allocation4 + $0xc8] sm:$0xff]  }
  0x88   : > { %5979 = vmatprep.subr.bf16.mxu0 %v10471_v0  ;;  %5730 = vmatprep.subr.bf16.mxu1 %v10471_v0  ;;  %v9158_v55 = vld [vmem:[#allocation3 + $0x5e8] ss:$36 sps:$4 sm:$0xff]   ;;  %1099 = vst [vmem:[#allocation3 + $0x778] sm:$0xf] %v9216_v49  ;;  %v9167_v57 = vld [vmem:[#allocation3 + $0x634] ss:$36 sps:$4 sm:$0xff]  }
  0x89   : > { %444 = vst [vmem:[#allocation2 + $0x1b0] sm:$0xff] %v8590_v48  ;;  %v9163_v56 = vld [vmem:[#allocation3 + $0x244] ss:$36 sps:$4 sm:$0xff]   ;;  %745 = vst [vmem:[#allocation3 + $0x33c] sm:$0xf] %v7963_v50  ;;  %v503_v58 = vld [vmem:[#allocation2 + $0x19f] sm:$0xff] }
  0x8a   : > { %746 = vst [vmem:[#allocation3 + $0x360] sm:$0xf] %v7964_v53  ;;  %1715 = vst [vmem:[#allocation3 + $0x300] sm:$0xf] %v7964_v53  ;;  %v504_v59 = vld [vmem:[#allocation2 + $0x1a7] sm:$0xff]  ;;  %v7991_v60 = vpack.c.bf16 %v503_v58, %v503_v58  ;;  %v9222_v63 = vld [vmem:[#allocation4 + $0x148] sm:$0xff]  }
  0x8b   : > { %5980 = vmatpush2.bf16.msra.mxu0 %v9171_v5  ;;  %5731 = vmatpush2.bf16.msra.mxu1 %v9172_v6  ;;  %v7992_v61 = vpack.c.bf16 %v504_v59, %v504_v59  ;;  %v9224_v2 = vld [vmem:[%s9746_s18 + $0x6c] ss:$0 sps:$4 sm:$0xff]   ;;  %v8021_v6 = vpack.c.bf16 %v803_v1, %v803_v1  ;;  %v9169_v13 = vld [vmem:[#allocation3 + $0x240] ss:$36 sps:$4 sm:$0xff]   ;;  %v9170_v14 = vld [vmem:[#allocation3 + $0x630] ss:$36 sps:$4 sm:$0xff]  }
  0x8c   : > { %5981 = vmatprep.subr.bf16.mxu0 %v10471_v0  ;;  %5732 = vmatprep.subr.bf16.mxu1 %v10471_v0  ;;  %773 = vst [vmem:[#allocation3 + $0x72c] sm:$0xf] %v7991_v60  ;;  %1072 = vst [vmem:[#allocation3 + $0x3ac] sm:$0xf] %v9224_v2  ;;  %v9223_v16 = vld [vmem:[#allocation4 + $0xc0] sm:$0xff]   ;;  %v1424_v21 = vld [vmem:[#allocation2 + $0x1f] sm:$0xff] }
  0x8d   : > { %5536 = vmatmul.mubr.bf16.gmra.mxu0 %v9132_v3  ;;  %5648 = vmatmul.mubr.bf16.gmra.mxu1 %v9133_v4  ;;  %774 = vst [vmem:[#allocation3 + $0x750] sm:$0xf] %v7992_v61  ;;  %v477_v3 = vld [vmem:[#allocation2 + $0xcf] sm:$0xff]  ;;  %1073 = vst [vmem:[#allocation3 + $0x3d0] sm:$0xf] %v8021_v6  ;;  %v8102_v23 = vpack.c.bf16 %v1424_v21, %v1424_v21  ;;  %v1427_v32 = vld [vmem:[#allocation2 + $0x37] sm:$0xff] }
  0x8e   : > { %5543 = vmatprep.mubr.bf16.mxu0 %v9139_v9  ;;  %5655 = vmatprep.mubr.bf16.mxu1 %v9143_v10  ;;  %v478_v4 = vld [vmem:[#allocation2 + $0xd7] sm:$0xff]  ;;  %v479_v5 = vld [vmem:[#allocation2 + $0xdf] sm:$0xff]  ;;  %v7965_v7 = vpack.c.bf16 %v477_v3, %v477_v3  ;;  %v9231_v25 = vld [vmem:[#allocation4 + $0x140] sm:$0xff]  }
  0x8f   : > { %5982 = vmatpush2.bf16.msra.mxu0 %v9181_v11  ;;  %5733 = vmatpush2.bf16.msra.mxu1 %v9184_v12  ;;  %v7966_v9 = vpack.c.bf16 %v478_v4, %v478_v4  ;;  %v7967_v10 = vpack.c.bf16 %v479_v5, %v479_v5  ;;  %v1100_v11 = vld [vmem:[#allocation2 + $0x9] sm:$0xff]  ;;  %v1101_v12 = vld [vmem:[#allocation2 + $0x11] sm:$0xff]  ;;  %v9175_v19 = vld [vmem:[#allocation3 + $0x28c] ss:$36 sps:$4 sm:$0xff]   ;;  %1694 = vst [vmem:[#allocation3 + $0xc] sm:$0xf] %v8102_v23 }
  0x90   : > { %5983 = vmatprep.subr.bf16.mxu0 %v10471_v0  ;;  %5734 = vmatprep.subr.bf16.mxu1 %v10471_v0  ;;  %v505_v8 = vld [vmem:[#allocation2 + $0x1af] sm:$0xff]  ;;  %v8048_v17 = vpack.c.bf16 %v1100_v11, %v1100_v11  ;;  %v8049_v18 = vpack.c.bf16 %v1101_v12, %v1101_v12  ;;  %747 = vst [vmem:[#allocation3 + $0x384] sm:$0xf] %v7965_v7  ;;  %1716 = vst [vmem:[#allocation3 + $0x324] sm:$0xf] %v7965_v7  ;;  %v1748_v33 = vld [vmem:[#allocation2 + $0x20] sm:$0xff] }
  0x91   : > { %v7993_v15 = vpack.c.bf16 %v505_v8, %v505_v8  ;;  %748 = vst [vmem:[#allocation3 + $0x3a8] sm:$0xf] %v7966_v9  ;;  %749 = vst [vmem:[#allocation3 + $0x3cc] sm:$0xf] %v7967_v10  ;;  %v1426_v28 = vld [vmem:[#allocation2 + $0x2f] sm:$0xff]  ;;  %v1428_v47 = vld [vmem:[#allocation2 + $0x3f] sm:$0xff] }
  0x92   : > { %1717 = vst [vmem:[#allocation3 + $0x348] sm:$0xf] %v7966_v9  ;;  %1718 = vst [vmem:[#allocation3 + $0x36c] sm:$0xf] %v7967_v10  ;;  %v8104_v31 = vpack.c.bf16 %v1426_v28, %v1426_v28  ;;  %v1749_v36 = vld [vmem:[#allocation2 + $0x28] sm:$0xff]  ;;  %v1105_v45 = vld [vmem:[#allocation2 + $0x31] sm:$0xff]  ;;  %v8106_v50 = vpack.c.bf16 %v1428_v47, %v1428_v47 }
  0x93   : > { %5984 = vmatpush2.bf16.msra.mxu0 %v9185_v20  ;;  %5735 = vmatpush2.bf16.msra.mxu1 %v9194_v22  ;;  %v9179_v20 = vld [vmem:[#allocation3 + $0x67c] ss:$36 sps:$4 sm:$0xff]   ;;  %775 = vst [vmem:[#allocation3 + $0x774] sm:$0xf] %v7993_v15  ;;  %1370 = vst [vmem:[#allocation3 + $0x8] sm:$0xf] %v8048_v17  ;;  %v8157_v39 = vpack.c.bf16 %v1749_v36, %v1749_v36  ;;  %v8053_v46 = vpack.c.bf16 %v1105_v45, %v1105_v45 }
  0x94   : > { %5736 = vmatprep.subr.bf16.mxu1 %v10471_v0  ;;  %5985 = vmatprep.subr.bf16.mxu0 %v10471_v0  ;;  %v1425_v22 = vld [vmem:[#allocation2 + $0x27] sm:$0xff]  ;;  %1371 = vst [vmem:[#allocation3 + $0x2c] sm:$0xf] %v8049_v18  ;;  %1696 = vst [vmem:[#allocation3 + $0x54] sm:$0xf] %v8104_v31  ;;  %v1750_v49 = vld [vmem:[#allocation2 + $0x30] sm:$0xff] }
  0x95   : > { %5544 = vmatmul.mubr.bf16.gmra.mxu0 %v9145_v26  ;;  %5656 = vmatmul.mubr.bf16.gmra.mxu1 %v9146_v27  ;;  %v8103_v24 = vpack.c.bf16 %v1425_v22, %v1425_v22  ;;  %v1102_v26 = vld [vmem:[#allocation2 + $0x19] sm:$0xff]  ;;  %v1103_v27 = vld [vmem:[#allocation2 + $0x21] sm:$0xff]  ;;  %2019 = vst [vmem:[#allocation3 + $0x34] sm:$0xf] %v8157_v39  ;;  %1375 = vst [vmem:[#allocation3 + $0xbc] sm:$0xf] %v8053_v46 }
  0x96   : > { %5551 = vmatprep.mubr.bf16.mxu0 %v9151_v34  ;;  %5663 = vmatprep.mubr.bf16.mxu1 %v9155_v35  ;;  %v8050_v29 = vpack.c.bf16 %v1102_v26, %v1102_v26  ;;  %v8051_v30 = vpack.c.bf16 %v1103_v27, %v1103_v27  ;;  %v10473_v34 = vmov 0.0   ;;  %v8105_v35 = vpack.c.bf16 %v1427_v32, %v1427_v32  ;;  %v9182_v41 = vld [vmem:[#allocation3 + $0x288] ss:$36 sps:$4 sm:$0xff]   ;;  %v9183_v42 = vld [vmem:[#allocation3 + $0x678] ss:$36 sps:$4 sm:$0xff]   ;;  %v1752_v4 = vld [vmem:[#allocation2 + $0x40] sm:$0xff] }
  0x97   : > { %5737 = vmatpush2.bf16.msra.mxu1 %v9197_v37  ;;  %5986 = vmatpush2.bf16.msra.mxu0 %v9198_v38  ;;  %1695 = vst [vmem:[#allocation3 + $0x30] sm:$0xf] %v8103_v24  ;;  %v8156_v37 = vpack.c.bf16 %v1748_v33, %v1748_v33  ;;  %v2073_v38 = vld [vmem:[#allocation2 + $0x29] sm:$0xff]  ;;  %v9192_v44 = vld [vmem:[#allocation3 + $0x6c4] ss:$36 sps:$4 sm:$0xff]   ;;  %v1107_v61 = vld [vmem:[#allocation2 + $0x41] sm:$0xff]  ;;  %v8160_v7 = vpack.c.bf16 %v1752_v4, %v1752_v4 }
  0x98   : > { %5738 = vmatprep.subr.bf16.mxu1 %v10471_v0  ;;  %5987 = vmatprep.subr.bf16.mxu0 %v10471_v0  ;;  %1372 = vst [vmem:[#allocation3 + $0x50] sm:$0xf] %v8050_v29  ;;  %1373 = vst [vmem:[#allocation3 + $0x74] sm:$0xf] %v8051_v30  ;;  %v8211_v40 = vpack.c.bf16 %v2073_v38, %v2073_v38  ;;  %v9188_v43 = vld [vmem:[#allocation3 + $0x2d4] ss:$36 sps:$4 sm:$0xff]   ;;  %v8055_v1 = vpack.c.bf16 %v1107_v61, %v1107_v61 }
  0x99   : > { %2342 = vst [vmem:[#allocation3 + $0x14] sm:$0xf] %v8051_v30  ;;  %1697 = vst [vmem:[#allocation3 + $0x78] sm:$0xf] %v8105_v35  ;;  %v1429_v48 = vld [vmem:[#allocation2 + $0x47] sm:$0xff]  ;;  %v1109_v10 = vld [vmem:[#allocation2 + $0x51] sm:$0xff] }
  0x9a   : > { %2018 = vst [vmem:[#allocation3 + $0x10] sm:$0xf] %v8156_v37  ;;  %2343 = vst [vmem:[#allocation3 + $0x38] sm:$0xf] %v8211_v40  ;;  %v9195_v53 = vld [vmem:[#allocation3 + $0x2d0] ss:$36 sps:$4 sm:$0xff]  }
  0x9b   : > { %5739 = vmatpush2.bf16.msra.mxu1 %v9209_v51  ;;  %5988 = vmatpush2.bf16.msra.mxu0 %v9210_v52  ;;  %1374 = vst [vmem:[#allocation3 + $0x98] sm:$0xf] %v8211_v40  ;;  %v8107_v51 = vpack.c.bf16 %v1429_v48, %v1429_v48  ;;  %v8158_v52 = vpack.c.bf16 %v1750_v49, %v1750_v49  ;;  %2344 = vst [vmem:[#allocation3 + $0x5c] sm:$0xf] %v8053_v46  ;;  %v9205_v58 = vld [vmem:[#allocation3 + $0x70c] ss:$36 sps:$4 sm:$0xff]  }
  0x9c   : > { %5740 = vmatprep.subr.bf16.mxu1 %v10471_v0  ;;  %5989 = vmatprep.subr.bf16.mxu0 %v10471_v0  ;;  %1698 = vst [vmem:[#allocation3 + $0x9c] sm:$0xf] %v8106_v50  ;;  %v1753_v5 = vld [vmem:[#allocation2 + $0x48] sm:$0xff]  ;;  %v1432_v11 = vld [vmem:[#allocation2 + $0x5f] sm:$0xff]  ;;  %1377 = vst [vmem:[#allocation3 + $0x104] sm:$0xf] %v8055_v1 }
  0x9d   : > { %5552 = vmatmul.mubr.bf16.gmra.mxu0 %v9157_v54  ;;  %5664 = vmatmul.mubr.bf16.gmra.mxu1 %v9158_v55  ;;  %v9196_v54 = vld [vmem:[#allocation3 + $0x6c0] ss:$36 sps:$4 sm:$0xff]   ;;  %1699 = vst [vmem:[#allocation3 + $0xc0] sm:$0xf] %v8107_v51  ;;  %2020 = vst [vmem:[#allocation3 + $0x58] sm:$0xf] %v8158_v52  ;;  %v8161_v8 = vpack.c.bf16 %v1753_v5, %v1753_v5 }
  0x9e   : > { %5559 = vmatprep.mubr.bf16.mxu0 %v9163_v56  ;;  %5671 = vmatprep.mubr.bf16.mxu1 %v9167_v57  ;;  %v9201_v55 = vld [vmem:[#allocation3 + $0x31c] ss:$36 sps:$4 sm:$0xff]   ;;  %v1751_v56 = vld [vmem:[#allocation2 + $0x38] sm:$0xff]  ;;  %2346 = vst [vmem:[#allocation3 + $0xa4] sm:$0xf] %v8055_v1  ;;  %v1111_v24 = vld [vmem:[#allocation2 + $0x61] sm:$0xff] }
  0x9f   : > { %5741 = vmatpush2.bf16.msra.mxu1 %v9221_v62  ;;  %5990 = vmatpush2.bf16.msra.mxu0 %v9222_v63  ;;  %v2075_v57 = vld [vmem:[#allocation2 + $0x39] sm:$0xff]  ;;  %v8159_v59 = vpack.c.bf16 %v1751_v56, %v1751_v56  ;;  %v1430_v62 = vld [vmem:[#allocation2 + $0x4f] sm:$0xff]  ;;  %v1433_v12 = vld [vmem:[#allocation2 + $0x67] sm:$0xff]  ;;  %2022 = vst [vmem:[#allocation3 + $0xa0] sm:$0xf] %v8160_v7  ;;  %v8059_v27 = vpack.c.bf16 %v1111_v24, %v1111_v24 }
  0xa0   : > { %5742 = vmatprep.subr.bf16.mxu1 %v10471_v0  ;;  %5991 = vmatprep.subr.bf16.mxu0 %v10471_v0  ;;  %v8213_v60 = vpack.c.bf16 %v2075_v57, %v2075_v57  ;;  %v1431_v63 = vld [vmem:[#allocation2 + $0x57] sm:$0xff]  ;;  %v8108_v2 = vpack.c.bf16 %v1430_v62, %v1430_v62  ;;  %v2077_v6 = vld [vmem:[#allocation2 + $0x49] sm:$0xff]  ;;  %v8111_v15 = vpack.c.bf16 %v1433_v12, %v1433_v12  ;;  %v1756_v30 = vld [vmem:[#allocation2 + $0x60] sm:$0xff] }
  0xa1   : > { %2021 = vst [vmem:[#allocation3 + $0x7c] sm:$0xf] %v8159_v59  ;;  %v8109_v3 = vpack.c.bf16 %v1431_v63, %v1431_v63  ;;  %v8215_v9 = vpack.c.bf16 %v2077_v6, %v2077_v6  ;;  %v1755_v17 = vld [vmem:[#allocation2 + $0x58] sm:$0xff]  ;;  %2023 = vst [vmem:[#allocation3 + $0xc4] sm:$0xf] %v8161_v8  ;;  %v1434_v28 = vld [vmem:[#allocation2 + $0x6f] sm:$0xff]  ;;  %v8164_v33 = vpack.c.bf16 %v1756_v30, %v1756_v30 }
  0xa2   : > { %2345 = vst [vmem:[#allocation3 + $0x80] sm:$0xf] %v8213_v60  ;;  %1376 = vst [vmem:[#allocation3 + $0xe0] sm:$0xf] %v8213_v60  ;;  %v2079_v18 = vld [vmem:[#allocation2 + $0x59] sm:$0xff]  ;;  %v8112_v31 = vpack.c.bf16 %v1434_v28, %v1434_v28  ;;  %v1757_v39 = vld [vmem:[#allocation2 + $0x68] sm:$0xff] }
  0xa3   : > { %5743 = vmatpush2.bf16.msra.mxu1 %v9223_v16  ;;  %5992 = vmatpush2.bf16.msra.mxu0 %v9231_v25  ;;  %1700 = vst [vmem:[#allocation3 + $0xe4] sm:$0xf] %v8108_v2  ;;  %1701 = vst [vmem:[#allocation3 + $0x108] sm:$0xf] %v8109_v3  ;;  %v1754_v16 = vld [vmem:[#allocation2 + $0x50] sm:$0xff]  ;;  %v8217_v21 = vpack.c.bf16 %v2079_v18, %v2079_v18  ;;  %v1437_v45 = vld [vmem:[#allocation2 + $0x87] sm:$0xff] }
  0xa4   : > { %6210 = vmatprep.subr.bf16.mxu1 %v10471_v0  ;;  %8831 = vmatprep.subr.bf16.mxu0 %v10473_v34  ;;  %2347 = vst [vmem:[#allocation3 + $0xc8] sm:$0xf] %v8215_v9  ;;  %1378 = vst [vmem:[#allocation3 + $0x128] sm:$0xf] %v8215_v9  ;;  %v9207_v22 = vld [vmem:[#allocation3 + $0x318] ss:$36 sps:$4 sm:$0xff]   ;;  %v8115_v48 = vpack.c.bf16 %v1437_v45, %v1437_v45 }
  0xa5   : > { %5560 = vmatmul.mubr.bf16.gmra.mxu0 %v9169_v13  ;;  %5672 = vmatmul.mubr.bf16.gmra.mxu1 %v9170_v14  ;;  %v8057_v13 = vpack.c.bf16 %v1109_v10, %v1109_v10  ;;  %v8110_v14 = vpack.c.bf16 %v1432_v11, %v1432_v11  ;;  %1703 = vst [vmem:[#allocation3 + $0x150] sm:$0xf] %v8111_v15  ;;  %2349 = vst [vmem:[#allocation3 + $0x110] sm:$0xf] %v8217_v21  ;;  %v9208_v23 = vld [vmem:[#allocation3 + $0x708] ss:$36 sps:$4 sm:$0xff]  }
  0xa6   : > { %5567 = vmatprep.mubr.bf16.mxu0 %v9175_v19  ;;  %5679 = vmatprep.mubr.bf16.mxu1 %v9179_v20  ;;  %v8162_v19 = vpack.c.bf16 %v1754_v16, %v1754_v16  ;;  %v8163_v20 = vpack.c.bf16 %v1755_v17, %v1755_v17  ;;  %1380 = vst [vmem:[#allocation3 + $0x170] sm:$0xf] %v8217_v21  ;;  %v9213_v25 = vld [vmem:[#allocation3 + $0x364] ss:$36 sps:$4 sm:$0xff]   ;;  %v9217_v26 = vld [vmem:[#allocation3 + $0x754] ss:$36 sps:$4 sm:$0xff]  }
  0xa7   : > { %1379 = vst [vmem:[#allocation3 + $0x14c] sm:$0xf] %v8057_v13  ;;  %1702 = vst [vmem:[#allocation3 + $0x12c] sm:$0xf] %v8110_v14  ;;  %v1435_v29 = vld [vmem:[#allocation2 + $0x77] sm:$0xff]  ;;  %v2081_v40 = vld [vmem:[#allocation2 + $0x69] sm:$0xff] }
  0xa8   : > { %2348 = vst [vmem:[#allocation3 + $0xec] sm:$0xf] %v8057_v13  ;;  %2024 = vst [vmem:[#allocation3 + $0xe8] sm:$0xf] %v8162_v19  ;;  %v8113_v32 = vpack.c.bf16 %v1435_v29, %v1435_v29  ;;  %v9219_v35 = vld [vmem:[#allocation3 + $0x360] ss:$36 sps:$4 sm:$0xff]  }
  0xa9   : > { %2025 = vst [vmem:[#allocation3 + $0x10c] sm:$0xf] %v8163_v20  ;;  %1381 = vst [vmem:[#allocation3 + $0x194] sm:$0xf] %v8059_v27  ;;  %v9220_v36 = vld [vmem:[#allocation3 + $0x750] ss:$36 sps:$4 sm:$0xff]  }
  0xaa   : > { %2350 = vst [vmem:[#allocation3 + $0x134] sm:$0xf] %v8059_v27  ;;  %1704 = vst [vmem:[#allocation3 + $0x174] sm:$0xf] %v8112_v31  ;;  %v9225_v37 = vld [vmem:[#allocation3 + $0x3ac] ss:$36 sps:$4 sm:$0xff]  }
  0xab   : > { %1705 = vst [vmem:[#allocation3 + $0x198] sm:$0xf] %v8113_v32  ;;  %2026 = vst [vmem:[#allocation3 + $0x130] sm:$0xf] %v8164_v33  ;;  %v9229_v38 = vld [vmem:[#allocation3 + $0xc] ss:$36 sps:$4 sm:$0xff]  }
  0xac   : > { %v1758_v49 = vld [vmem:[#allocation2 + $0x70] sm:$0xff]  ;;  %v1759_v50 = vld [vmem:[#allocation2 + $0x78] sm:$0xff]  ;;  %1707 = vst [vmem:[#allocation3 + $0x1e0] sm:$0xf] %v8115_v48  ;;  %v1760_v61 = vld [vmem:[#allocation2 + $0x80] sm:$0xff] }
  0xad   : > { %5568 = vmatmul.mubr.bf16.gmra.mxu0 %v9182_v41  ;;  %5680 = vmatmul.mubr.bf16.gmra.mxu1 %v9183_v42  ;;  %v8165_v41 = vpack.c.bf16 %v1757_v39, %v1757_v39  ;;  %v8219_v42 = vpack.c.bf16 %v2081_v40, %v2081_v40  ;;  %v2083_v51 = vld [vmem:[#allocation2 + $0x79] sm:$0xff]  ;;  %v8166_v52 = vpack.c.bf16 %v1758_v49, %v1758_v49  ;;  %v1438_v59 = vld [vmem:[#allocation2 + $0x8f] sm:$0xff]  ;;  %v9232_v62 = vld [vmem:[#allocation3 + $0x54] ss:$36 sps:$4 sm:$0xff]  }
  0xae   : > { %5575 = vmatprep.mubr.bf16.mxu0 %v9188_v43  ;;  %5687 = vmatprep.mubr.bf16.mxu1 %v9192_v44  ;;  %v1113_v43 = vld [vmem:[#allocation2 + $0x71] sm:$0xff]  ;;  %v1436_v44 = vld [vmem:[#allocation2 + $0x7f] sm:$0xff]  ;;  %v8116_v63 = vpack.c.bf16 %v1438_v59, %v1438_v59  ;;  %v1761_v2 = vld [vmem:[#allocation2 + $0x88] sm:$0xff]  ;;  %v8168_v3 = vpack.c.bf16 %v1760_v61, %v1760_v61 }
  0xaf   : > { %v8061_v46 = vpack.c.bf16 %v1113_v43, %v1113_v43  ;;  %v8114_v47 = vpack.c.bf16 %v1436_v44, %v1436_v44  ;;  %2027 = vst [vmem:[#allocation3 + $0x154] sm:$0xf] %v8165_v41  ;;  %2351 = vst [vmem:[#allocation3 + $0x158] sm:$0xf] %v8219_v42  ;;  %v9227_v56 = vld [vmem:[#allocation3 + $0x8] ss:$36 sps:$4 sm:$0xff]   ;;  %v8169_v6 = vpack.c.bf16 %v1761_v2, %v1761_v2 }
  0xb0   : > { %1382 = vst [vmem:[#allocation3 + $0x1b8] sm:$0xf] %v8219_v42  ;;  %2028 = vst [vmem:[#allocation3 + $0x178] sm:$0xf] %v8166_v52  ;;  %v9230_v57 = vld [vmem:[#allocation3 + $0x3a8] ss:$36 sps:$4 sm:$0xff]  }
  0xb1   : > { %1383 = vst [vmem:[#allocation3 + $0x1dc] sm:$0xf] %v8061_v46  ;;  %1706 = vst [vmem:[#allocation3 + $0x1bc] sm:$0xf] %v8114_v47  ;;  %v1439_v60 = vld [vmem:[#allocation2 + $0x97] sm:$0xff]  ;;  %v2085_v4 = vld [vmem:[#allocation2 + $0x89] sm:$0xff] }
  0xb2   : > { %2352 = vst [vmem:[#allocation3 + $0x17c] sm:$0xf] %v8061_v46  ;;  %v8117_v1 = vpack.c.bf16 %v1439_v60, %v1439_v60  ;;  %v9236_v5 = vld [vmem:[#allocation3 + $0x14] ss:$36 sps:$4 sm:$0xff]   ;;  %v8223_v7 = vpack.c.bf16 %v2085_v4, %v2085_v4  ;;  %v1117_v8 = vld [vmem:[#allocation2 + $0x91] sm:$0xff]  ;;  %v2087_v17 = vld [vmem:[#allocation2 + $0x99] sm:$0xff] }
  0xb3   : > { %1708 = vst [vmem:[#allocation3 + $0x204] sm:$0xf] %v8116_v63  ;;  %2030 = vst [vmem:[#allocation3 + $0x1c0] sm:$0xf] %v8168_v3  ;;  %v8065_v9 = vpack.c.bf16 %v1117_v8, %v1117_v8  ;;  %v1440_v10 = vld [vmem:[#allocation2 + $0x9f] sm:$0xff]  ;;  %v1762_v11 = vld [vmem:[#allocation2 + $0x90] sm:$0xff]  ;;  %v8225_v20 = vpack.c.bf16 %v2087_v17, %v2087_v17 }
  0xb4   : > { %1709 = vst [vmem:[#allocation3 + $0x228] sm:$0xf] %v8117_v1  ;;  %v1763_v12 = vld [vmem:[#allocation2 + $0x98] sm:$0xff]  ;;  %v9237_v13 = vld [vmem:[#allocation4 + $0x1b8] sm:$0xff]   ;;  %2031 = vst [vmem:[#allocation3 + $0x1e4] sm:$0xf] %v8169_v6  ;;  %v8118_v14 = vpack.c.bf16 %v1440_v10, %v1440_v10  ;;  %v8170_v15 = vpack.c.bf16 %v1762_v11, %v1762_v11 }
  0xb5   : > { %5576 = vmatmul.mubr.bf16.gmra.mxu0 %v9195_v53  ;;  %5688 = vmatmul.mubr.bf16.gmra.mxu1 %v9196_v54  ;;  %v8167_v53 = vpack.c.bf16 %v1759_v50, %v1759_v50  ;;  %v8221_v54 = vpack.c.bf16 %v2083_v51, %v2083_v51  ;;  %2355 = vst [vmem:[#allocation3 + $0x1e8] sm:$0xf] %v8223_v7  ;;  %1386 = vst [vmem:[#allocation3 + $0x248] sm:$0xf] %v8223_v7  ;;  %v9234_v18 = vld [vmem:[#allocation3 + $0x10] ss:$36 sps:$4 sm:$0xff]  }
  0xb6   : > { %5583 = vmatprep.mubr.bf16.mxu0 %v9201_v55  ;;  %5695 = vmatprep.mubr.bf16.mxu1 %v9205_v58  ;;  %v1115_v55 = vld [vmem:[#allocation2 + $0x81] sm:$0xff]  ;;  %v8171_v16 = vpack.c.bf16 %v1763_v12, %v1763_v12  ;;  %1387 = vst [vmem:[#allocation3 + $0x26c] sm:$0xf] %v8065_v9  ;;  %2356 = vst [vmem:[#allocation3 + $0x20c] sm:$0xf] %v8065_v9  ;;  %v9246_v19 = vld [vmem:[#allocation4 + $0x1b0] sm:$0xff]  }
  0xb7   : > { %2029 = vst [vmem:[#allocation3 + $0x19c] sm:$0xf] %v8167_v53  ;;  %2353 = vst [vmem:[#allocation3 + $0x1a0] sm:$0xf] %v8221_v54  ;;  %v8063_v58 = vpack.c.bf16 %v1115_v55, %v1115_v55  ;;  %v9239_v21 = vld [vmem:[#allocation4 + $0x238] sm:$0xff]   ;;  %v9259_v31 = vld [vmem:[#allocation4 + $0x1a8] sm:$0xff]  }
  0xb8   : > { %1384 = vst [vmem:[#allocation3 + $0x200] sm:$0xf] %v8221_v54  ;;  %1710 = vst [vmem:[#allocation3 + $0x24c] sm:$0xf] %v8118_v14  ;;  %v1764_v24 = vld [vmem:[#allocation2 + $0xa0] sm:$0xff]  ;;  %v9260_v32 = vld [vmem:[#allocation4 + $0x230] sm:$0xff]  }
  0xb9   : > { %1385 = vst [vmem:[#allocation3 + $0x224] sm:$0xf] %v8063_v58  ;;  %2354 = vst [vmem:[#allocation3 + $0x1c4] sm:$0xf] %v8063_v58  ;;  %v8172_v28 = vpack.c.bf16 %v1764_v24, %v1764_v24  ;;  %v9240_v29 = vld [vmem:[#allocation3 + $0x9c] ss:$36 sps:$4 sm:$0xff]  }
  0xba   : > { %2032 = vst [vmem:[#allocation3 + $0x208] sm:$0xf] %v8170_v15  ;;  %2033 = vst [vmem:[#allocation3 + $0x22c] sm:$0xf] %v8171_v16  ;;  %v9242_v30 = vld [vmem:[#allocation3 + $0x5c] ss:$36 sps:$4 sm:$0xff]  }
  0xbb   : > { %2357 = vst [vmem:[#allocation3 + $0x230] sm:$0xf] %v8225_v20  ;;  %1388 = vst [vmem:[#allocation3 + $0x290] sm:$0xf] %v8225_v20  ;;  %v1765_v33 = vld [vmem:[#allocation2 + $0xa8] sm:$0xff]  ;;  %v1121_v41 = vld [vmem:[#allocation2 + $0xb1] sm:$0xff] }
  0xbc   : > { %2034 = vst [vmem:[#allocation3 + $0x250] sm:$0xf] %v8172_v28  ;;  %v9244_v39 = vld [vmem:[#allocation3 + $0x98] ss:$36 sps:$4 sm:$0xff]   ;;  %v1444_v42 = vld [vmem:[#allocation2 + $0xbf] sm:$0xff]  ;;  %v1766_v43 = vld [vmem:[#allocation2 + $0xb0] sm:$0xff]  ;;  %v8069_v46 = vpack.c.bf16 %v1121_v41, %v1121_v41 }
  0xbd   : > { %5584 = vmatmul.mubr.bf16.gmra.mxu0 %v9207_v22  ;;  %5696 = vmatmul.mubr.bf16.gmra.mxu1 %v9208_v23  ;;  %v1119_v22 = vld [vmem:[#allocation2 + $0xa1] sm:$0xff]  ;;  %v1442_v23 = vld [vmem:[#allocation2 + $0xaf] sm:$0xff]  ;;  %v8122_v47 = vpack.c.bf16 %v1444_v42, %v1444_v42  ;;  %v8174_v48 = vpack.c.bf16 %v1766_v43, %v1766_v43  ;;  %v1767_v49 = vld [vmem:[#allocation2 + $0xb8] sm:$0xff] }
  0xbe   : > { %5591 = vmatprep.mubr.bf16.mxu0 %v9213_v25  ;;  %5703 = vmatprep.mubr.bf16.mxu1 %v9217_v26  ;;  %v9238_v25 = vld [vmem:[#allocation3 + $0x50] ss:$36 sps:$4 sm:$0xff]   ;;  %v8067_v26 = vpack.c.bf16 %v1119_v22, %v1119_v22  ;;  %v8120_v27 = vpack.c.bf16 %v1442_v23, %v1442_v23  ;;  %v9245_v40 = vld [vmem:[#allocation3 + $0x58] ss:$36 sps:$4 sm:$0xff]   ;;  %v9247_v44 = vld [vmem:[#allocation3 + $0xe4] ss:$36 sps:$4 sm:$0xff]   ;;  %v8175_v53 = vpack.c.bf16 %v1767_v49, %v1767_v49 }
  0xbf   : > { %v9249_v45 = vld [vmem:[#allocation3 + $0xa4] ss:$36 sps:$4 sm:$0xff]   ;;  %v1123_v51 = vld [vmem:[#allocation2 + $0xc1] sm:$0xff]  ;;  %1391 = vst [vmem:[#allocation3 + $0x2fc] sm:$0xf] %v8069_v46  ;;  %v2093_v60 = vld [vmem:[#allocation2 + $0xc9] sm:$0xff] }
  0xc0   : > { %1389 = vst [vmem:[#allocation3 + $0x2b4] sm:$0xf] %v8067_v26  ;;  %1712 = vst [vmem:[#allocation3 + $0x294] sm:$0xf] %v8120_v27  ;;  %v2091_v50 = vld [vmem:[#allocation2 + $0xb9] sm:$0xff]  ;;  %v8071_v55 = vpack.c.bf16 %v1123_v51, %v1123_v51  ;;  %v1769_v58 = vld [vmem:[#allocation2 + $0xc8] sm:$0xff] }
  0xc1   : > { %2358 = vst [vmem:[#allocation3 + $0x254] sm:$0xf] %v8067_v26  ;;  %v9280_v52 = vld [vmem:[#allocation4 + $0x198] sm:$0xff]   ;;  %1714 = vst [vmem:[#allocation3 + $0x2dc] sm:$0xf] %v8122_v47  ;;  %v8229_v54 = vpack.c.bf16 %v2091_v50, %v2091_v50  ;;  %v8177_v61 = vpack.c.bf16 %v1769_v58, %v1769_v58  ;;  %v9294_v2 = vld [vmem:[#allocation4 + $0x190] sm:$0xff]  }
  0xc2   : > { %2036 = vst [vmem:[#allocation3 + $0x298] sm:$0xf] %v8174_v48  ;;  %2360 = vst [vmem:[#allocation3 + $0x29c] sm:$0xf] %v8069_v46  ;;  %v9251_v63 = vld [vmem:[#allocation3 + $0xe0] ss:$36 sps:$4 sm:$0xff]  }
  0xc3   : > { %2037 = vst [vmem:[#allocation3 + $0x2bc] sm:$0xf] %v8175_v53  ;;  %2361 = vst [vmem:[#allocation3 + $0x2c0] sm:$0xf] %v8229_v54  ;;  %v9252_v1 = vld [vmem:[#allocation3 + $0xa0] ss:$36 sps:$4 sm:$0xff]  }
  0xc4   : > { %1392 = vst [vmem:[#allocation3 + $0x320] sm:$0xf] %v8229_v54  ;;  %1393 = vst [vmem:[#allocation3 + $0x344] sm:$0xf] %v8071_v55  ;;  %v9308_v3 = vld [vmem:[#allocation4 + $0x220] sm:$0xff]   ;;  %v1125_v4 = vld [vmem:[#allocation2 + $0xd1] sm:$0xff] }
  0xc5   : > { %5592 = vmatmul.mubr.bf16.gmra.mxu0 %v9219_v35  ;;  %5704 = vmatmul.mubr.bf16.gmra.mxu1 %v9220_v36  ;;  %v2089_v35 = vld [vmem:[#allocation2 + $0xa9] sm:$0xff]  ;;  %2362 = vst [vmem:[#allocation3 + $0x2e4] sm:$0xf] %v8071_v55  ;;  %2039 = vst [vmem:[#allocation3 + $0x304] sm:$0xf] %v8177_v61  ;;  %v8073_v8 = vpack.c.bf16 %v1125_v4, %v1125_v4  ;;  %v1771_v12 = vld [vmem:[#allocation2 + $0xd8] sm:$0xff] }
  0xc6   : > { %5599 = vmatprep.mubr.bf16.mxu0 %v9225_v37  ;;  %5744 = vmatprep.mubr.bf16.mxu1 %v9229_v38  ;;  %v9273_v36 = vld [vmem:[#allocation4 + $0x1a0] sm:$0xff]   ;;  %v8173_v37 = vpack.c.bf16 %v1765_v33, %v1765_v33  ;;  %v8227_v38 = vpack.c.bf16 %v2089_v35, %v2089_v35  ;;  %v1770_v6 = vld [vmem:[#allocation2 + $0xd0] sm:$0xff]  ;;  %v9253_v7 = vld [vmem:[#allocation3 + $0x12c] ss:$36 sps:$4 sm:$0xff]   ;;  %v8179_v14 = vpack.c.bf16 %v1771_v12, %v1771_v12 }
  0xc7   : > { %v8178_v10 = vpack.c.bf16 %v1770_v6, %v1770_v6  ;;  %v9255_v11 = vld [vmem:[#allocation3 + $0xec] ss:$36 sps:$4 sm:$0xff]   ;;  %1395 = vst [vmem:[#allocation3 + $0x38c] sm:$0xf] %v8073_v8  ;;  %2364 = vst [vmem:[#allocation3 + $0x32c] sm:$0xf] %v8073_v8 }
  0xc8   : > { %2035 = vst [vmem:[#allocation3 + $0x274] sm:$0xf] %v8173_v37  ;;  %2359 = vst [vmem:[#allocation3 + $0x278] sm:$0xf] %v8227_v38  ;;  %v2095_v15 = vld [vmem:[#allocation2 + $0xd9] sm:$0xff]  ;;  %v9315_v20 = vld [vmem:[#allocation4 + $0x180] sm:$0xff]  }
  0xc9   : > { %1390 = vst [vmem:[#allocation3 + $0x2d8] sm:$0xf] %v8227_v38  ;;  %2040 = vst [vmem:[#allocation3 + $0x328] sm:$0xf] %v8178_v10  ;;  %v8233_v16 = vpack.c.bf16 %v2095_v15, %v2095_v15  ;;  %v9257_v17 = vld [vmem:[#allocation3 + $0x128] ss:$36 sps:$4 sm:$0xff]  }
  0xca   : > { %2041 = vst [vmem:[#allocation3 + $0x34c] sm:$0xf] %v8179_v14  ;;  %v1450_v22 = vld [vmem:[#allocation2 + $0xef] sm:$0xff]  ;;  %v1451_v24 = vld [vmem:[#allocation2 + $0xf7] sm:$0xff]  ;;  %v1772_v26 = vld [vmem:[#allocation2 + $0xe0] sm:$0xff] }
  0xcb   : > { %2365 = vst [vmem:[#allocation3 + $0x350] sm:$0xf] %v8233_v16  ;;  %1396 = vst [vmem:[#allocation3 + $0x3b0] sm:$0xf] %v8233_v16  ;;  %v1773_v27 = vld [vmem:[#allocation2 + $0xe8] sm:$0xff]  ;;  %v1129_v33 = vld [vmem:[#allocation2 + $0xf1] sm:$0xff] }
  0xcc   : > { %v9263_v28 = vld [vmem:[#allocation3 + $0x134] ss:$36 sps:$4 sm:$0xff]   ;;  %v1775_v42 = vld [vmem:[#allocation2 + $0xf8] sm:$0xff]  ;;  %v9267_v50 = vld [vmem:[#allocation3 + $0x1bc] ss:$36 sps:$4 sm:$0xff]  }
  0xcd   : > { %5600 = vmatmul.mubr.bf16.gmra.mxu0 %v9230_v57  ;;  %5745 = vmatmul.mubr.bf16.vlgmr.msra.gmra.mxu1 %v9227_v56  ;;  %v9285_v56 = vld [vmem:[#allocation4 + $0x228] sm:$0xff]   ;;  %v1768_v57 = vld [vmem:[#allocation2 + $0xc0] sm:$0xff]  ;;  %v9271_v6 = vld [vmem:[#allocation3 + $0x1b8] ss:$36 sps:$4 sm:$0xff]  }
  0xce   : > { %5752 = vmatprep.mubr.bf16.mxu1 %v9232_v62  ;;  %5993 = vmatprep.mubr.bf16.mxu0 %v9236_v5  ;;  %v8176_v59 = vpack.c.bf16 %v1768_v57, %v1768_v57  ;;  %v8231_v62 = vpack.c.bf16 %v2093_v60, %v2093_v60  ;;  %v1449_v5 = vld [vmem:[#allocation2 + $0xe7] sm:$0xff]  ;;  %v1452_v37 = vld [vmem:[#allocation2 + $0xff] sm:$0xff]  ;;  %v1454_v55 = vld [vmem:[#allocation2 + $0x10f] sm:$0xff] }
  0xcf   : > { %6211 = vmatpush1.bf16.msra.mxu1 %v9237_v13  ;;  %v8127_v9 = vpack.c.bf16 %v1449_v5, %v1449_v5  ;;  %v9307_v13 = vld [vmem:[#allocation4 + $0x188] sm:$0xff]   ;;  %v1453_v38 = vld [vmem:[#allocation2 + $0x107] sm:$0xff]  ;;  %v8132_v58 = vpack.c.bf16 %v1454_v55, %v1454_v55  ;;  %v2103_v14 = vld [vmem:[#allocation2 + $0x119] sm:$0xff] }
  0xd0   : > { %6212 = vmatprep.subr.bf16.mxu1 %v10471_v0  ;;  %2038 = vst [vmem:[#allocation3 + $0x2e0] sm:$0xf] %v8176_v59  ;;  %2363 = vst [vmem:[#allocation3 + $0x308] sm:$0xf] %v8231_v62  ;;  %v8131_v41 = vpack.c.bf16 %v1453_v38, %v1453_v38  ;;  %v9328_v47 = vld [vmem:[#allocation4 + $0x1f8] sm:$0xff]   ;;  %v1777_v60 = vld [vmem:[#allocation2 + $0x108] sm:$0xff] }
  0xd1   : > { %1394 = vst [vmem:[#allocation3 + $0x368] sm:$0xf] %v8231_v62  ;;  %1719 = vst [vmem:[#allocation3 + $0x390] sm:$0xf] %v8127_v9  ;;  %v9265_v48 = vld [vmem:[#allocation3 + $0x170] ss:$36 sps:$4 sm:$0xff]  }
  0xd2   : > { %v9266_v49 = vld [vmem:[#allocation3 + $0x130] ss:$36 sps:$4 sm:$0xff]   ;;  %1723 = vst [vmem:[#allocation3 + $0x420] sm:$0xf] %v8131_v41  ;;  %v9269_v51 = vld [vmem:[#allocation3 + $0x17c] ss:$36 sps:$4 sm:$0xff]  }
  0xd3   : > { %6213 = vmatpush1.bf16.msra.mxu1 %v9246_v19  ;;  %v9261_v19 = vld [vmem:[#allocation3 + $0x174] ss:$36 sps:$4 sm:$0xff]   ;;  %1724 = vst [vmem:[#allocation3 + $0x444] sm:$0xf] %v8132_v58  ;;  %v9274_v8 = vld [vmem:[#allocation3 + $0x204] ss:$36 sps:$4 sm:$0xff]  }
  0xd4   : > { %6214 = vmatprep.subr.bf16.mxu1 %v10471_v0  ;;  %v1131_v53 = vld [vmem:[#allocation2 + $0x101] sm:$0xff]  ;;  %v2101_v62 = vld [vmem:[#allocation2 + $0x109] sm:$0xff]  ;;  %v9276_v9 = vld [vmem:[#allocation3 + $0x1c4] ss:$36 sps:$4 sm:$0xff]  }
  0xd5   : > { %5753 = vmatmul.mubr.bf16.gmra.mxu1 %v9238_v25  ;;  %5994 = vmatmul.mubr.bf16.vlgmr.msra.gmra.mxu0 %v9234_v18  ;;  %v9258_v18 = vld [vmem:[#allocation3 + $0xe8] ss:$36 sps:$4 sm:$0xff]   ;;  %v8128_v25 = vpack.c.bf16 %v1450_v22, %v1450_v22  ;;  %v8079_v54 = vpack.c.bf16 %v1131_v53, %v1131_v53  ;;  %v1776_v57 = vld [vmem:[#allocation2 + $0x100] sm:$0xff]  ;;  %v1778_v12 = vld [vmem:[#allocation2 + $0x110] sm:$0xff] }
  0xd6   : > { %8832 = vmatpush3.bf16.msra.mxu0 %v9239_v21  ;;  %5760 = vmatprep.mubr.bf16.mxu1 %v9240_v29  ;;  %v1127_v21 = vld [vmem:[#allocation2 + $0xe1] sm:$0xff]  ;;  %v8129_v29 = vpack.c.bf16 %v1451_v24, %v1451_v24  ;;  %v8184_v61 = vpack.c.bf16 %v1776_v57, %v1776_v57  ;;  %v8186_v15 = vpack.c.bf16 %v1778_v12, %v1778_v12  ;;  %v1459_v22 = vld [vmem:[#allocation2 + $0x137] sm:$0xff]  ;;  %v1462_v53 = vld [vmem:[#allocation2 + $0x14f] sm:$0xff] }
  0xd7   : > { %6001 = vmatprep.mubr.bf16.mxu0 %v9242_v30  ;;  %6215 = vmatpush1.bf16.msra.mxu1 %v9259_v31  ;;  %v8075_v23 = vpack.c.bf16 %v1127_v21, %v1127_v21  ;;  %v8180_v30 = vpack.c.bf16 %v1772_v26, %v1772_v26  ;;  %v8181_v31 = vpack.c.bf16 %v1773_v27, %v1773_v27  ;;  %v1457_v10 = vld [vmem:[#allocation2 + $0x127] sm:$0xff]  ;;  %v1458_v21 = vld [vmem:[#allocation2 + $0x12f] sm:$0xff]  ;;  %v1460_v38 = vld [vmem:[#allocation2 + $0x13f] sm:$0xff] }
  0xd8   : > { %8833 = vmatprep.subr.bf16.mxu0 %v10473_v34  ;;  %6216 = vmatprep.subr.bf16.mxu1 %v10471_v0  ;;  %1720 = vst [vmem:[#allocation3 + $0x3b4] sm:$0xf] %v8128_v25  ;;  %1721 = vst [vmem:[#allocation3 + $0x3d8] sm:$0xf] %v8129_v29  ;;  %v9279_v24 = vld [vmem:[#allocation3 + $0x1c0] ss:$36 sps:$4 sm:$0xff]   ;;  %v8136_v25 = vpack.c.bf16 %v1458_v21, %v1458_v21  ;;  %v8137_v26 = vpack.c.bf16 %v1459_v22, %v1459_v22 }
  0xd9   : > { %1397 = vst [vmem:[#allocation3 + $0x3d4] sm:$0xf] %v8075_v23  ;;  %2366 = vst [vmem:[#allocation3 + $0x374] sm:$0xf] %v8075_v23  ;;  %v9278_v23 = vld [vmem:[#allocation3 + $0x200] ss:$36 sps:$4 sm:$0xff]  }
  0xda   : > { %8834 = vmatpush3.bf16.msra.mxu0 %v9260_v32  ;;  %v2097_v32 = vld [vmem:[#allocation2 + $0xe9] sm:$0xff]  ;;  %2042 = vst [vmem:[#allocation3 + $0x370] sm:$0xf] %v8180_v30  ;;  %2043 = vst [vmem:[#allocation3 + $0x394] sm:$0xf] %v8181_v31  ;;  %v1780_v27 = vld [vmem:[#allocation2 + $0x120] sm:$0xff] }
  0xdb   : > { %6217 = vmatpush1.bf16.msra.mxu1 %v9273_v36  ;;  %8835 = vmatprep.subr.bf16.mxu0 %v10473_v34  ;;  %v8235_v35 = vpack.c.bf16 %v2097_v32, %v2097_v32  ;;  %v8077_v36 = vpack.c.bf16 %v1129_v33, %v1129_v33  ;;  %1401 = vst [vmem:[#allocation3 + $0x464] sm:$0xf] %v8079_v54  ;;  %2370 = vst [vmem:[#allocation3 + $0x404] sm:$0xf] %v8079_v54  ;;  %v2105_v29 = vld [vmem:[#allocation2 + $0x129] sm:$0xff]  ;;  %v9528_v30 = vld [vmem:[%s9746_s18 + $0xd8] sm:$0xff]  }
  0xdc   : > { %6218 = vmatprep.subr.bf16.mxu1 %v10471_v0  ;;  %2046 = vst [vmem:[#allocation3 + $0x400] sm:$0xf] %v8184_v61  ;;  %2048 = vst [vmem:[#allocation3 + $0x448] sm:$0xf] %v8186_v15  ;;  %v8591_v31 = vunpack.c.h.bf16 %v9528_v30  ;;  %v8188_v32 = vpack.c.bf16 %v1780_v27, %v1780_v27  ;;  %v9283_v41 = vld [vmem:[#allocation3 + $0x20c] ss:$36 sps:$4 sm:$0xff]  }
  0xdd   : > { %5761 = vmatmul.mubr.bf16.gmra.mxu1 %v9244_v39  ;;  %6002 = vmatmul.mubr.bf16.gmra.mxu0 %v9245_v40  ;;  %v1774_v39 = vld [vmem:[#allocation2 + $0xf0] sm:$0xff]  ;;  %v8130_v40 = vpack.c.bf16 %v1452_v37, %v1452_v37  ;;  %2367 = vst [vmem:[#allocation3 + $0x398] sm:$0xf] %v8235_v35  ;;  %1398 = vst [vmem:[#allocation3 + $0x3f8] sm:$0xf] %v8235_v35  ;;  %v8243_v35 = vpack.c.bf16 %v2105_v29, %v2105_v29  ;;  %v1784_v57 = vld [vmem:[#allocation2 + $0x140] sm:$0xff] }
  0xde   : > { %5768 = vmatprep.mubr.bf16.mxu1 %v9247_v44  ;;  %6009 = vmatprep.mubr.bf16.mxu0 %v9249_v45  ;;  %v8182_v43 = vpack.c.bf16 %v1774_v39, %v1774_v39  ;;  %v2099_v44 = vld [vmem:[#allocation2 + $0xf9] sm:$0xff]  ;;  %1399 = vst [vmem:[#allocation3 + $0x41c] sm:$0xf] %v8077_v36  ;;  %v8183_v45 = vpack.c.bf16 %v1775_v42, %v1775_v42  ;;  %2368 = vst [vmem:[#allocation3 + $0x3bc] sm:$0xf] %v8077_v36  ;;  %v9349_v36 = vld [vmem:[#allocation4 + $0x1e8] sm:$0xff]  }
  0xdf   : > { %6219 = vmatpush1.bf16.msra.mxu1 %v9280_v52  ;;  %8836 = vmatpush3.bf16.msra.mxu0 %v9285_v56  ;;  %v8237_v46 = vpack.c.bf16 %v2099_v44, %v2099_v44  ;;  %1722 = vst [vmem:[#allocation3 + $0x3fc] sm:$0xf] %v8130_v40  ;;  %v9329_v52 = vld [vmem:[#allocation4 + $0x218] sm:$0xff]   ;;  %v1455_v56 = vld [vmem:[#allocation2 + $0x117] sm:$0xff]  ;;  %1728 = vst [vmem:[#allocation3 + $0x4d4] sm:$0xf] %v8136_v25  ;;  %v8192_v61 = vpack.c.bf16 %v1784_v57, %v1784_v57 }
  0xe0   : > { %6220 = vmatprep.subr.bf16.mxu1 %v10471_v0  ;;  %8837 = vmatprep.subr.bf16.mxu0 %v10473_v34  ;;  %2044 = vst [vmem:[#allocation3 + $0x3b8] sm:$0xf] %v8182_v43  ;;  %2045 = vst [vmem:[#allocation3 + $0x3dc] sm:$0xf] %v8183_v45  ;;  %v8133_v59 = vpack.c.bf16 %v1455_v56, %v1455_v56  ;;  %v1137_v37 = vld [vmem:[#allocation2 + $0x131] sm:$0xff]  ;;  %v1461_v39 = vld [vmem:[#allocation2 + $0x147] sm:$0xff]  ;;  %v8138_v43 = vpack.c.bf16 %v1460_v38, %v1460_v38 }
  0xe1   : > { %2369 = vst [vmem:[#allocation3 + $0x3e0] sm:$0xf] %v8237_v46  ;;  %1400 = vst [vmem:[#allocation3 + $0x440] sm:$0xf] %v8237_v46  ;;  %v9281_v40 = vld [vmem:[#allocation3 + $0x24c] ss:$36 sps:$4 sm:$0xff]   ;;  %v8085_v42 = vpack.c.bf16 %v1137_v37, %v1137_v37  ;;  %v8139_v44 = vpack.c.bf16 %v1461_v39, %v1461_v39  ;;  %v8140_v56 = vpack.c.bf16 %v1462_v53, %v1462_v53 }
  0xe2   : > { %1725 = vst [vmem:[#allocation3 + $0x468] sm:$0xf] %v8133_v59  ;;  %1729 = vst [vmem:[#allocation3 + $0x4f8] sm:$0xf] %v8137_v26  ;;  %v1782_v45 = vld [vmem:[#allocation2 + $0x130] sm:$0xff]  ;;  %v1783_v46 = vld [vmem:[#allocation2 + $0x138] sm:$0xff] }
  0xe3   : > { %6221 = vmatpush1.bf16.msra.mxu1 %v9294_v2  ;;  %8838 = vmatpush3.bf16.msra.mxu0 %v9308_v3  ;;  %v1133_v2 = vld [vmem:[#allocation2 + $0x111] sm:$0xff]  ;;  %v1456_v3 = vld [vmem:[#allocation2 + $0x11f] sm:$0xff]  ;;  %445 = vst [vmem:[#allocation2 + $0x1b8] sm:$0xff] %v8591_v31  ;;  %2050 = vst [vmem:[#allocation3 + $0x490] sm:$0xf] %v8188_v32 }
  0xe4   : > { %6222 = vmatprep.subr.bf16.mxu1 %v10471_v0  ;;  %8839 = vmatprep.subr.bf16.mxu0 %v10473_v34  ;;  %v8081_v4 = vpack.c.bf16 %v1133_v2, %v1133_v2  ;;  %v8134_v5 = vpack.c.bf16 %v1456_v3, %v1456_v3  ;;  %2375 = vst [vmem:[#allocation3 + $0x4b8] sm:$0xf] %v8243_v35  ;;  %1406 = vst [vmem:[#allocation3 + $0x518] sm:$0xf] %v8243_v35  ;;  %v1463_v55 = vld [vmem:[#allocation2 + $0x157] sm:$0xff]  ;;  %v1785_v58 = vld [vmem:[#allocation2 + $0x148] sm:$0xff] }
  0xe5   : > { %5769 = vmatmul.mubr.bf16.gmra.mxu1 %v9251_v63  ;;  %6010 = vmatmul.mubr.bf16.gmra.mxu0 %v9252_v1  ;;  %v8185_v63 = vpack.c.bf16 %v1777_v60, %v1777_v60  ;;  %v8239_v1 = vpack.c.bf16 %v2101_v62, %v2101_v62  ;;  %1407 = vst [vmem:[#allocation3 + $0x53c] sm:$0xf] %v8085_v42  ;;  %1730 = vst [vmem:[#allocation3 + $0x51c] sm:$0xf] %v8138_v43  ;;  %v9286_v59 = vld [vmem:[#allocation3 + $0x248] ss:$36 sps:$4 sm:$0xff]  }
  0xe6   : > { %5776 = vmatprep.mubr.bf16.mxu1 %v9253_v7  ;;  %6017 = vmatprep.mubr.bf16.mxu0 %v9255_v11  ;;  %v9272_v7 = vld [vmem:[#allocation3 + $0x178] ss:$36 sps:$4 sm:$0xff]   ;;  %1403 = vst [vmem:[#allocation3 + $0x4ac] sm:$0xf] %v8081_v4  ;;  %1726 = vst [vmem:[#allocation3 + $0x48c] sm:$0xf] %v8134_v5  ;;  %v8135_v11 = vpack.c.bf16 %v1457_v10, %v1457_v10  ;;  %v8141_v60 = vpack.c.bf16 %v1463_v55, %v1463_v55 }
  0xe7   : > { %6223 = vmatpush1.bf16.msra.mxu1 %v9307_v13  ;;  %8840 = vmatpush3.bf16.msra.mxu0 %v9329_v52  ;;  %2047 = vst [vmem:[#allocation3 + $0x424] sm:$0xf] %v8185_v63  ;;  %2371 = vst [vmem:[#allocation3 + $0x428] sm:$0xf] %v8239_v1  ;;  %v1779_v13 = vld [vmem:[#allocation2 + $0x118] sm:$0xff]  ;;  %v1139_v52 = vld [vmem:[#allocation2 + $0x141] sm:$0xff]  ;;  %v8193_v62 = vpack.c.bf16 %v1785_v58, %v1785_v58 }
  0xe8   : > { %6224 = vmatprep.subr.bf16.mxu1 %v10471_v0  ;;  %8841 = vmatprep.subr.bf16.mxu0 %v10473_v34  ;;  %1402 = vst [vmem:[#allocation3 + $0x488] sm:$0xf] %v8239_v1  ;;  %2372 = vst [vmem:[#allocation3 + $0x44c] sm:$0xf] %v8081_v4  ;;  %v8187_v16 = vpack.c.bf16 %v1779_v13, %v1779_v13  ;;  %v8087_v54 = vpack.c.bf16 %v1139_v52, %v1139_v52  ;;  %v9287_v63 = vld [vmem:[#allocation3 + $0x208] ss:$36 sps:$4 sm:$0xff]  }
  0xe9   : > { %1727 = vst [vmem:[#allocation3 + $0x4b0] sm:$0xf] %v8135_v11  ;;  %1731 = vst [vmem:[#allocation3 + $0x540] sm:$0xf] %v8139_v44  ;;  %v9288_v1 = vld [vmem:[#allocation3 + $0x294] ss:$36 sps:$4 sm:$0xff]  }
  0xea   : > { %2049 = vst [vmem:[#allocation3 + $0x46c] sm:$0xf] %v8187_v16  ;;  %2376 = vst [vmem:[#allocation3 + $0x4dc] sm:$0xf] %v8085_v42  ;;  %v9290_v2 = vld [vmem:[#allocation3 + $0x254] ss:$36 sps:$4 sm:$0xff]  }
  0xeb   : > { %6225 = vmatpush1.bf16.msra.mxu1 %v9315_v20  ;;  %1409 = vst [vmem:[#allocation3 + $0x584] sm:$0xf] %v8087_v54  ;;  %1732 = vst [vmem:[#allocation3 + $0x564] sm:$0xf] %v8140_v56  ;;  %v2109_v3 = vld [vmem:[#allocation2 + $0x149] sm:$0xff]  ;;  %v1787_v16 = vld [vmem:[#allocation2 + $0x158] sm:$0xff] }
  0xec   : > { %6226 = vmatprep.subr.bf16.mxu1 %v10471_v0  ;;  %2378 = vst [vmem:[#allocation3 + $0x524] sm:$0xf] %v8087_v54  ;;  %1733 = vst [vmem:[#allocation3 + $0x588] sm:$0xf] %v8141_v60  ;;  %v8247_v4 = vpack.c.bf16 %v2109_v3, %v2109_v3  ;;  %v9363_v5 = vld [vmem:[#allocation4 + $0x1e0] sm:$0xff]   ;;  %v1786_v11 = vld [vmem:[#allocation2 + $0x150] sm:$0xff] }
  0xed   : > { %5777 = vmatmul.mubr.bf16.gmra.mxu1 %v9257_v17  ;;  %6018 = vmatmul.mubr.bf16.gmra.mxu0 %v9258_v18  ;;  %v8241_v17 = vpack.c.bf16 %v2103_v14, %v2103_v14  ;;  %v9342_v18 = vld [vmem:[#allocation4 + $0x1f0] sm:$0xff]   ;;  %2054 = vst [vmem:[#allocation3 + $0x520] sm:$0xf] %v8192_v61  ;;  %2055 = vst [vmem:[#allocation3 + $0x544] sm:$0xf] %v8193_v62  ;;  %v8194_v15 = vpack.c.bf16 %v1786_v11, %v1786_v11  ;;  %v1143_v22 = vld [vmem:[#allocation2 + $0x161] sm:$0xff] }
  0xee   : > { %5784 = vmatprep.mubr.bf16.mxu1 %v9261_v19  ;;  %6025 = vmatprep.mubr.bf16.mxu0 %v9263_v28  ;;  %v1135_v19 = vld [vmem:[#allocation2 + $0x121] sm:$0xff]  ;;  %2379 = vst [vmem:[#allocation3 + $0x548] sm:$0xf] %v8247_v4  ;;  %1410 = vst [vmem:[#allocation3 + $0x5a8] sm:$0xf] %v8247_v4  ;;  %v1467_v25 = vld [vmem:[#allocation2 + $0x177] sm:$0xff] }
  0xef   : > { %6227 = vmatpush2.bf16.msra.mxu1 %v9328_v47  ;;  %2373 = vst [vmem:[#allocation3 + $0x470] sm:$0xf] %v8241_v17  ;;  %1404 = vst [vmem:[#allocation3 + $0x4d0] sm:$0xf] %v8241_v17  ;;  %v8083_v20 = vpack.c.bf16 %v1135_v19, %v1135_v19  ;;  %v1781_v28 = vld [vmem:[#allocation2 + $0x128] sm:$0xff]  ;;  %v8190_v47 = vpack.c.bf16 %v1782_v45, %v1782_v45  ;;  %v2111_v17 = vld [vmem:[#allocation2 + $0x159] sm:$0xff]  ;;  %v8145_v29 = vpack.c.bf16 %v1467_v25, %v1467_v25 }
  0xf0   : > { %6228 = vmatprep.subr.bf16.mxu1 %v10471_v0  ;;  %v8189_v33 = vpack.c.bf16 %v1781_v28, %v1781_v28  ;;  %v9292_v12 = vld [vmem:[#allocation3 + $0x290] ss:$36 sps:$4 sm:$0xff]   ;;  %v9297_v19 = vld [vmem:[#allocation3 + $0x29c] ss:$36 sps:$4 sm:$0xff]   ;;  %2056 = vst [vmem:[#allocation3 + $0x568] sm:$0xf] %v8194_v15  ;;  %v8249_v21 = vpack.c.bf16 %v2111_v17, %v2111_v17 }
  0xf1   : > { %1405 = vst [vmem:[#allocation3 + $0x4f4] sm:$0xf] %v8083_v20  ;;  %2374 = vst [vmem:[#allocation3 + $0x494] sm:$0xf] %v8083_v20  ;;  %v9293_v13 = vld [vmem:[#allocation3 + $0x250] ss:$36 sps:$4 sm:$0xff]   ;;  %v8195_v20 = vpack.c.bf16 %v1787_v16, %v1787_v16 }
  0xf2   : > { %2051 = vst [vmem:[#allocation3 + $0x4b4] sm:$0xf] %v8189_v33  ;;  %2052 = vst [vmem:[#allocation3 + $0x4d8] sm:$0xf] %v8190_v47  ;;  %v1788_v27 = vld [vmem:[#allocation2 + $0x160] sm:$0xff]  ;;  %v1789_v28 = vld [vmem:[#allocation2 + $0x168] sm:$0xff] }
  0xf3   : > { %6229 = vmatpush2.bf16.msra.mxu1 %v9342_v18  ;;  %v9295_v18 = vld [vmem:[#allocation3 + $0x2dc] ss:$36 sps:$4 sm:$0xff]   ;;  %2057 = vst [vmem:[#allocation3 + $0x58c] sm:$0xf] %v8195_v20  ;;  %2381 = vst [vmem:[#allocation3 + $0x590] sm:$0xf] %v8249_v21  ;;  %v8196_v30 = vpack.c.bf16 %v1788_v27, %v1788_v27  ;;  %v8197_v31 = vpack.c.bf16 %v1789_v28, %v1789_v28 }
  0xf4   : > { %6230 = vmatprep.subr.bf16.mxu1 %v10471_v0  ;;  %1412 = vst [vmem:[#allocation3 + $0x5f0] sm:$0xf] %v8249_v21  ;;  %v2113_v32 = vld [vmem:[#allocation2 + $0x169] sm:$0xff]  ;;  %1737 = vst [vmem:[#allocation3 + $0x618] sm:$0xf] %v8145_v29  ;;  %v9376_v35 = vld [vmem:[#allocation4 + $0x1d8] sm:$0xff]  }
  0xf5   : > { %5785 = vmatmul.mubr.bf16.gmra.mxu1 %v9265_v48  ;;  %6026 = vmatmul.mubr.bf16.gmra.mxu0 %v9266_v49  ;;  %v8191_v48 = vpack.c.bf16 %v1783_v46, %v1783_v46  ;;  %v2107_v49 = vld [vmem:[#allocation2 + $0x139] sm:$0xff]  ;;  %2058 = vst [vmem:[#allocation3 + $0x5b0] sm:$0xf] %v8196_v30  ;;  %2059 = vst [vmem:[#allocation3 + $0x5d4] sm:$0xf] %v8197_v31  ;;  %v8251_v33 = vpack.c.bf16 %v2113_v32, %v2113_v32  ;;  %v1145_v37 = vld [vmem:[#allocation2 + $0x171] sm:$0xff] }
  0xf6   : > { %5792 = vmatprep.mubr.bf16.mxu1 %v9267_v50  ;;  %6033 = vmatprep.mubr.bf16.mxu0 %v9269_v51  ;;  %v8245_v50 = vpack.c.bf16 %v2107_v49, %v2107_v49  ;;  %v9356_v51 = vld [vmem:[#allocation4 + $0x210] sm:$0xff]   ;;  %v9299_v38 = vld [vmem:[#allocation3 + $0x2d8] ss:$36 sps:$4 sm:$0xff]   ;;  %v1790_v47 = vld [vmem:[#allocation2 + $0x170] sm:$0xff] }
  0xf7   : > { %6231 = vmatpush2.bf16.msra.mxu1 %v9349_v36  ;;  %2053 = vst [vmem:[#allocation3 + $0x4fc] sm:$0xf] %v8191_v48  ;;  %8842 = vmatpush3.bf16.msra.mxu0 %v9356_v51  ;;  %v9377_v36 = vld [vmem:[#allocation4 + $0x208] sm:$0xff]   ;;  %v9300_v39 = vld [vmem:[#allocation3 + $0x298] ss:$36 sps:$4 sm:$0xff]   ;;  %v1791_v48 = vld [vmem:[#allocation2 + $0x178] sm:$0xff] }
  0xf8   : > { %6232 = vmatprep.subr.bf16.mxu1 %v10471_v0  ;;  %2377 = vst [vmem:[#allocation3 + $0x500] sm:$0xf] %v8245_v50  ;;  %1408 = vst [vmem:[#allocation3 + $0x560] sm:$0xf] %v8245_v50  ;;  %8843 = vmatprep.subr.bf16.mxu0 %v10473_v34  ;;  %v1469_v42 = vld [vmem:[#allocation2 + $0x187] sm:$0xff]  ;;  %v2115_v49 = vld [vmem:[#allocation2 + $0x179] sm:$0xff]  ;;  %v8198_v50 = vpack.c.bf16 %v1790_v47, %v1790_v47  ;;  %v8199_v51 = vpack.c.bf16 %v1791_v48, %v1791_v48 }
  0xf9   : > { %2383 = vst [vmem:[#allocation3 + $0x5d8] sm:$0xf] %v8251_v33  ;;  %1414 = vst [vmem:[#allocation3 + $0x638] sm:$0xf] %v8251_v33  ;;  %v9301_v43 = vld [vmem:[#allocation3 + $0x324] ss:$36 sps:$4 sm:$0xff]   ;;  %v8147_v46 = vpack.c.bf16 %v1469_v42, %v1469_v42  ;;  %v8253_v52 = vpack.c.bf16 %v2115_v49, %v2115_v49 }
  0xfa   : > { %v9303_v44 = vld [vmem:[#allocation3 + $0x2e4] ss:$36 sps:$4 sm:$0xff]   ;;  %v1147_v53 = vld [vmem:[#allocation2 + $0x181] sm:$0xff]  ;;  %2060 = vst [vmem:[#allocation3 + $0x5f8] sm:$0xf] %v8198_v50  ;;  %v2117_v3 = vld [vmem:[#allocation2 + $0x189] sm:$0xff] }
  0xfb   : > { %6233 = vmatpush2.bf16.msra.mxu1 %v9363_v5  ;;  %8844 = vmatpush3.bf16.msra.mxu0 %v9377_v36  ;;  %1739 = vst [vmem:[#allocation3 + $0x660] sm:$0xf] %v8147_v46  ;;  %v1470_v54 = vld [vmem:[#allocation2 + $0x18f] sm:$0xff]  ;;  %v8095_v55 = vpack.c.bf16 %v1147_v53, %v1147_v53  ;;  %2061 = vst [vmem:[#allocation3 + $0x61c] sm:$0xf] %v8199_v51  ;;  %v1471_v57 = vld [vmem:[#allocation2 + $0x197] sm:$0xff]  ;;  %v8255_v5 = vpack.c.bf16 %v2117_v3, %v2117_v3 }
  0xfc   : > { %6234 = vmatprep.subr.bf16.mxu1 %v10471_v0  ;;  %8845 = vmatprep.subr.bf16.mxu0 %v10473_v34  ;;  %v8148_v56 = vpack.c.bf16 %v1470_v54, %v1470_v54  ;;  %2385 = vst [vmem:[#allocation3 + $0x620] sm:$0xf] %v8253_v52  ;;  %1416 = vst [vmem:[#allocation3 + $0x680] sm:$0xf] %v8253_v52  ;;  %v1792_v58 = vld [vmem:[#allocation2 + $0x180] sm:$0xff]  ;;  %v8149_v61 = vpack.c.bf16 %v1471_v57, %v1471_v57  ;;  %v1794_v11 = vld [vmem:[#allocation2 + $0x190] sm:$0xff] }
  0xfd   : > { %5793 = vmatmul.mubr.bf16.gmra.mxu1 %v9271_v6  ;;  %6034 = vmatmul.mubr.bf16.gmra.mxu0 %v9272_v7  ;;  %v1141_v6 = vld [vmem:[#allocation2 + $0x151] sm:$0xff]  ;;  %v1464_v7 = vld [vmem:[#allocation2 + $0x15f] sm:$0xff]  ;;  %1417 = vst [vmem:[#allocation3 + $0x6a4] sm:$0xf] %v8095_v55  ;;  %v8200_v62 = vpack.c.bf16 %v1792_v58, %v1792_v58  ;;  %2386 = vst [vmem:[#allocation3 + $0x644] sm:$0xf] %v8095_v55 }
  0xfe   : > { %5800 = vmatprep.mubr.bf16.mxu1 %v9274_v8  ;;  %6041 = vmatprep.mubr.bf16.mxu0 %v9276_v9  ;;  %v8089_v8 = vpack.c.bf16 %v1141_v6, %v1141_v6  ;;  %v1465_v9 = vld [vmem:[#allocation2 + $0x167] sm:$0xff]  ;;  %v8142_v10 = vpack.c.bf16 %v1464_v7, %v1464_v7  ;;  %v9306_v60 = vld [vmem:[#allocation3 + $0x2e0] ss:$36 sps:$4 sm:$0xff]   ;;  %1740 = vst [vmem:[#allocation3 + $0x684] sm:$0xf] %v8148_v56  ;;  %v9390_v6 = vld [vmem:[#allocation4 + $0x1d0] sm:$0xff]  }
  0xff   : > { %v8143_v14 = vpack.c.bf16 %v1465_v9, %v1465_v9  ;;  %6235 = vmatpush2.bf16.msra.mxu1 %v9376_v35  ;;  %1741 = vst [vmem:[#allocation3 + $0x6a8] sm:$0xf] %v8149_v61  ;;  %2062 = vst [vmem:[#allocation3 + $0x640] sm:$0xf] %v8200_v62  ;;  %v1149_v7 = vld [vmem:[#allocation2 + $0x191] sm:$0xff]  ;;  %v1472_v9 = vld [vmem:[#allocation2 + $0x19f] sm:$0xff] }
 0x100   : > { %1411 = vst [vmem:[#allocation3 + $0x5cc] sm:$0xf] %v8089_v8  ;;  %1734 = vst [vmem:[#allocation3 + $0x5ac] sm:$0xf] %v8142_v10  ;;  %6236 = vmatprep.subr.bf16.mxu1 %v10471_v0  ;;  %v1473_v10 = vld [vmem:[#allocation2 + $0x1a7] sm:$0xff]  ;;  %v1795_v15 = vld [vmem:[#allocation2 + $0x198] sm:$0xff] }
 0x101   : > { %2380 = vst [vmem:[#allocation3 + $0x56c] sm:$0xf] %v8089_v8  ;;  %1735 = vst [vmem:[#allocation3 + $0x5d0] sm:$0xf] %v8143_v14  ;;  %v8097_v8 = vpack.c.bf16 %v1149_v7, %v1149_v7  ;;  %v8202_v14 = vpack.c.bf16 %v1794_v11, %v1794_v11  ;;  %v2119_v16 = vld [vmem:[#allocation2 + $0x199] sm:$0xff]  ;;  %v9398_v28 = vld [vmem:[#allocation4 + $0x200] sm:$0xff]  }
 0x102   : > { %2387 = vst [vmem:[#allocation3 + $0x668] sm:$0xf] %v8255_v5  ;;  %1418 = vst [vmem:[#allocation3 + $0x6c8] sm:$0xf] %v8255_v5  ;;  %v8257_v20 = vpack.c.bf16 %v2119_v16, %v2119_v16  ;;  %v9314_v25 = vld [vmem:[#allocation3 + $0x328] ss:$36 sps:$4 sm:$0xff]   ;;  %8846 = vmatpush3.bf16.msra.mxu0 %v9398_v28 }
 0x103   : > { %6237 = vmatpush2.bf16.msra.mxu1 %v9390_v6  ;;  %1419 = vst [vmem:[#allocation3 + $0x6ec] sm:$0xf] %v8097_v8  ;;  %2388 = vst [vmem:[#allocation3 + $0x68c] sm:$0xf] %v8097_v8  ;;  %v9316_v29 = vld [vmem:[#allocation3 + $0x3b4] ss:$36 sps:$4 sm:$0xff]  }
 0x104   : > { %6238 = vmatprep.subr.bf16.mxu1 %v10471_v0  ;;  %2064 = vst [vmem:[#allocation3 + $0x688] sm:$0xf] %v8202_v14  ;;  %2389 = vst [vmem:[#allocation3 + $0x6b0] sm:$0xf] %v8257_v20  ;;  %v9318_v30 = vld [vmem:[#allocation3 + $0x374] ss:$36 sps:$4 sm:$0xff]  }
 0x105   : > { %5801 = vmatmul.mubr.bf16.gmra.mxu1 %v9278_v23  ;;  %6042 = vmatmul.mubr.bf16.gmra.mxu0 %v9279_v24  ;;  %v1466_v23 = vld [vmem:[#allocation2 + $0x16f] sm:$0xff]  ;;  %v8091_v24 = vpack.c.bf16 %v1143_v22, %v1143_v22  ;;  %1420 = vst [vmem:[#allocation3 + $0x710] sm:$0xf] %v8257_v20  ;;  %v1151_v33 = vld [vmem:[#allocation2 + $0x1a1] sm:$0xff]  ;;  %v1475_v36 = vld [vmem:[#allocation2 + $0x1b7] sm:$0xff] }
 0x106   : > { %5808 = vmatprep.mubr.bf16.mxu1 %v9281_v40  ;;  %6049 = vmatprep.mubr.bf16.mxu0 %v9283_v41  ;;  %v8144_v26 = vpack.c.bf16 %v1466_v23, %v1466_v23  ;;  %v8093_v40 = vpack.c.bf16 %v1145_v37, %v1145_v37  ;;  %v1468_v41 = vld [vmem:[#allocation2 + $0x17f] sm:$0xff]  ;;  %v9397_v23 = vld [vmem:[#allocation4 + $0x1c8] sm:$0xff]   ;;  %v8099_v37 = vpack.c.bf16 %v1151_v33, %v1151_v33  ;;  %v1797_v48 = vld [vmem:[#allocation2 + $0x1a8] sm:$0xff] }
 0x107   : > { %1413 = vst [vmem:[#allocation3 + $0x614] sm:$0xf] %v8091_v24  ;;  %2382 = vst [vmem:[#allocation3 + $0x5b4] sm:$0xf] %v8091_v24  ;;  %v8146_v45 = vpack.c.bf16 %v1468_v41, %v1468_v41  ;;  %v9313_v24 = vld [vmem:[#allocation3 + $0x368] ss:$36 sps:$4 sm:$0xff]   ;;  %6239 = vmatpush2.bf16.msra.mxu1 %v9397_v23  ;;  %v8205_v53 = vpack.c.bf16 %v1797_v48, %v1797_v48 }
 0x108   : > { %1736 = vst [vmem:[#allocation3 + $0x5f4] sm:$0xf] %v8144_v26  ;;  %1415 = vst [vmem:[#allocation3 + $0x65c] sm:$0xf] %v8093_v40  ;;  %6240 = vmatprep.subr.bf16.mxu1 %v10471_v0  ;;  %v1474_v35 = vld [vmem:[#allocation2 + $0x1af] sm:$0xff]  ;;  %v1796_v42 = vld [vmem:[#allocation2 + $0x1a0] sm:$0xff] }
 0x109   : > { %2384 = vst [vmem:[#allocation3 + $0x5fc] sm:$0xf] %v8093_v40  ;;  %1738 = vst [vmem:[#allocation3 + $0x63c] sm:$0xf] %v8146_v45  ;;  %v9320_v46 = vld [vmem:[#allocation3 + $0x3b0] ss:$36 sps:$4 sm:$0xff]  }
 0x10a   : > { %1421 = vst [vmem:[#allocation3 + $0x734] sm:$0xf] %v8099_v37  ;;  %2390 = vst [vmem:[#allocation3 + $0x6d4] sm:$0xf] %v8099_v37  ;;  %v9321_v47 = vld [vmem:[#allocation3 + $0x370] ss:$36 sps:$4 sm:$0xff]  }
 0x10b   : > { %v2121_v49 = vld [vmem:[#allocation2 + $0x1a9] sm:$0xff]  ;;  %v8766_v50 = vld [vmem:[%s9746_s18 + $0xe0] sm:$0xff]   ;;  %v1153_v57 = vld [vmem:[#allocation2 + $0x1b1] sm:$0xff]  ;;  %2067 = vst [vmem:[#allocation3 + $0x6f4] sm:$0xf] %v8205_v53 }
 0x10c   : > { %v9322_v51 = vld [vmem:[#allocation3 + $0x3fc] ss:$36 sps:$4 sm:$0xff]   ;;  %v8259_v54 = vpack.c.bf16 %v2121_v49, %v2121_v49  ;;  %v8594_v55 = vunpack.c.l.bf16 %v8766_v50  ;;  %v8595_v56 = vunpack.c.h.bf16 %v8766_v50  ;;  %v8101_v62 = vpack.c.bf16 %v1153_v57, %v1153_v57  ;;  %v9413_v3 = vld [vmem:[%s9746_s18 + $0xe0] ss:$0 sps:$4 sm:$0xff]   ;;  %v2396_v8 = vld [vmem:[#allocation2 + $0x37] sm:$0xff] }
 0x10d   : > { %5809 = vmatmul.mubr.bf16.gmra.mxu1 %v9286_v59  ;;  %6050 = vmatmul.mubr.bf16.gmra.mxu0 %v9287_v63  ;;  %v9305_v59 = vld [vmem:[#allocation3 + $0x320] ss:$36 sps:$4 sm:$0xff]   ;;  %v9309_v63 = vld [vmem:[#allocation3 + $0x36c] ss:$36 sps:$4 sm:$0xff]   ;;  %2070 = vst [vmem:[#allocation3 + $0x760] sm:$0xf] %v9413_v3  ;;  %v8264_v11 = vpack.c.bf16 %v2396_v8, %v2396_v8 }
 0x10e   : > { %5816 = vmatprep.mubr.bf16.mxu1 %v9288_v1  ;;  %6057 = vmatprep.mubr.bf16.mxu0 %v9290_v2  ;;  %v9311_v1 = vld [vmem:[#allocation3 + $0x32c] ss:$36 sps:$4 sm:$0xff]   ;;  %v1793_v2 = vld [vmem:[#allocation2 + $0x188] sm:$0xff]  ;;  %v1798_v58 = vld [vmem:[#allocation2 + $0x1b0] sm:$0xff]  ;;  %2391 = vst [vmem:[#allocation3 + $0x6f8] sm:$0xf] %v8259_v54 }
 0x10f   : > { %v8201_v4 = vpack.c.bf16 %v1793_v2, %v1793_v2  ;;  %v9324_v52 = vld [vmem:[#allocation3 + $0x3bc] ss:$36 sps:$4 sm:$0xff]   ;;  %446 = vst [vmem:[#allocation2 + $0x1c0] sm:$0xff] %v8594_v55  ;;  %447 = vst [vmem:[#allocation2 + $0x1c8] sm:$0xff] %v8595_v56 }
 0x110   : > { %1422 = vst [vmem:[#allocation3 + $0x758] sm:$0xf] %v8259_v54  ;;  %v8767_v2 = vld [vmem:[%s9746_s18 + $0xe8] sm:$0xff]   ;;  %1423 = vst [vmem:[#allocation3 + $0x77c] sm:$0xf] %v8101_v62 }
 0x111   : > { %2063 = vst [vmem:[#allocation3 + $0x664] sm:$0xf] %v8201_v4  ;;  %v9414_v4 = vld [vmem:[%s9746_s18 + $0xe4] ss:$0 sps:$4 sm:$0xff]   ;;  %2392 = vst [vmem:[#allocation3 + $0x71c] sm:$0xf] %v8101_v62  ;;  %v8598_v7 = vunpack.c.l.bf16 %v8767_v2 }
 0x112   : > { %2071 = vst [vmem:[#allocation3 + $0x784] sm:$0xf] %v9414_v4  ;;  %v2399_v16 = vld [vmem:[#allocation2 + $0x4f] sm:$0xff]  ;;  %2666 = vst [vmem:[#allocation3 + $0x18] sm:$0xf] %v8264_v11  ;;  %v2725_v62 = vld [vmem:[#allocation2 + $0x60] sm:$0xff] }
 0x113   : > { %448 = vst [vmem:[#allocation2 + $0x1d0] sm:$0xff] %v8598_v7  ;;  %v8267_v23 = vpack.c.bf16 %v2399_v16, %v2399_v16  ;;  %v8323_v2 = vpack.c.bf16 %v2725_v62, %v2725_v62  ;;  %v3046_v3 = vld [vmem:[#allocation2 + $0x49] sm:$0xff]  ;;  %v3047_v4 = vld [vmem:[#allocation2 + $0x51] sm:$0xff] }
 0x114   : > { %v8374_v8 = vpack.c.bf16 %v3046_v3, %v3046_v3  ;;  %v2403_v11 = vld [vmem:[#allocation2 + $0x6f] sm:$0xff] }
 0x115   : > { %5817 = vmatmul.mubr.bf16.gmra.mxu1 %v9292_v12  ;;  %6058 = vmatmul.mubr.bf16.gmra.mxu0 %v9293_v13  ;;  %v8150_v12 = vpack.c.bf16 %v1472_v9, %v1472_v9  ;;  %v8151_v13 = vpack.c.bf16 %v1473_v10, %v1473_v10  ;;  %v2397_v9 = vld [vmem:[#allocation2 + $0x3f] sm:$0xff]  ;;  %2669 = vst [vmem:[#allocation3 + $0x84] sm:$0xf] %v8267_v23  ;;  %2995 = vst [vmem:[#allocation3 + $0xd0] sm:$0xf] %v8323_v2  ;;  %v3051_v3 = vld [vmem:[#allocation2 + $0x71] sm:$0xff] }
 0x116   : > { %5824 = vmatprep.mubr.bf16.mxu1 %v9295_v18  ;;  %6065 = vmatprep.mubr.bf16.mxu0 %v9297_v19  ;;  %v8203_v19 = vpack.c.bf16 %v1795_v15, %v1795_v15  ;;  %v2720_v10 = vld [vmem:[#allocation2 + $0x38] sm:$0xff]  ;;  %v2398_v15 = vld [vmem:[#allocation2 + $0x47] sm:$0xff]  ;;  %3316 = vst [vmem:[#allocation3 + $0x68] sm:$0xf] %v8374_v8  ;;  %v8271_v16 = vpack.c.bf16 %v2403_v11, %v2403_v11  ;;  %v2407_v11 = vld [vmem:[#allocation2 + $0x8f] sm:$0xff] }
 0x117   : > { %1742 = vst [vmem:[#allocation3 + $0x6cc] sm:$0xf] %v8150_v12  ;;  %1743 = vst [vmem:[#allocation3 + $0x6f0] sm:$0xf] %v8151_v13  ;;  %v8265_v12 = vpack.c.bf16 %v2397_v9, %v2397_v9  ;;  %v2721_v13 = vld [vmem:[#allocation2 + $0x40] sm:$0xff]  ;;  %v8318_v14 = vpack.c.bf16 %v2720_v10, %v2720_v10  ;;  %v8375_v9 = vpack.c.bf16 %v3047_v4, %v3047_v4 }
 0x118   : > { %2065 = vst [vmem:[#allocation3 + $0x6ac] sm:$0xf] %v8203_v19  ;;  %v2123_v53 = vld [vmem:[#allocation2 + $0x1b9] sm:$0xff]  ;;  %v2402_v10 = vld [vmem:[#allocation2 + $0x67] sm:$0xff]  ;;  %2673 = vst [vmem:[#allocation3 + $0x114] sm:$0xf] %v8271_v16 }
 0x119   : > { %2667 = vst [vmem:[#allocation3 + $0x3c] sm:$0xf] %v8265_v12  ;;  %2990 = vst [vmem:[#allocation3 + $0x1c] sm:$0xf] %v8318_v14  ;;  %v8270_v12 = vpack.c.bf16 %v2402_v10, %v2402_v10  ;;  %v3048_v23 = vld [vmem:[#allocation2 + $0x59] sm:$0xff]  ;;  %v2406_v10 = vld [vmem:[#allocation2 + $0x87] sm:$0xff] }
 0x11a   : > { %3317 = vst [vmem:[#allocation3 + $0x8c] sm:$0xf] %v8375_v9  ;;  %v8379_v9 = vpack.c.bf16 %v3051_v3, %v3051_v3  ;;  %v3056_v3 = vld [vmem:[#allocation2 + $0x99] sm:$0xff] }
 0x11b   : > { %2672 = vst [vmem:[#allocation3 + $0xf0] sm:$0xf] %v8270_v12  ;;  %v8274_v12 = vpack.c.bf16 %v2406_v10, %v2406_v10 }
 0x11c   : > { %3321 = vst [vmem:[#allocation3 + $0x11c] sm:$0xf] %v8379_v9 }
 0x11d   : > { %5825 = vmatmul.mubr.bf16.gmra.mxu1 %v9299_v38  ;;  %6066 = vmatmul.mubr.bf16.gmra.mxu0 %v9300_v39  ;;  %v8152_v38 = vpack.c.bf16 %v1474_v35, %v1474_v35  ;;  %v8153_v39 = vpack.c.bf16 %v1475_v36, %v1475_v36  ;;  %v3044_v35 = vld [vmem:[#allocation2 + $0x39] sm:$0xff]  ;;  %v3045_v36 = vld [vmem:[#allocation2 + $0x41] sm:$0xff]  ;;  %2676 = vst [vmem:[#allocation3 + $0x180] sm:$0xf] %v8274_v12 }
 0x11e   : > { %5832 = vmatprep.mubr.bf16.mxu1 %v9301_v43  ;;  %6073 = vmatprep.mubr.bf16.mxu0 %v9303_v44  ;;  %v8204_v43 = vpack.c.bf16 %v1796_v42, %v1796_v42  ;;  %v8372_v37 = vpack.c.bf16 %v3044_v35, %v3044_v35  ;;  %v2401_v42 = vld [vmem:[#allocation2 + $0x5f] sm:$0xff] }
 0x11f   : > { %1744 = vst [vmem:[#allocation3 + $0x714] sm:$0xf] %v8152_v38  ;;  %1745 = vst [vmem:[#allocation3 + $0x738] sm:$0xf] %v8153_v39  ;;  %v8373_v38 = vpack.c.bf16 %v3045_v36, %v3045_v36  ;;  %v2400_v39 = vld [vmem:[#allocation2 + $0x57] sm:$0xff]  ;;  %v8269_v49 = vpack.c.bf16 %v2401_v42, %v2401_v42  ;;  %v3049_v35 = vld [vmem:[#allocation2 + $0x61] sm:$0xff] }
 0x120   : > { %2066 = vst [vmem:[#allocation3 + $0x6d0] sm:$0xf] %v8204_v43  ;;  %v2724_v43 = vld [vmem:[#allocation2 + $0x58] sm:$0xff]  ;;  %v8268_v48 = vpack.c.bf16 %v2400_v39, %v2400_v39  ;;  %3314 = vst [vmem:[#allocation3 + $0x20] sm:$0xf] %v8372_v37 }
 0x121   : > { %v8322_v50 = vpack.c.bf16 %v2724_v43, %v2724_v43  ;;  %3315 = vst [vmem:[#allocation3 + $0x44] sm:$0xf] %v8373_v38  ;;  %2671 = vst [vmem:[#allocation3 + $0xcc] sm:$0xf] %v8269_v49  ;;  %v8377_v38 = vpack.c.bf16 %v3049_v35, %v3049_v35  ;;  %v2404_v39 = vld [vmem:[#allocation2 + $0x77] sm:$0xff]  ;;  %v2405_v42 = vld [vmem:[#allocation2 + $0x7f] sm:$0xff] }
 0x122   : > { %2670 = vst [vmem:[#allocation3 + $0xa8] sm:$0xf] %v8268_v48  ;;  %v2728_v43 = vld [vmem:[#allocation2 + $0x78] sm:$0xff] }
 0x123   : > { %2994 = vst [vmem:[#allocation3 + $0xac] sm:$0xf] %v8322_v50  ;;  %v8326_v48 = vpack.c.bf16 %v2728_v43, %v2728_v43  ;;  %3319 = vst [vmem:[#allocation3 + $0xd4] sm:$0xf] %v8377_v38  ;;  %v2409_v35 = vld [vmem:[#allocation2 + $0x9f] sm:$0xff] }
 0x124   : > { %v2732_v43 = vld [vmem:[#allocation2 + $0x98] sm:$0xff] }
 0x125   : > { %v9909_v17 = vpop.f32.mrf.mxu0  ;;  %v9911_v18 = vpop.f32.mrf.mxu1  ;;  %5833 = vmatmul.mubr.bf16.gmra.mxu1 %v9305_v59  ;;  %6074 = vmatmul.mubr.bf16.gmra.mxu0 %v9306_v60  ;;  %v9408_v59 = vld [vmem:[%s9746_s18 + $0xdc] ss:$0 sps:$4 sm:$0xff]   ;;  %2998 = vst [vmem:[#allocation3 + $0x13c] sm:$0xf] %v8326_v48 }
 0x126   : > { %5840 = vmatprep.mubr.bf16.mxu1 %v9309_v63  ;;  %6081 = vmatprep.mubr.bf16.mxu0 %v9311_v1  ;;  %v8206_v63 = vpack.c.bf16 %v1798_v58, %v1798_v58  ;;  %v9412_v1 = vld [vmem:[#allocation4 + $0x1c0] sm:$0xff]   ;;  %2069 = vst [vmem:[#allocation3 + $0x73c] sm:$0xf] %v9408_v59  ;;  %v8261_v58 = vpack.c.bf16 %v2123_v53, %v2123_v53  ;;  %v9336_v53 = vld [vmem:[#allocation3 + $0x488] ss:$36 sps:$4 sm:$0xff]  }
 0x127   : > { %v5499_v21 = vpop.f32.mrf.mxu0  ;;  %v5611_v22 = vpop.f32.mrf.mxu1  ;;  %6241 = vmatpush2.bf16.msra.mxu1 %v9412_v1  ;;  %v2124_v59 = vld [vmem:[#allocation2 + $0x1c1] sm:$0xff] }
 0x128   : > { %2068 = vst [vmem:[#allocation3 + $0x718] sm:$0xf] %v8206_v63  ;;  %v8319_v21 = vpack.c.bf16 %v2721_v13, %v2721_v13  ;;  %v8266_v22 = vpack.c.bf16 %v2398_v15, %v2398_v15  ;;  %v2125_v63 = vld [vmem:[#allocation2 + $0x1c9] sm:$0xff]  ;;  %v8262_v1 = vpack.c.bf16 %v2124_v59, %v2124_v59  ;;  %2393 = vst [vmem:[#allocation3 + $0x740] sm:$0xf] %v8261_v58 }
 0x129   : > { %v9913_v26 = vpop.f32.mrf.mxu0  ;;  %v9915_v27 = vpop.f32.mrf.mxu1  ;;  %v8263_v7 = vpack.c.bf16 %v2125_v63, %v2125_v63  ;;  %v9330_v15 = vld [vmem:[#allocation3 + $0x440] ss:$36 sps:$4 sm:$0xff]   ;;  %v9348_v58 = vld [vmem:[#allocation3 + $0x494] ss:$36 sps:$4 sm:$0xff]  }
 0x12a   : > { %2991 = vst [vmem:[#allocation3 + $0x40] sm:$0xf] %v8319_v21  ;;  %2668 = vst [vmem:[#allocation3 + $0x60] sm:$0xf] %v8266_v22  ;;  %v2726_v21 = vld [vmem:[#allocation2 + $0x68] sm:$0xff]  ;;  %v2727_v22 = vld [vmem:[#allocation2 + $0x70] sm:$0xff] }
 0x12b   : > { %v5502_v31 = vpop.f32.mrf.mxu0  ;;  %v5614_v32 = vpop.f32.mrf.mxu1  ;;  %2394 = vst [vmem:[#allocation3 + $0x764] sm:$0xf] %v8262_v1  ;;  %2395 = vst [vmem:[#allocation3 + $0x788] sm:$0xf] %v8263_v7  ;;  %v2729_v63 = vld [vmem:[#allocation2 + $0x80] sm:$0xff]  ;;  %v3050_v1 = vld [vmem:[#allocation2 + $0x69] sm:$0xff] }
 0x12c   : > { %v9327_v31 = vld [vmem:[#allocation3 + $0x3b8] ss:$36 sps:$4 sm:$0xff]   ;;  %v8327_v2 = vpack.c.bf16 %v2729_v63, %v2729_v63  ;;  %v8378_v4 = vpack.c.bf16 %v3050_v1, %v3050_v1 }
 0x12d   : > { %v9918_v40 = vpop.f32.mrf.mxu0  ;;  %v9920_v41 = vpop.f32.mrf.mxu1  ;;  %5841 = vmatmul.mubr.bf16.gmra.mxu1 %v9313_v24  ;;  %6082 = vmatmul.mubr.bf16.gmra.mxu0 %v9314_v25  ;;  %v2722_v24 = vld [vmem:[#allocation2 + $0x48] sm:$0xff]  ;;  %v2723_v25 = vld [vmem:[#allocation2 + $0x50] sm:$0xff] }
 0x12e   : > { %5848 = vmatprep.mubr.bf16.mxu1 %v9316_v29  ;;  %6089 = vmatprep.mubr.bf16.mxu0 %v9318_v30  ;;  %v9326_v30 = vld [vmem:[#allocation3 + $0x3f8] ss:$36 sps:$4 sm:$0xff]   ;;  %v8320_v32 = vpack.c.bf16 %v2722_v24, %v2722_v24  ;;  %v8321_v33 = vpack.c.bf16 %v2723_v25, %v2723_v25  ;;  %v9333_v24 = vld [vmem:[#allocation3 + $0x400] ss:$36 sps:$4 sm:$0xff]   ;;  %v8324_v25 = vpack.c.bf16 %v2726_v21, %v2726_v21 }
 0x12f   : > { %v5507_v44 = vpop.f32.mrf.mxu0  ;;  %v5619_v45 = vpop.f32.mrf.mxu1  ;;  %2999 = vst [vmem:[#allocation3 + $0x160] sm:$0xf] %v8327_v2  ;;  %3320 = vst [vmem:[#allocation3 + $0xf8] sm:$0xf] %v8378_v4  ;;  %v2734_v1 = vld [vmem:[#allocation2 + $0xa8] sm:$0xff]  ;;  %v2735_v2 = vld [vmem:[#allocation2 + $0xb0] sm:$0xff] }
 0x130   : > { %2992 = vst [vmem:[#allocation3 + $0x64] sm:$0xf] %v8320_v32  ;;  %2993 = vst [vmem:[#allocation3 + $0x88] sm:$0xf] %v8321_v33  ;;  %v9338_v32 = vld [vmem:[#allocation3 + $0x48c] ss:$36 sps:$4 sm:$0xff]   ;;  %v8333_v12 = vpack.c.bf16 %v2735_v2, %v2735_v2 }
 0x131   : > { %v9924_v60 = vpop.f32.mrf.mxu0  ;;  %v9926_v61 = vpop.f32.mrf.mxu1  ;;  %v9341_v33 = vld [vmem:[#allocation3 + $0x44c] ss:$36 sps:$4 sm:$0xff]   ;;  %2996 = vst [vmem:[#allocation3 + $0xf4] sm:$0xf] %v8324_v25  ;;  %v3059_v2 = vld [vmem:[#allocation2 + $0xb1] sm:$0xff] }
 0x132   : > { %3005 = vst [vmem:[#allocation3 + $0x238] sm:$0xf] %v8333_v12  ;;  %v2414_v12 = vld [vmem:[#allocation2 + $0xc7] sm:$0xff] }
 0x133   : > { %v5510_v5 = vpop.f32.mrf.mxu0  ;;  %v5622_v6 = vpop.f32.mrf.mxu1 }
 0x135   : > { %v9931_v19 = vpop.f32.mrf.mxu0  ;;  %v9933_v20 = vpop.f32.mrf.mxu1  ;;  %5849 = vmatmul.mubr.bf16.gmra.mxu1 %v9320_v46  ;;  %6090 = vmatmul.mubr.bf16.gmra.mxu0 %v9321_v47  ;;  %v9332_v46 = vld [vmem:[#allocation3 + $0x444] ss:$36 sps:$4 sm:$0xff]  }
 0x136   : > { %5856 = vmatprep.mubr.bf16.mxu1 %v9322_v51  ;;  %6097 = vmatprep.mubr.bf16.mxu0 %v9324_v52  ;;  %v9335_v47 = vld [vmem:[#allocation3 + $0x404] ss:$36 sps:$4 sm:$0xff]   ;;  %v1476_v51 = vld [vmem:[#allocation2 + $0x1bf] sm:$0xff]  ;;  %v1477_v52 = vld [vmem:[#allocation2 + $0x1c7] sm:$0xff] }
 0x137   : > { %v5515_v28 = vpop.f32.mrf.mxu0  ;;  %v5627_v29 = vpop.f32.mrf.mxu1  ;;  %v8154_v56 = vpack.c.bf16 %v1476_v51, %v1476_v51  ;;  %v8155_v57 = vpack.c.bf16 %v1477_v52, %v1477_v52 }
 0x138   : > { %v8325_v28 = vpack.c.bf16 %v2727_v22, %v2727_v22  ;;  %v8376_v29 = vpack.c.bf16 %v3048_v23, %v3048_v23  ;;  %v9343_v22 = vld [vmem:[#allocation3 + $0x4d0] ss:$36 sps:$4 sm:$0xff]  }
 0x139   : > { %v9935_v44 = vpop.f32.mrf.mxu0  ;;  %v9937_v45 = vpop.f32.mrf.mxu1  ;;  %1746 = vst [vmem:[#allocation3 + $0x75c] sm:$0xf] %v8154_v56  ;;  %1747 = vst [vmem:[#allocation3 + $0x780] sm:$0xf] %v8155_v57  ;;  %v9339_v56 = vld [vmem:[#allocation3 + $0x448] ss:$36 sps:$4 sm:$0xff]  }
 0x13a   : > { %2997 = vst [vmem:[#allocation3 + $0x118] sm:$0xf] %v8325_v28  ;;  %3318 = vst [vmem:[#allocation3 + $0xb0] sm:$0xf] %v8376_v29  ;;  %v9345_v57 = vld [vmem:[#allocation3 + $0x4d4] ss:$36 sps:$4 sm:$0xff]  }
 0x13b   : > { %v5518_v54 = vpop.f32.mrf.mxu0  ;;  %v5630_v55 = vpop.f32.mrf.mxu1  ;;  %v9346_v23 = vld [vmem:[#allocation3 + $0x490] ss:$36 sps:$4 sm:$0xff]  }
 0x13c   : > { %v3053_v29 = vld [vmem:[#allocation2 + $0x81] sm:$0xff] }
 0x13d   : > { %v9939_v5 = vpop.f32.mrf.mxu0  ;;  %v9941_v6 = vpop.f32.mrf.mxu1  ;;  %5857 = vmatmul.mubr.bf16.gmra.mxu1 %v9326_v30  ;;  %6098 = vmatmul.mubr.bf16.gmra.mxu0 %v9327_v31  ;;  %v8381_v38 = vpack.c.bf16 %v3053_v29, %v3053_v29  ;;  %v9353_v29 = vld [vmem:[#allocation3 + $0x4d8] ss:$36 sps:$4 sm:$0xff]  }
 0x13e   : > { %5864 = vmatprep.mubr.bf16.mxu1 %v9332_v46  ;;  %6105 = vmatprep.mubr.bf16.mxu0 %v9335_v47  ;;  %v8272_v46 = vpack.c.bf16 %v2404_v39, %v2404_v39  ;;  %v8273_v47 = vpack.c.bf16 %v2405_v42, %v2405_v42  ;;  %v8277_v42 = vpack.c.bf16 %v2409_v35, %v2409_v35  ;;  %v9359_v35 = vld [vmem:[#allocation3 + $0x564] ss:$36 sps:$4 sm:$0xff]  }
 0x13f   : > { %v5523_v13 = vpop.f32.mrf.mxu0  ;;  %v5635_v14 = vpop.f32.mrf.mxu1  ;;  %3323 = vst [vmem:[#allocation3 + $0x164] sm:$0xf] %v8381_v38  ;;  %v9362_v38 = vld [vmem:[#allocation3 + $0x524] ss:$36 sps:$4 sm:$0xff]  }
 0x140   : > { %2674 = vst [vmem:[#allocation3 + $0x138] sm:$0xf] %v8272_v46  ;;  %2675 = vst [vmem:[#allocation3 + $0x15c] sm:$0xf] %v8273_v47  ;;  %v2730_v13 = vld [vmem:[#allocation2 + $0x88] sm:$0xff]  ;;  %v2731_v14 = vld [vmem:[#allocation2 + $0x90] sm:$0xff] }
 0x141   : > { %v9943_v30 = vpop.f32.mrf.mxu0  ;;  %v9945_v31 = vpop.f32.mrf.mxu1  ;;  %v8328_v25 = vpack.c.bf16 %v2730_v13, %v2730_v13  ;;  %v8329_v28 = vpack.c.bf16 %v2731_v14, %v2731_v14  ;;  %v2733_v46 = vld [vmem:[#allocation2 + $0xa0] sm:$0xff]  ;;  %v3054_v47 = vld [vmem:[#allocation2 + $0x89] sm:$0xff]  ;;  %2679 = vst [vmem:[#allocation3 + $0x1ec] sm:$0xf] %v8277_v42  ;;  %v8384_v14 = vpack.c.bf16 %v3056_v3, %v3056_v3 }
 0x142   : > { %v3057_v13 = vld [vmem:[#allocation2 + $0xa1] sm:$0xff] }
 0x143   : > { %v5526_v36 = vpop.f32.mrf.mxu0  ;;  %v5638_v37 = vpop.f32.mrf.mxu1  ;;  %3000 = vst [vmem:[#allocation3 + $0x184] sm:$0xf] %v8328_v25  ;;  %3001 = vst [vmem:[#allocation3 + $0x1a8] sm:$0xf] %v8329_v28  ;;  %v9350_v28 = vld [vmem:[#allocation3 + $0x518] ss:$36 sps:$4 sm:$0xff]  }
 0x144   : > { %v9352_v36 = vld [vmem:[#allocation3 + $0x51c] ss:$36 sps:$4 sm:$0xff]   ;;  %3326 = vst [vmem:[#allocation3 + $0x1d0] sm:$0xf] %v8384_v14 }
 0x145   : > { %v9947_v49 = vpop.f32.mrf.mxu0  ;;  %v9949_v50 = vpop.f32.mrf.mxu1  ;;  %5865 = vmatmul.mubr.bf16.gmra.mxu1 %v9330_v15  ;;  %6106 = vmatmul.mubr.bf16.gmra.mxu0 %v9333_v24  ;;  %v3052_v15 = vld [vmem:[#allocation2 + $0x79] sm:$0xff]  ;;  %v8275_v24 = vpack.c.bf16 %v2407_v11, %v2407_v11  ;;  %v9355_v37 = vld [vmem:[#allocation3 + $0x4dc] ss:$36 sps:$4 sm:$0xff]   ;;  %v8332_v11 = vpack.c.bf16 %v2734_v1, %v2734_v1 }
 0x146   : > { %5872 = vmatprep.mubr.bf16.mxu1 %v9338_v32  ;;  %6113 = vmatprep.mubr.bf16.mxu0 %v9341_v33  ;;  %v8380_v32 = vpack.c.bf16 %v3052_v15, %v3052_v15  ;;  %v2408_v33 = vld [vmem:[#allocation2 + $0x97] sm:$0xff]  ;;  %v8385_v15 = vpack.c.bf16 %v3057_v13, %v3057_v13  ;;  %v3058_v1 = vld [vmem:[#allocation2 + $0xa9] sm:$0xff] }
 0x147   : > { %v5531_v51 = vpop.f32.mrf.mxu0  ;;  %v5643_v52 = vpop.f32.mrf.mxu1  ;;  %v8276_v39 = vpack.c.bf16 %v2408_v33, %v2408_v33  ;;  %2677 = vst [vmem:[#allocation3 + $0x1a4] sm:$0xf] %v8275_v24  ;;  %3004 = vst [vmem:[#allocation3 + $0x214] sm:$0xf] %v8332_v11  ;;  %v8387_v11 = vpack.c.bf16 %v3059_v2, %v3059_v2  ;;  %v2415_v13 = vld [vmem:[#allocation2 + $0xcf] sm:$0xff]  ;;  %v2740_v2 = vld [vmem:[#allocation2 + $0xd8] sm:$0xff] }
 0x148   : > { %3322 = vst [vmem:[#allocation3 + $0x140] sm:$0xf] %v8380_v32  ;;  %v8330_v52 = vpack.c.bf16 %v2732_v43, %v2732_v43  ;;  %3327 = vst [vmem:[#allocation3 + $0x1f4] sm:$0xf] %v8385_v15  ;;  %v9357_v43 = vld [vmem:[#allocation3 + $0x560] ss:$36 sps:$4 sm:$0xff]   ;;  %v8282_v15 = vpack.c.bf16 %v2414_v12, %v2414_v12  ;;  %v8338_v12 = vpack.c.bf16 %v2740_v2, %v2740_v2 }
 0x149   : > { %v9951_v54 = vpop.f32.mrf.mxu0  ;;  %v9953_v55 = vpop.f32.mrf.mxu1  ;;  %2678 = vst [vmem:[#allocation3 + $0x1c8] sm:$0xf] %v8276_v39  ;;  %v2738_v14 = vld [vmem:[#allocation2 + $0xc8] sm:$0xff]  ;;  %3329 = vst [vmem:[#allocation3 + $0x23c] sm:$0xf] %v8387_v11 }
 0x14a   : > { %3002 = vst [vmem:[#allocation3 + $0x1cc] sm:$0xf] %v8330_v52  ;;  %v2413_v52 = vld [vmem:[#allocation2 + $0xbf] sm:$0xff]  ;;  %2684 = vst [vmem:[#allocation3 + $0x2a0] sm:$0xf] %v8282_v15 }
 0x14b   : > { %v5534_v59 = vpop.f32.mrf.mxu0  ;;  %v5646_v62 = vpop.f32.mrf.mxu1  ;;  %v9375_v15 = vld [vmem:[#allocation3 + $0x5b4] ss:$36 sps:$4 sm:$0xff]   ;;  %3010 = vst [vmem:[#allocation3 + $0x2ec] sm:$0xf] %v8338_v12 }
 0x14c   : > { %v2411_v59 = vld [vmem:[#allocation2 + $0xaf] sm:$0xff]  ;;  %v3065_v12 = vld [vmem:[#allocation2 + $0xe1] sm:$0xff] }
 0x14d   : > { %v9955_v7 = vpop.f32.mrf.mxu0  ;;  %v9957_v8 = vpop.f32.mrf.mxu1  ;;  %5873 = vmatmul.mubr.bf16.gmra.mxu1 %v9336_v53  ;;  %6114 = vmatmul.mubr.bf16.gmra.mxu0 %v9339_v56  ;;  %v8331_v53 = vpack.c.bf16 %v2733_v46, %v2733_v46  ;;  %v3055_v56 = vld [vmem:[#allocation2 + $0x91] sm:$0xff]  ;;  %v8279_v10 = vpack.c.bf16 %v2411_v59, %v2411_v59  ;;  %v8281_v59 = vpack.c.bf16 %v2413_v52, %v2413_v52 }
 0x14e   : > { %5880 = vmatprep.mubr.bf16.mxu1 %v9345_v57  ;;  %6121 = vmatprep.mubr.bf16.mxu0 %v9348_v58  ;;  %v8382_v57 = vpack.c.bf16 %v3054_v47, %v3054_v47  ;;  %v2410_v58 = vld [vmem:[#allocation2 + $0xa7] sm:$0xff]  ;;  %v8383_v62 = vpack.c.bf16 %v3055_v56, %v3055_v56  ;;  %v9360_v46 = vld [vmem:[#allocation3 + $0x520] ss:$36 sps:$4 sm:$0xff]   ;;  %v9366_v56 = vld [vmem:[#allocation3 + $0x5ac] ss:$36 sps:$4 sm:$0xff]  }
 0x14f   : > { %v5539_v16 = vpop.f32.mrf.mxu0  ;;  %v5651_v21 = vpop.f32.mrf.mxu1  ;;  %v8278_v63 = vpack.c.bf16 %v2410_v58, %v2410_v58  ;;  %3003 = vst [vmem:[#allocation3 + $0x1f0] sm:$0xf] %v8331_v53  ;;  %2681 = vst [vmem:[#allocation3 + $0x234] sm:$0xf] %v8279_v10  ;;  %v2412_v47 = vld [vmem:[#allocation2 + $0xb7] sm:$0xff]  ;;  %v8386_v10 = vpack.c.bf16 %v3058_v1, %v3058_v1  ;;  %v2417_v1 = vld [vmem:[#allocation2 + $0xdf] sm:$0xff] }
 0x150   : > { %3324 = vst [vmem:[#allocation3 + $0x188] sm:$0xf] %v8382_v57  ;;  %3325 = vst [vmem:[#allocation3 + $0x1ac] sm:$0xf] %v8383_v62  ;;  %v2736_v53 = vld [vmem:[#allocation2 + $0xb8] sm:$0xff]  ;;  %v8280_v58 = vpack.c.bf16 %v2412_v47, %v2412_v47  ;;  %v2737_v62 = vld [vmem:[#allocation2 + $0xc0] sm:$0xff] }
 0x151   : > { %v9959_v48 = vpop.f32.mrf.mxu0  ;;  %v9961_v51 = vpop.f32.mrf.mxu1  ;;  %2680 = vst [vmem:[#allocation3 + $0x210] sm:$0xf] %v8278_v63  ;;  %v9369_v57 = vld [vmem:[#allocation3 + $0x56c] ss:$36 sps:$4 sm:$0xff]   ;;  %v8334_v63 = vpack.c.bf16 %v2736_v53, %v2736_v53  ;;  %2683 = vst [vmem:[#allocation3 + $0x27c] sm:$0xf] %v8281_v59 }
 0x152   : > { %2682 = vst [vmem:[#allocation3 + $0x258] sm:$0xf] %v8280_v58  ;;  %3328 = vst [vmem:[#allocation3 + $0x218] sm:$0xf] %v8386_v10  ;;  %v9364_v59 = vld [vmem:[#allocation3 + $0x5a8] ss:$36 sps:$4 sm:$0xff]  }
 0x153   : > { %v5542_v4 = vpop.f32.mrf.mxu0  ;;  %v5654_v9 = vpop.f32.mrf.mxu1  ;;  %3006 = vst [vmem:[#allocation3 + $0x25c] sm:$0xf] %v8334_v63  ;;  %v2416_v63 = vld [vmem:[#allocation2 + $0xd7] sm:$0xff] }
 0x154   : > { %v8335_v9 = vpack.c.bf16 %v2737_v62, %v2737_v62  ;;  %v9367_v62 = vld [vmem:[#allocation3 + $0x568] ss:$36 sps:$4 sm:$0xff]   ;;  %v8284_v11 = vpack.c.bf16 %v2416_v63, %v2416_v63  ;;  %v2742_v63 = vld [vmem:[#allocation2 + $0xe8] sm:$0xff] }
 0x155   : > { %v9963_v16 = vpop.f32.mrf.mxu0  ;;  %v9965_v21 = vpop.f32.mrf.mxu1  ;;  %5881 = vmatmul.mubr.bf16.gmra.mxu1 %v9343_v22  ;;  %6122 = vmatmul.mubr.bf16.gmra.mxu0 %v9346_v23 }
 0x156   : > { %5888 = vmatprep.mubr.bf16.mxu1 %v9352_v36  ;;  %6129 = vmatprep.mubr.bf16.mxu0 %v9355_v37  ;;  %3007 = vst [vmem:[#allocation3 + $0x280] sm:$0xf] %v8335_v9  ;;  %2686 = vst [vmem:[#allocation3 + $0x2e8] sm:$0xf] %v8284_v11 }
 0x157   : > { %v5547_v24 = vpop.f32.mrf.mxu0  ;;  %v5659_v25 = vpop.f32.mrf.mxu1 }
 0x158   : > { %v8283_v24 = vpack.c.bf16 %v2415_v13, %v2415_v13  ;;  %v2739_v25 = vld [vmem:[#allocation2 + $0xd0] sm:$0xff] }
 0x159   : > { %v9967_v32 = vpop.f32.mrf.mxu0  ;;  %v9969_v33 = vpop.f32.mrf.mxu1  ;;  %v3062_v13 = vld [vmem:[#allocation2 + $0xc9] sm:$0xff] }
 0x15a   : > { %2685 = vst [vmem:[#allocation3 + $0x2c4] sm:$0xf] %v8283_v24 }
 0x15b   : > { %v5550_v39 = vpop.f32.mrf.mxu0  ;;  %v5662_v22 = vpop.f32.mrf.mxu1 }
 0x15c   : > { %v8336_v39 = vpack.c.bf16 %v2738_v14, %v2738_v14  ;;  %v8337_v22 = vpack.c.bf16 %v2739_v25, %v2739_v25  ;;  %v9372_v14 = vld [vmem:[#allocation3 + $0x5f4] ss:$36 sps:$4 sm:$0xff]  }
 0x15d   : > { %v9971_v23 = vpop.f32.mrf.mxu0  ;;  %v9973_v42 = vpop.f32.mrf.mxu1  ;;  %5889 = vmatmul.mubr.bf16.gmra.mxu1 %v9350_v28  ;;  %6130 = vmatmul.mubr.bf16.gmra.mxu0 %v9353_v29  ;;  %v3060_v28 = vld [vmem:[#allocation2 + $0xb9] sm:$0xff]  ;;  %v3061_v29 = vld [vmem:[#allocation2 + $0xc1] sm:$0xff] }
 0x15e   : > { %10478 = vst [vmem:[#allocation10_spill] sm:$0xff] %v9973_v42  ;;  %5896 = vmatprep.mubr.bf16.mxu1 %v9359_v35  ;;  %6137 = vmatprep.mubr.bf16.mxu0 %v9362_v38  ;;  %3008 = vst [vmem:[#allocation3 + $0x2a4] sm:$0xf] %v8336_v39 }
 0x15f   : > { %v5555_v36 = vpop.f32.mrf.mxu0  ;;  %v5667_v37 = vpop.f32.mrf.mxu1  ;;  %3009 = vst [vmem:[#allocation3 + $0x2c8] sm:$0xf] %v8337_v22  ;;  %v9370_v22 = vld [vmem:[#allocation3 + $0x5f0] ss:$36 sps:$4 sm:$0xff]  }
 0x160   : > { %v8388_v36 = vpack.c.bf16 %v3060_v28, %v3060_v28  ;;  %v8389_v37 = vpack.c.bf16 %v3061_v29, %v3061_v29 }
 0x161   : > { %v9975_v3 = vpop.f32.mrf.mxu0  ;;  %v9977_v4 = vpop.f32.mrf.mxu1 }
 0x162   : > { %10479 = vst [vmem:[#allocation11_spill] sm:$0xff] %v9977_v4  ;;  %3330 = vst [vmem:[#allocation3 + $0x260] sm:$0xf] %v8388_v36  ;;  %v9373_v36 = vld [vmem:[#allocation3 + $0x5b0] ss:$36 sps:$4 sm:$0xff]  }
 0x163   : > { %v5558_v35 = vpop.f32.mrf.mxu0  ;;  %v5670_v38 = vpop.f32.mrf.mxu1  ;;  %3331 = vst [vmem:[#allocation3 + $0x284] sm:$0xf] %v8389_v37 }
 0x164   : > { %v3063_v35 = vld [vmem:[#allocation2 + $0xd1] sm:$0xff] }
 0x165   : > { %v9979_v47 = vpop.f32.mrf.mxu0  ;;  %v9981_v52 = vpop.f32.mrf.mxu1  ;;  %5897 = vmatmul.mubr.bf16.gmra.mxu1 %v9357_v43  ;;  %6138 = vmatmul.mubr.bf16.gmra.mxu0 %v9360_v46  ;;  %v8285_v43 = vpack.c.bf16 %v2417_v1, %v2417_v1  ;;  %v2741_v46 = vld [vmem:[#allocation2 + $0xe0] sm:$0xff]  ;;  %v8391_v37 = vpack.c.bf16 %v3063_v35, %v3063_v35 }
 0x166   : > { %10480 = vst [vmem:[#allocation12_spill] sm:$0xff] %v9981_v52  ;;  %5904 = vmatprep.mubr.bf16.mxu1 %v9366_v56  ;;  %6145 = vmatprep.mubr.bf16.mxu0 %v9369_v57  ;;  %v8339_v56 = vpack.c.bf16 %v2741_v46, %v2741_v46  ;;  %v8390_v57 = vpack.c.bf16 %v3062_v13, %v3062_v13  ;;  %v3064_v46 = vld [vmem:[#allocation2 + $0xd9] sm:$0xff]  ;;  %v9380_v13 = vld [vmem:[#allocation3 + $0x63c] ss:$36 sps:$4 sm:$0xff]  }
 0x167   : > { %v5563_v53 = vpop.f32.mrf.mxu0  ;;  %v5675_v58 = vpop.f32.mrf.mxu1  ;;  %2687 = vst [vmem:[#allocation3 + $0x30c] sm:$0xf] %v8285_v43  ;;  %3333 = vst [vmem:[#allocation3 + $0x2cc] sm:$0xf] %v8391_v37 }
 0x168   : > { %3011 = vst [vmem:[#allocation3 + $0x310] sm:$0xf] %v8339_v56  ;;  %3332 = vst [vmem:[#allocation3 + $0x2a8] sm:$0xf] %v8390_v57  ;;  %v2418_v53 = vld [vmem:[#allocation2 + $0xe7] sm:$0xff]  ;;  %v2419_v58 = vld [vmem:[#allocation2 + $0xef] sm:$0xff]  ;;  %v8392_v56 = vpack.c.bf16 %v3064_v46, %v3064_v46 }
 0x169   : > { %v9983_v9 = vpop.f32.mrf.mxu0  ;;  %v9985_v10 = vpop.f32.mrf.mxu1  ;;  %v8286_v11 = vpack.c.bf16 %v2418_v53, %v2418_v53  ;;  %v8287_v43 = vpack.c.bf16 %v2419_v58, %v2419_v58  ;;  %v9378_v53 = vld [vmem:[#allocation3 + $0x638] ss:$36 sps:$4 sm:$0xff]   ;;  %v2421_v46 = vld [vmem:[#allocation2 + $0xff] sm:$0xff] }
 0x16a   : > { %10481 = vst [vmem:[#allocation13_spill] sm:$0xff] %v9985_v10  ;;  %3334 = vst [vmem:[#allocation3 + $0x2f0] sm:$0xf] %v8392_v56  ;;  %v9381_v58 = vld [vmem:[#allocation3 + $0x5f8] ss:$36 sps:$4 sm:$0xff]   ;;  %v2745_v56 = vld [vmem:[#allocation2 + $0x100] sm:$0xff] }
 0x16b   : > { %v5566_v24 = vpop.f32.mrf.mxu0  ;;  %v5678_v25 = vpop.f32.mrf.mxu1  ;;  %2688 = vst [vmem:[#allocation3 + $0x330] sm:$0xf] %v8286_v11  ;;  %2689 = vst [vmem:[#allocation3 + $0x354] sm:$0xf] %v8287_v43  ;;  %v9389_v11 = vld [vmem:[#allocation3 + $0x644] ss:$36 sps:$4 sm:$0xff]  }
 0x16c   : > { %v8393_v25 = vpack.c.bf16 %v3065_v12, %v3065_v12  ;;  %v2420_v43 = vld [vmem:[#allocation2 + $0xf7] sm:$0xff] }
 0x16d   : > { %v9987_v28 = vpop.f32.mrf.mxu0  ;;  %v9989_v29 = vpop.f32.mrf.mxu1  ;;  %5905 = vmatmul.mubr.bf16.gmra.mxu1 %v9364_v59  ;;  %6146 = vmatmul.mubr.bf16.gmra.mxu0 %v9367_v62  ;;  %v2743_v59 = vld [vmem:[#allocation2 + $0xf0] sm:$0xff]  ;;  %v8340_v62 = vpack.c.bf16 %v2742_v63, %v2742_v63  ;;  %v8288_v12 = vpack.c.bf16 %v2420_v43, %v2420_v43 }
 0x16e   : > { %10482 = vst [vmem:[#allocation14_spill] sm:$0xff] %v9989_v29  ;;  %5912 = vmatprep.mubr.bf16.mxu1 %v9372_v14  ;;  %6153 = vmatprep.mubr.bf16.mxu0 %v9375_v15  ;;  %v9383_v14 = vld [vmem:[#allocation3 + $0x5fc] ss:$36 sps:$4 sm:$0xff]   ;;  %v8341_v15 = vpack.c.bf16 %v2743_v59, %v2743_v59  ;;  %3335 = vst [vmem:[#allocation3 + $0x314] sm:$0xf] %v8393_v25  ;;  %v8343_v25 = vpack.c.bf16 %v2745_v56, %v2745_v56 }
 0x16f   : > { %v5571_v38 = vpop.f32.mrf.mxu0  ;;  %v5683_v39 = vpop.f32.mrf.mxu1  ;;  %3012 = vst [vmem:[#allocation3 + $0x334] sm:$0xf] %v8340_v62  ;;  %v9386_v63 = vld [vmem:[#allocation3 + $0x684] ss:$36 sps:$4 sm:$0xff]   ;;  %2690 = vst [vmem:[#allocation3 + $0x378] sm:$0xf] %v8288_v12 }
 0x170   : > { %3013 = vst [vmem:[#allocation3 + $0x358] sm:$0xf] %v8341_v15  ;;  %v2744_v15 = vld [vmem:[#allocation2 + $0xf8] sm:$0xff]  ;;  %3015 = vst [vmem:[#allocation3 + $0x3a0] sm:$0xf] %v8343_v25  ;;  %v2422_v56 = vld [vmem:[#allocation2 + $0x107] sm:$0xff] }
 0x171   : > { %v9991_v1 = vpop.f32.mrf.mxu0  ;;  %v9993_v2 = vpop.f32.mrf.mxu1  ;;  %v9387_v12 = vld [vmem:[#allocation3 + $0x640] ss:$36 sps:$4 sm:$0xff]   ;;  %v3068_v25 = vld [vmem:[#allocation2 + $0xf9] sm:$0xff] }
 0x172   : > { %10483 = vst [vmem:[#allocation15_spill] sm:$0xff] %v9993_v2 }
 0x173   : > { %v5574_v57 = vpop.f32.mrf.mxu0  ;;  %v5686_v24 = vpop.f32.mrf.mxu1 }
 0x174   : > { %v3066_v57 = vld [vmem:[#allocation2 + $0xe9] sm:$0xff] }
 0x175   : > { %v9995_v35 = vpop.f32.mrf.mxu0  ;;  %v9997_v38 = vpop.f32.mrf.mxu1  ;;  %5913 = vmatmul.mubr.bf16.gmra.mxu1 %v9370_v22  ;;  %6154 = vmatmul.mubr.bf16.gmra.mxu0 %v9373_v36  ;;  %v8289_v22 = vpack.c.bf16 %v2421_v46, %v2421_v46  ;;  %v8342_v36 = vpack.c.bf16 %v2744_v15, %v2744_v15  ;;  %v9384_v15 = vld [vmem:[#allocation3 + $0x680] ss:$36 sps:$4 sm:$0xff]  }
 0x176   : > { %10484 = vst [vmem:[#allocation16_spill] sm:$0xff] %v9997_v38  ;;  %5920 = vmatprep.mubr.bf16.mxu1 %v9380_v13  ;;  %6161 = vmatprep.mubr.bf16.mxu0 %v9383_v14  ;;  %v3067_v13 = vld [vmem:[#allocation2 + $0xf1] sm:$0xff] }
 0x177   : > { %v5579_v39 = vpop.f32.mrf.mxu0  ;;  %v5691_v37 = vpop.f32.mrf.mxu1  ;;  %2691 = vst [vmem:[#allocation3 + $0x39c] sm:$0xf] %v8289_v22  ;;  %3014 = vst [vmem:[#allocation3 + $0x37c] sm:$0xf] %v8342_v36 }
 0x178   : > { %v8394_v39 = vpack.c.bf16 %v3066_v57, %v3066_v57  ;;  %v8395_v37 = vpack.c.bf16 %v3067_v13, %v3067_v13  ;;  %v2423_v57 = vld [vmem:[#allocation2 + $0x10f] sm:$0xff] }
 0x179   : > { %v9999_v59 = vpop.f32.mrf.mxu0  ;;  %v10001_v62 = vpop.f32.mrf.mxu1  ;;  %v2746_v13 = vld [vmem:[#allocation2 + $0x108] sm:$0xff] }
 0x17a   : > { %10485 = vst [vmem:[#allocation17_spill] sm:$0xff] %v10001_v62  ;;  %3336 = vst [vmem:[#allocation3 + $0x338] sm:$0xf] %v8394_v39  ;;  %v3069_v39 = vld [vmem:[#allocation2 + $0x101] sm:$0xff] }
 0x17b   : > { %v5582_v14 = vpop.f32.mrf.mxu0  ;;  %v5694_v24 = vpop.f32.mrf.mxu1  ;;  %3337 = vst [vmem:[#allocation3 + $0x35c] sm:$0xf] %v8395_v37  ;;  %v9393_v37 = vld [vmem:[#allocation3 + $0x6cc] ss:$36 sps:$4 sm:$0xff]   ;;  %v8397_v62 = vpack.c.bf16 %v3069_v39, %v3069_v39 }
 0x17c   : > { %v8290_v14 = vpack.c.bf16 %v2422_v56, %v2422_v56  ;;  %v8291_v24 = vpack.c.bf16 %v2423_v57, %v2423_v57  ;;  %v10018_v57 = vld [vmem:[%s10468_s4] ss:$0 sm:$0xff] }
 0x17d   : > { %v10003_v0 = vpop.f32.mrf.mxu0  ;;  %v10005_v34 = vpop.f32.mrf.mxu1  ;;  %5921 = vmatmul.mubr.bf16.gmra.mxu1 %v9378_v53  ;;  %6162 = vmatmul.mubr.bf16.gmra.mxu0 %v9381_v58  ;;  %v2747_v53 = vld [vmem:[#allocation2 + $0x110] sm:$0xff]  ;;  %v8344_v58 = vpack.c.bf16 %v2746_v13, %v2746_v13  ;;  %3339 = vst [vmem:[#allocation3 + $0x3a4] sm:$0xf] %v8397_v62  ;;  %v5498_v10 = vadd.f32 %v10018_v57, %v9909_v17 }
 0x17e   : > { %10486 = vst [vmem:[#allocation18_spill] sm:$0xff] %v10005_v34  ;;  %5928 = vmatprep.mubr.bf16.mxu1 %v9386_v63  ;;  %6169 = vmatprep.mubr.bf16.mxu0 %v9389_v11  ;;  %v9396_v63 = vld [vmem:[#allocation3 + $0x68c] ss:$36 sps:$4 sm:$0xff]   ;;  %v8345_v11 = vpack.c.bf16 %v2747_v53, %v2747_v53  ;;  %2692 = vst [vmem:[#allocation3 + $0x3c0] sm:$0xf] %v8290_v14  ;;  %v2427_v17 = vld [vmem:[#allocation2 + $0x12f] sm:$0xff]  ;;  %v5506_v42 = vadd.f32 %v10018_v57, %v9918_v40 }
 0x17f   : > { %v5587_v43 = vpop.f32.mrf.mxu0  ;;  %v5699_v46 = vpop.f32.mrf.mxu1  ;;  %2693 = vst [vmem:[#allocation3 + $0x3e4] sm:$0xf] %v8291_v24  ;;  %3016 = vst [vmem:[#allocation3 + $0x3c4] sm:$0xf] %v8344_v58  ;;  %v9391_v14 = vld [vmem:[#allocation3 + $0x6c8] ss:$36 sps:$4 sm:$0xff]  }
 0x180   : > { %v8396_v43 = vpack.c.bf16 %v3068_v25, %v3068_v25  ;;  %3017 = vst [vmem:[#allocation3 + $0x3e8] sm:$0xf] %v8345_v11  ;;  %v9394_v24 = vld [vmem:[#allocation3 + $0x688] ss:$36 sps:$4 sm:$0xff]  }
 0x181   : > { %v10007_v22 = vpop.f32.mrf.mxu0  ;;  %v10009_v36 = vpop.f32.mrf.mxu1  ;;  %v2424_v53 = vld [vmem:[#allocation2 + $0x117] sm:$0xff]  ;;  %v2425_v58 = vld [vmem:[#allocation2 + $0x11f] sm:$0xff] }
 0x182   : > { %10487 = vst [vmem:[#allocation19_spill] sm:$0xff] %v10009_v36  ;;  %3338 = vst [vmem:[#allocation3 + $0x380] sm:$0xf] %v8396_v43  ;;  %v2748_v25 = vld [vmem:[#allocation2 + $0x118] sm:$0xff]  ;;  %v8293_v62 = vpack.c.bf16 %v2425_v58, %v2425_v58 }
 0x183   : > { %v5590_v46 = vpop.f32.mrf.mxu0  ;;  %v5702_v34 = vpop.f32.mrf.mxu1  ;;  %v3071_v43 = vld [vmem:[#allocation2 + $0x111] sm:$0xff] }
 0x184   : > { %v9401_v46 = vld [vmem:[#allocation3 + $0x714] ss:$36 sps:$4 sm:$0xff]   ;;  %2695 = vst [vmem:[#allocation3 + $0x42c] sm:$0xf] %v8293_v62  ;;  %v8399_v29 = vpack.c.bf16 %v3071_v43, %v3071_v43  ;;  %v2428_v40 = vld [vmem:[#allocation2 + $0x137] sm:$0xff] }
 0x185   : > { %v10011_v38 = vpop.f32.mrf.mxu0  ;;  %v10013_v56 = vpop.f32.mrf.mxu1  ;;  %5929 = vmatmul.mubr.bf16.gmra.mxu1 %v9384_v15  ;;  %6170 = vmatmul.mubr.bf16.gmra.mxu0 %v9387_v12  ;;  %v8292_v15 = vpack.c.bf16 %v2424_v53, %v2424_v53  ;;  %v2749_v12 = vld [vmem:[#allocation2 + $0x120] sm:$0xff] }
 0x186   : > { %10488 = vst [vmem:[#allocation20_spill] sm:$0xff] %v10013_v56  ;;  %5936 = vmatprep.mubr.bf16.mxu1 %v9393_v37  ;;  %6177 = vmatprep.mubr.bf16.mxu0 %v9396_v63  ;;  %v8346_v37 = vpack.c.bf16 %v2748_v25, %v2748_v25  ;;  %v3070_v63 = vld [vmem:[#allocation2 + $0x109] sm:$0xff]  ;;  %v8347_v36 = vpack.c.bf16 %v2749_v12, %v2749_v12  ;;  %3341 = vst [vmem:[#allocation3 + $0x3ec] sm:$0xf] %v8399_v29  ;;  %v9402_v62 = vld [vmem:[#allocation3 + $0x6d0] ss:$36 sps:$4 sm:$0xff]  }
 0x187   : > { %v5595_v34 = vpop.f32.mrf.mxu0  ;;  %v5707_v13 = vpop.f32.mrf.mxu1  ;;  %v9404_v56 = vld [vmem:[#allocation3 + $0x6d4] ss:$36 sps:$4 sm:$0xff]   ;;  %2694 = vst [vmem:[#allocation3 + $0x408] sm:$0xf] %v8292_v15 }
 0x188   : > { %v8398_v34 = vpack.c.bf16 %v3070_v63, %v3070_v63  ;;  %3018 = vst [vmem:[#allocation3 + $0x40c] sm:$0xf] %v8346_v37  ;;  %3019 = vst [vmem:[#allocation3 + $0x430] sm:$0xf] %v8347_v36  ;;  %v9399_v15 = vld [vmem:[#allocation3 + $0x710] ss:$36 sps:$4 sm:$0xff]   ;;  %v5501_v37 = vadd.f32 %v10018_v57, %v9913_v26 }
 0x189   : > { %v10020_v39 = vpop.f32.mrf.mxu0  ;;  %v10022_v11 = vpop.f32.mrf.mxu1  ;;  %v2426_v63 = vld [vmem:[#allocation2 + $0x127] sm:$0xff] }
 0x18a   : > { %10489 = vst [vmem:[#allocation21_spill] sm:$0xff] %v10022_v11  ;;  %3340 = vst [vmem:[#allocation3 + $0x3c8] sm:$0xf] %v8398_v34  ;;  %v2750_v36 = vld [vmem:[#allocation2 + $0x128] sm:$0xff] }
 0x18b   : > { %v5598_v13 = vpop.f32.mrf.mxu0  ;;  %v5710_v2 = vpop.f32.mrf.mxu1  ;;  %v8348_v29 = vpack.c.bf16 %v2750_v36, %v2750_v36 }
 0x18c   : > { %v8294_v13 = vpack.c.bf16 %v2426_v63, %v2426_v63 }
 0x18d   : > { %v10026_v53 = vpop.f32.mrf.mxu0  ;;  %v5746_v58 = vpop.f32.mrf.mxu1  ;;  %5937 = vmatmul.mubr.bf16.gmra.mxu1 %v9391_v14  ;;  %6178 = vmatmul.mubr.bf16.gmra.mxu0 %v9394_v24  ;;  %v8295_v14 = vpack.c.bf16 %v2427_v17, %v2427_v17  ;;  %v2751_v24 = vld [vmem:[#allocation2 + $0x130] sm:$0xff]  ;;  %3020 = vst [vmem:[#allocation3 + $0x454] sm:$0xf] %v8348_v29 }
 0x18e   : > { %v5747_v25 = vadd.f32 %v5746_v58, %v5498_v10  ;;  %5944 = vmatprep.mubr.bf16.mxu1 %v9401_v46  ;;  %6185 = vmatprep.mubr.bf16.mxu0 %v9404_v56  ;;  %v3072_v10 = vld [vmem:[#allocation2 + $0x119] sm:$0xff]  ;;  %v3073_v46 = vld [vmem:[#allocation2 + $0x121] sm:$0xff]  ;;  %v9407_v58 = vld [vmem:[#allocation3 + $0x75c] ss:$36 sps:$4 sm:$0xff]   ;;  %2696 = vst [vmem:[#allocation3 + $0x450] sm:$0xf] %v8294_v13 }
 0x18f   : > { %v5603_v12 = vpop.f32.mrf.mxu0  ;;  %v5748_v2 = vpop.f32.mrf.mxu1  ;;  %v8400_v11 = vpack.c.bf16 %v3072_v10, %v3072_v10  ;;  %2697 = vst [vmem:[#allocation3 + $0x474] sm:$0xf] %v8295_v14  ;;  %v8401_v26 = vpack.c.bf16 %v3073_v46, %v3073_v46  ;;  %v9409_v13 = vld [vmem:[#allocation3 + $0x718] ss:$36 sps:$4 sm:$0xff]   ;;  %v5509_v14 = vadd.f32 %v10018_v57, %v9924_v60  ;;  %v8296_v10 = vpack.c.bf16 %v2428_v40, %v2428_v40  ;;  %v2753_v46 = vld [vmem:[#allocation2 + $0x140] sm:$0xff] }
 0x190   : > { %v9411_v12 = vld [vmem:[#allocation3 + $0x71c] ss:$36 sps:$4 sm:$0xff]   ;;  %v8349_v2 = vpack.c.bf16 %v2751_v24, %v2751_v24  ;;  %v2429_v24 = vld [vmem:[#allocation2 + $0x13f] sm:$0xff]  ;;  %v5514_v40 = vadd.f32 %v10018_v57, %v9931_v19 }
 0x191   : > { %v10030_v43 = vpop.f32.mrf.mxu0  ;;  %v5749_v34 = vpop.f32.mrf.mxu1  ;;  %3342 = vst [vmem:[#allocation3 + $0x410] sm:$0xf] %v8400_v11  ;;  %3343 = vst [vmem:[#allocation3 + $0x434] sm:$0xf] %v8401_v26  ;;  %v2752_v11 = vld [vmem:[#allocation2 + $0x138] sm:$0xff]  ;;  %v2430_v19 = vld [vmem:[#allocation2 + $0x147] sm:$0xff] }
 0x192   : > { %v5750_v56 = vadd.f32 %v5749_v34, %v5501_v37  ;;  %3021 = vst [vmem:[#allocation3 + $0x478] sm:$0xf] %v8349_v2  ;;  %v9405_v34 = vld [vmem:[#allocation3 + $0x758] ss:$36 sps:$4 sm:$0xff]   ;;  %v3075_v2 = vld [vmem:[#allocation2 + $0x131] sm:$0xff] }
 0x193   : > { %v5606_v52 = vpop.f32.mrf.mxu0  ;;  %v5751_v4 = vpop.f32.mrf.mxu1  ;;  %v9417_v26 = vld [vmem:[#allocation3 + $0x764] ss:$36 sps:$4 sm:$0xff]   ;;  %2698 = vst [vmem:[#allocation3 + $0x498] sm:$0xf] %v8296_v10 }
 0x194   : > { %v9415_v10 = vld [vmem:[#allocation3 + $0x760] ss:$36 sps:$4 sm:$0xff]  }
 0x195   : > { %v5754_v63 = vpop.f32.mrf.mxu1  ;;  %5945 = vmatmul.mubr.bf16.gmra.mxu1 %v9399_v15  ;;  %v5995_v17 = vpop.f32.mrf.mxu0  ;;  %6186 = vmatmul.mubr.bf16.gmra.mxu0 %v9402_v62  ;;  %v8297_v62 = vpack.c.bf16 %v2429_v24, %v2429_v24 }
 0x196   : > { %v5755_v37 = vadd.f32 %v5754_v63, %v5506_v42  ;;  %v10034_v36 = vadd.f32 %v5995_v17, %v5747_v25  ;;  %5952 = vmatprep.mubr.bf16.mxu1 %v9407_v58  ;;  %6193 = vmatprep.mubr.bf16.mxu0 %v9411_v12  ;;  %v8350_v42 = vpack.c.bf16 %v2752_v11, %v2752_v11  ;;  %v3074_v25 = vld [vmem:[#allocation2 + $0x129] sm:$0xff] }
 0x197   : > { %v5756_v4 = vpop.f32.mrf.mxu1  ;;  %v5997_v52 = vpop.f32.mrf.mxu0  ;;  %v9420_v63 = vld [vmem:[#allocation3 + $0x1c] ss:$36 sps:$4 sm:$0xff]   ;;  %v8351_v17 = vpack.c.bf16 %v2753_v46, %v2753_v46  ;;  %2699 = vst [vmem:[#allocation3 + $0x4bc] sm:$0xf] %v8297_v62  ;;  %v5517_v46 = vadd.f32 %v10018_v57, %v9935_v44 }
 0x198   : > { %10490 = vst [vmem:[#allocation22_spill] sm:$0xff] %v10034_v36  ;;  %v8402_v4 = vpack.c.bf16 %v3074_v25, %v3074_v25  ;;  %3022 = vst [vmem:[#allocation3 + $0x49c] sm:$0xf] %v8350_v42  ;;  %v8403_v36 = vpack.c.bf16 %v3075_v2, %v3075_v2  ;;  %v9418_v62 = vld [vmem:[#allocation3 + $0x18] ss:$36 sps:$4 sm:$0xff]  }
 0x199   : > { %v5757_v29 = vpop.f32.mrf.mxu1  ;;  %v5998_v15 = vpop.f32.mrf.mxu0  ;;  %3023 = vst [vmem:[#allocation3 + $0x4c0] sm:$0xf] %v8351_v17  ;;  %v2431_v42 = vld [vmem:[#allocation2 + $0x14f] sm:$0xff]  ;;  %v8298_v17 = vpack.c.bf16 %v2430_v19, %v2430_v19 }
 0x19a   : > { %v5758_v58 = vadd.f32 %v5757_v29, %v5509_v14  ;;  %v10038_v12 = vadd.f32 %v5998_v15, %v5750_v56  ;;  %3344 = vst [vmem:[#allocation3 + $0x458] sm:$0xf] %v8402_v4  ;;  %3345 = vst [vmem:[#allocation3 + $0x47c] sm:$0xf] %v8403_v36  ;;  %v2754_v25 = vld [vmem:[#allocation2 + $0x148] sm:$0xff]  ;;  %v2755_v36 = vld [vmem:[#allocation2 + $0x150] sm:$0xff] }
 0x19b   : > { %v5759_v52 = vpop.f32.mrf.mxu1  ;;  %v6000_v60 = vpop.f32.mrf.mxu0  ;;  %v8352_v4 = vpack.c.bf16 %v2754_v25, %v2754_v25  ;;  %2700 = vst [vmem:[#allocation3 + $0x4e0] sm:$0xf] %v8298_v17  ;;  %v10491_v25 = vmov 0.0   ;;  %v9421_v17 = vld [vmem:[#allocation3 + $0x60] ss:$36 sps:$4 sm:$0xff]  }
 0x19c   : > { %v3077_v52 = vld [vmem:[#allocation2 + $0x141] sm:$0xff]  ;;  %v9423_v60 = vld [vmem:[#allocation3 + $0x64] ss:$36 sps:$4 sm:$0xff]  }
 0x19d   : > { %v5762_v24 = vpop.f32.mrf.mxu1  ;;  %5953 = vmatmul.mubr.bf16.gmra.mxu1 %v9405_v34  ;;  %v6003_v14 = vpop.f32.mrf.mxu0  ;;  %6194 = vmatmul.mubr.bf16.gmra.mxu0 %v9409_v13  ;;  %v8299_v13 = vpack.c.bf16 %v2431_v42, %v2431_v42  ;;  %3024 = vst [vmem:[#allocation3 + $0x4e4] sm:$0xf] %v8352_v4  ;;  %v8405_v44 = vpack.c.bf16 %v3077_v52, %v3077_v52  ;;  %v2433_v4 = vld [vmem:[#allocation2 + $0x15f] sm:$0xff] }
 0x19e   : > { %v5763_v56 = vadd.f32 %v5762_v24, %v5514_v40  ;;  %v10042_v11 = vadd.f32 %v6003_v14, %v5755_v37  ;;  %6201 = vmatprep.mubr.bf16.mxu0 %v9417_v26  ;;  %6242 = vmatprep.mubr.bf16.mxu1 %v9420_v63  ;;  %v3076_v37 = vld [vmem:[#allocation2 + $0x139] sm:$0xff]  ;;  %v8353_v40 = vpack.c.bf16 %v2755_v36, %v2755_v36 }
 0x19f   : > { %v5764_v29 = vpop.f32.mrf.mxu1  ;;  %v6005_v15 = vpop.f32.mrf.mxu0  ;;  %v8404_v24 = vpack.c.bf16 %v3076_v37, %v3076_v37  ;;  %2701 = vst [vmem:[#allocation3 + $0x504] sm:$0xf] %v8299_v13  ;;  %3347 = vst [vmem:[#allocation3 + $0x4c4] sm:$0xf] %v8405_v44  ;;  %v9424_v13 = vld [vmem:[#allocation3 + $0x20] ss:$36 sps:$4 sm:$0xff]  }
 0x1a0   : > { %v5522_v15 = vadd.f32 %v10018_v57, %v9939_v5  ;;  %3025 = vst [vmem:[#allocation3 + $0x508] sm:$0xf] %v8353_v40  ;;  %v5525_v5 = vadd.f32 %v10018_v57, %v9943_v30  ;;  %v2432_v36 = vld [vmem:[#allocation2 + $0x157] sm:$0xff]  ;;  %v2757_v40 = vld [vmem:[#allocation2 + $0x160] sm:$0xff] }
 0x1a1   : > { %v5765_v2 = vpop.f32.mrf.mxu1  ;;  %v6006_v34 = vpop.f32.mrf.mxu0  ;;  %3346 = vst [vmem:[#allocation3 + $0x4a0] sm:$0xf] %v8404_v24  ;;  %v8300_v52 = vpack.c.bf16 %v2432_v36, %v2432_v36  ;;  %v3078_v24 = vld [vmem:[#allocation2 + $0x149] sm:$0xff]  ;;  %v5530_v36 = vadd.f32 %v10018_v57, %v9947_v49  ;;  %v5533_v49 = vadd.f32 %v10018_v57, %v9951_v54 }
 0x1a2   : > { %v5766_v26 = vadd.f32 %v5765_v2, %v5517_v46  ;;  %v10046_v63 = vadd.f32 %v6006_v34, %v5758_v58 }
 0x1a3   : > { %v5767_v14 = vpop.f32.mrf.mxu1  ;;  %v6008_v29 = vpop.f32.mrf.mxu0  ;;  %2702 = vst [vmem:[#allocation3 + $0x528] sm:$0xf] %v8300_v52  ;;  %v9425_v52 = vld [vmem:[#allocation3 + $0xa8] ss:$36 sps:$4 sm:$0xff]  }
 0x1a4   : > { %v3079_v14 = vld [vmem:[#allocation2 + $0x151] sm:$0xff] }
 0x1a5   : > { %v5770_v19 = vpop.f32.mrf.mxu1  ;;  %v6011_v42 = vpop.f32.mrf.mxu0  ;;  %6202 = vmatmul.mubr.bf16.gmra.mxu0 %v9415_v10  ;;  %6243 = vmatmul.mubr.bf16.vlgmr.msra.gmra.mxu1 %v9418_v62  ;;  %v2756_v10 = vld [vmem:[#allocation2 + $0x158] sm:$0xff]  ;;  %v8407_v30 = vpack.c.bf16 %v3079_v14, %v3079_v14 }
 0x1a6   : > { %v5771_v58 = vadd.f32 %v5770_v19, %v5522_v15  ;;  %v10050_v46 = vadd.f32 %v6011_v42, %v5763_v56  ;;  %6250 = vmatprep.mubr.bf16.mxu1 %v9423_v60  ;;  %8847 = vmatprep.mubr.msk.bf16.mxu0 %vm9628_vm0, %v10491_v25  ;;  %v8301_v56 = vpack.c.bf16 %v2433_v4, %v2433_v4  ;;  %v9427_v15 = vld [vmem:[#allocation3 + $0xac] ss:$36 sps:$4 sm:$0xff]  }
 0x1a7   : > { %v5772_v2 = vpop.f32.mrf.mxu1  ;;  %v6013_v34 = vpop.f32.mrf.mxu0  ;;  %v8354_v60 = vpack.c.bf16 %v2756_v10, %v2756_v10  ;;  %v8355_v19 = vpack.c.bf16 %v2757_v40, %v2757_v40  ;;  %v8406_v42 = vpack.c.bf16 %v3078_v24, %v3078_v24  ;;  %3349 = vst [vmem:[#allocation3 + $0x50c] sm:$0xf] %v8407_v30  ;;  %v2434_v40 = vld [vmem:[#allocation2 + $0x167] sm:$0xff] }
 0x1a8   : > { %2703 = vst [vmem:[#allocation3 + $0x54c] sm:$0xf] %v8301_v56  ;;  %v9428_v56 = vld [vmem:[#allocation3 + $0x68] ss:$36 sps:$4 sm:$0xff]   ;;  %v2758_v24 = vld [vmem:[#allocation2 + $0x168] sm:$0xff]  ;;  %v8302_v14 = vpack.c.bf16 %v2434_v40, %v2434_v40  ;;  %v5538_v40 = vadd.f32 %v10018_v57, %v9955_v7  ;;  %v5541_v7 = vadd.f32 %v10018_v57, %v9959_v48 }
 0x1a9   : > { %v5773_v62 = vpop.f32.mrf.mxu1  ;;  %v6014_v37 = vpop.f32.mrf.mxu0  ;;  %3026 = vst [vmem:[#allocation3 + $0x52c] sm:$0xf] %v8354_v60  ;;  %3027 = vst [vmem:[#allocation3 + $0x550] sm:$0xf] %v8355_v19  ;;  %v2435_v60 = vld [vmem:[#allocation2 + $0x16f] sm:$0xff] }
 0x1aa   : > { %v5774_v29 = vadd.f32 %v5773_v62, %v5525_v5  ;;  %v10056_v44 = vadd.f32 %v6014_v37, %v5766_v26  ;;  %3348 = vst [vmem:[#allocation3 + $0x4e8] sm:$0xf] %v8406_v42  ;;  %v8303_v19 = vpack.c.bf16 %v2435_v60, %v2435_v60  ;;  %v8356_v42 = vpack.c.bf16 %v2758_v24, %v2758_v24 }
 0x1ab   : > { %v5775_v2 = vpop.f32.mrf.mxu1  ;;  %v6016_v34 = vpop.f32.mrf.mxu0  ;;  %2704 = vst [vmem:[#allocation3 + $0x570] sm:$0xf] %v8302_v14  ;;  %v9429_v14 = vld [vmem:[#allocation3 + $0xf0] ss:$36 sps:$4 sm:$0xff]  }
 0x1ac   : > { %v3081_v2 = vld [vmem:[#allocation2 + $0x161] sm:$0xff]  ;;  %2705 = vst [vmem:[#allocation3 + $0x594] sm:$0xf] %v8303_v19  ;;  %3028 = vst [vmem:[#allocation3 + $0x574] sm:$0xf] %v8356_v42 }
 0x1ad   : > { %v5778_v4 = vpop.f32.mrf.mxu1  ;;  %v6019_v10 = vpop.f32.mrf.mxu0  ;;  %6251 = vmatmul.mubr.bf16.gmra.mxu1 %v9421_v17  ;;  %8848 = vmatmul.mubr.bf16.vlgmr.msra.gmra.mxu0 %v9424_v13  ;;  %v8409_v54 = vpack.c.bf16 %v3081_v2, %v3081_v2  ;;  %v9432_v19 = vld [vmem:[#allocation3 + $0xb0] ss:$36 sps:$4 sm:$0xff]  }
 0x1ae   : > { %v5779_v26 = vadd.f32 %v5778_v4, %v5530_v36  ;;  %v10060_v5 = vadd.f32 %v6019_v10, %v5771_v58  ;;  %6258 = vmatprep.mubr.bf16.mxu1 %v9427_v15  ;;  %8851 = vmatprep.mubr.msk.bf16.mxu0 %vm9628_vm0, %v10491_v25  ;;  %v2759_v58 = vld [vmem:[#allocation2 + $0x170] sm:$0xff]  ;;  %v3080_v15 = vld [vmem:[#allocation2 + $0x159] sm:$0xff]  ;;  %v9431_v36 = vld [vmem:[#allocation3 + $0xf4] ss:$36 sps:$4 sm:$0xff]  }
 0x1af   : > { %v5780_v62 = vpop.f32.mrf.mxu1  ;;  %v6021_v37 = vpop.f32.mrf.mxu0  ;;  %v8357_v4 = vpack.c.bf16 %v2759_v58, %v2759_v58  ;;  %v8408_v10 = vpack.c.bf16 %v3080_v15, %v3080_v15  ;;  %3351 = vst [vmem:[#allocation3 + $0x554] sm:$0xf] %v8409_v54  ;;  %v2436_v58 = vld [vmem:[#allocation2 + $0x177] sm:$0xff]  ;;  %v2437_v42 = vld [vmem:[#allocation2 + $0x17f] sm:$0xff] }
 0x1b0   : > { %v2760_v15 = vld [vmem:[#allocation2 + $0x178] sm:$0xff]  ;;  %v8304_v2 = vpack.c.bf16 %v2436_v58, %v2436_v58  ;;  %v5546_v58 = vadd.f32 %v10018_v57, %v9963_v16  ;;  %v5549_v16 = vadd.f32 %v10018_v57, %v9967_v32 }
 0x1b1   : > { %v5781_v17 = vpop.f32.mrf.mxu1  ;;  %v6022_v13 = vpop.f32.mrf.mxu0  ;;  %3029 = vst [vmem:[#allocation3 + $0x598] sm:$0xf] %v8357_v4  ;;  %3350 = vst [vmem:[#allocation3 + $0x530] sm:$0xf] %v8408_v10  ;;  %v8305_v4 = vpack.c.bf16 %v2437_v42, %v2437_v42  ;;  %v8358_v10 = vpack.c.bf16 %v2760_v15, %v2760_v15 }
 0x1b2   : > { %v5782_v34 = vadd.f32 %v5781_v17, %v5533_v49  ;;  %v10066_v30 = vadd.f32 %v6022_v13, %v5774_v29  ;;  %2706 = vst [vmem:[#allocation3 + $0x5b8] sm:$0xf] %v8304_v2  ;;  %v9433_v2 = vld [vmem:[#allocation3 + $0x138] ss:$36 sps:$4 sm:$0xff]  }
 0x1b3   : > { %v5783_v62 = vpop.f32.mrf.mxu1  ;;  %v6024_v37 = vpop.f32.mrf.mxu0  ;;  %2707 = vst [vmem:[#allocation3 + $0x5dc] sm:$0xf] %v8305_v4  ;;  %3030 = vst [vmem:[#allocation3 + $0x5bc] sm:$0xf] %v8358_v10  ;;  %v9436_v4 = vld [vmem:[#allocation3 + $0xf8] ss:$36 sps:$4 sm:$0xff]  }
 0x1b4   : > { %v3083_v62 = vld [vmem:[#allocation2 + $0x171] sm:$0xff] }
 0x1b5   : > { %v5786_v60 = vpop.f32.mrf.mxu1  ;;  %v6027_v24 = vpop.f32.mrf.mxu0  ;;  %6259 = vmatmul.mubr.bf16.gmra.mxu1 %v9425_v52  ;;  %8852 = vmatmul.mubr.bf16.gmra.mxu0 %v9428_v56  ;;  %v8411_v48 = vpack.c.bf16 %v3083_v62, %v3083_v62  ;;  %v2439_v10 = vld [vmem:[#allocation2 + $0x18f] sm:$0xff] }
 0x1b6   : > { %v5787_v29 = vadd.f32 %v5786_v60, %v5538_v40  ;;  %v10070_v49 = vadd.f32 %v6027_v24, %v5779_v26  ;;  %6266 = vmatprep.mubr.bf16.mxu1 %v9431_v36  ;;  %8855 = vmatprep.mubr.msk.bf16.mxu0 %vm9628_vm0, %v10491_v25  ;;  %v2761_v26 = vld [vmem:[#allocation2 + $0x180] sm:$0xff]  ;;  %v3082_v36 = vld [vmem:[#allocation2 + $0x169] sm:$0xff] }
 0x1b7   : > { %v5788_v17 = vpop.f32.mrf.mxu1  ;;  %v6029_v13 = vpop.f32.mrf.mxu0  ;;  %v9435_v40 = vld [vmem:[#allocation3 + $0x13c] ss:$36 sps:$4 sm:$0xff]   ;;  %v8359_v60 = vpack.c.bf16 %v2761_v26, %v2761_v26  ;;  %v8410_v24 = vpack.c.bf16 %v3082_v36, %v3082_v36  ;;  %3353 = vst [vmem:[#allocation3 + $0x59c] sm:$0xf] %v8411_v48 }
 0x1b8   : > { %v2438_v26 = vld [vmem:[#allocation2 + $0x187] sm:$0xff] }
 0x1b9   : > { %v5789_v52 = vpop.f32.mrf.mxu1  ;;  %v6030_v56 = vpop.f32.mrf.mxu0  ;;  %3031 = vst [vmem:[#allocation3 + $0x5e0] sm:$0xf] %v8359_v60  ;;  %3352 = vst [vmem:[#allocation3 + $0x578] sm:$0xf] %v8410_v24  ;;  %v2762_v36 = vld [vmem:[#allocation2 + $0x188] sm:$0xff]  ;;  %v8306_v62 = vpack.c.bf16 %v2438_v26, %v2438_v26  ;;  %v8307_v60 = vpack.c.bf16 %v2439_v10, %v2439_v10  ;;  %v5554_v26 = vadd.f32 %v10018_v57, %v9971_v23 }
 0x1ba   : > { %v5790_v37 = vadd.f32 %v5789_v52, %v5541_v7  ;;  %v10076_v54 = vadd.f32 %v6030_v56, %v5782_v34  ;;  %v8360_v24 = vpack.c.bf16 %v2762_v36, %v2762_v36  ;;  %v5557_v23 = vadd.f32 %v10018_v57, %v9975_v3 }
 0x1bb   : > { %v5791_v17 = vpop.f32.mrf.mxu1  ;;  %v6032_v13 = vpop.f32.mrf.mxu0  ;;  %2708 = vst [vmem:[#allocation3 + $0x600] sm:$0xf] %v8306_v62  ;;  %2709 = vst [vmem:[#allocation3 + $0x624] sm:$0xf] %v8307_v60  ;;  %v9437_v62 = vld [vmem:[#allocation3 + $0x180] ss:$36 sps:$4 sm:$0xff]  }
 0x1bc   : > { %v3085_v17 = vld [vmem:[#allocation2 + $0x181] sm:$0xff]  ;;  %3032 = vst [vmem:[#allocation3 + $0x604] sm:$0xf] %v8360_v24  ;;  %v9440_v60 = vld [vmem:[#allocation3 + $0x140] ss:$36 sps:$4 sm:$0xff]  }
 0x1bd   : > { %v5794_v42 = vpop.f32.mrf.mxu1  ;;  %v6035_v15 = vpop.f32.mrf.mxu0  ;;  %6267 = vmatmul.mubr.bf16.gmra.mxu1 %v9429_v14  ;;  %8856 = vmatmul.mubr.bf16.gmra.mxu0 %v9432_v19  ;;  %v8413_v32 = vpack.c.bf16 %v3085_v17, %v3085_v17  ;;  %v2441_v24 = vld [vmem:[#allocation2 + $0x19f] sm:$0xff] }
 0x1be   : > { %v5795_v34 = vadd.f32 %v5794_v42, %v5546_v58  ;;  %v10080_v7 = vadd.f32 %v6035_v15, %v5787_v29  ;;  %6274 = vmatprep.mubr.bf16.mxu1 %v9435_v40  ;;  %8859 = vmatprep.mubr.msk.bf16.mxu0 %vm9628_vm0, %v10491_v25  ;;  %v2763_v29 = vld [vmem:[#allocation2 + $0x190] sm:$0xff]  ;;  %v3084_v40 = vld [vmem:[#allocation2 + $0x179] sm:$0xff] }
 0x1bf   : > { %v5796_v52 = vpop.f32.mrf.mxu1  ;;  %v6037_v56 = vpop.f32.mrf.mxu0  ;;  %v9439_v58 = vld [vmem:[#allocation3 + $0x184] ss:$36 sps:$4 sm:$0xff]   ;;  %v8361_v42 = vpack.c.bf16 %v2763_v29, %v2763_v29  ;;  %v8412_v15 = vpack.c.bf16 %v3084_v40, %v3084_v40  ;;  %3355 = vst [vmem:[#allocation3 + $0x5e4] sm:$0xf] %v8413_v32 }
 0x1c0   : > { %v2440_v29 = vld [vmem:[#allocation2 + $0x197] sm:$0xff] }
 0x1c1   : > { %v5797_v14 = vpop.f32.mrf.mxu1  ;;  %v6038_v19 = vpop.f32.mrf.mxu0  ;;  %3033 = vst [vmem:[#allocation3 + $0x628] sm:$0xf] %v8361_v42  ;;  %3354 = vst [vmem:[#allocation3 + $0x5c0] sm:$0xf] %v8412_v15  ;;  %v2764_v40 = vld [vmem:[#allocation2 + $0x198] sm:$0xff]  ;;  %v8308_v17 = vpack.c.bf16 %v2440_v29, %v2440_v29  ;;  %v8309_v42 = vpack.c.bf16 %v2441_v24, %v2441_v24  ;;  %v5562_v29 = vadd.f32 %v10018_v57, %v9979_v47 }
 0x1c2   : > { %v5798_v13 = vadd.f32 %v5797_v14, %v5549_v16  ;;  %v10086_v48 = vadd.f32 %v6038_v19, %v5790_v37  ;;  %v8362_v15 = vpack.c.bf16 %v2764_v40, %v2764_v40  ;;  %v5565_v47 = vadd.f32 %v10018_v57, %v9983_v9 }
 0x1c3   : > { %v5799_v52 = vpop.f32.mrf.mxu1  ;;  %v6040_v56 = vpop.f32.mrf.mxu0  ;;  %2710 = vst [vmem:[#allocation3 + $0x648] sm:$0xf] %v8308_v17  ;;  %2711 = vst [vmem:[#allocation3 + $0x66c] sm:$0xf] %v8309_v42  ;;  %v9441_v17 = vld [vmem:[#allocation3 + $0x1c8] ss:$36 sps:$4 sm:$0xff]  }
 0x1c4   : > { %v3087_v52 = vld [vmem:[#allocation2 + $0x191] sm:$0xff]  ;;  %3034 = vst [vmem:[#allocation3 + $0x64c] sm:$0xf] %v8362_v15 }
 0x1c5   : > { %v5802_v10 = vpop.f32.mrf.mxu1  ;;  %v6043_v36 = vpop.f32.mrf.mxu0  ;;  %6275 = vmatmul.mubr.bf16.gmra.mxu1 %v9433_v2  ;;  %8860 = vmatmul.mubr.bf16.gmra.mxu0 %v9436_v4  ;;  %v8415_v3 = vpack.c.bf16 %v3087_v52, %v3087_v52  ;;  %v9444_v42 = vld [vmem:[#allocation3 + $0x188] ss:$36 sps:$4 sm:$0xff]   ;;  %v2443_v15 = vld [vmem:[#allocation2 + $0x1af] sm:$0xff] }
 0x1c6   : > { %v5803_v37 = vadd.f32 %v5802_v10, %v5554_v26  ;;  %v10090_v16 = vadd.f32 %v6043_v36, %v5795_v34  ;;  %6282 = vmatprep.mubr.bf16.mxu1 %v9439_v58  ;;  %8863 = vmatprep.mubr.msk.bf16.mxu0 %vm9628_vm0, %v10491_v25  ;;  %v2765_v34 = vld [vmem:[#allocation2 + $0x1a0] sm:$0xff]  ;;  %v3086_v58 = vld [vmem:[#allocation2 + $0x189] sm:$0xff] }
 0x1c7   : > { %v5804_v14 = vpop.f32.mrf.mxu1  ;;  %v6045_v19 = vpop.f32.mrf.mxu0  ;;  %v9443_v26 = vld [vmem:[#allocation3 + $0x1cc] ss:$36 sps:$4 sm:$0xff]   ;;  %v8363_v10 = vpack.c.bf16 %v2765_v34, %v2765_v34  ;;  %v8414_v36 = vpack.c.bf16 %v3086_v58, %v3086_v58  ;;  %3357 = vst [vmem:[#allocation3 + $0x62c] sm:$0xf] %v8415_v3  ;;  %v2442_v34 = vld [vmem:[#allocation2 + $0x1a7] sm:$0xff] }
 0x1c8   : > { %v2766_v58 = vld [vmem:[#allocation2 + $0x1a8] sm:$0xff]  ;;  %v8310_v52 = vpack.c.bf16 %v2442_v34, %v2442_v34  ;;  %v5570_v34 = vadd.f32 %v10018_v57, %v9987_v28  ;;  %v5573_v28 = vadd.f32 %v10018_v57, %v9991_v1 }
 0x1c9   : > { %v5805_v2 = vpop.f32.mrf.mxu1  ;;  %v6046_v4 = vpop.f32.mrf.mxu0  ;;  %3035 = vst [vmem:[#allocation3 + $0x670] sm:$0xf] %v8363_v10  ;;  %3356 = vst [vmem:[#allocation3 + $0x608] sm:$0xf] %v8414_v36  ;;  %v8311_v10 = vpack.c.bf16 %v2443_v15, %v2443_v15  ;;  %v8364_v36 = vpack.c.bf16 %v2766_v58, %v2766_v58 }
 0x1ca   : > { %v5806_v56 = vadd.f32 %v5805_v2, %v5557_v23  ;;  %v10096_v32 = vadd.f32 %v6046_v4, %v5798_v13  ;;  %2712 = vst [vmem:[#allocation3 + $0x690] sm:$0xf] %v8310_v52  ;;  %v9445_v52 = vld [vmem:[#allocation3 + $0x210] ss:$36 sps:$4 sm:$0xff]  }
 0x1cb   : > { %v5807_v14 = vpop.f32.mrf.mxu1  ;;  %v6048_v19 = vpop.f32.mrf.mxu0  ;;  %2713 = vst [vmem:[#allocation3 + $0x6b4] sm:$0xf] %v8311_v10  ;;  %3036 = vst [vmem:[#allocation3 + $0x694] sm:$0xf] %v8364_v36  ;;  %v9448_v10 = vld [vmem:[#allocation3 + $0x1d0] ss:$36 sps:$4 sm:$0xff]  }
 0x1cc   : > { %v3089_v14 = vld [vmem:[#allocation2 + $0x1a1] sm:$0xff] }
 0x1cd   : > { %v5810_v24 = vpop.f32.mrf.mxu1  ;;  %v6051_v40 = vpop.f32.mrf.mxu0  ;;  %6283 = vmatmul.mubr.bf16.gmra.mxu1 %v9437_v62  ;;  %8864 = vmatmul.mubr.bf16.gmra.mxu0 %v9440_v60  ;;  %v8417_v9 = vpack.c.bf16 %v3089_v14, %v3089_v14  ;;  %v2445_v36 = vld [vmem:[#allocation2 + $0x1bf] sm:$0xff] }
 0x1ce   : > { %v5811_v13 = vadd.f32 %v5810_v24, %v5562_v29  ;;  %v10100_v23 = vadd.f32 %v6051_v40, %v5803_v37  ;;  %6290 = vmatprep.mubr.bf16.mxu1 %v9443_v26  ;;  %8867 = vmatprep.mubr.msk.bf16.mxu0 %vm9628_vm0, %v10491_v25  ;;  %v2767_v37 = vld [vmem:[#allocation2 + $0x1b0] sm:$0xff]  ;;  %v3088_v26 = vld [vmem:[#allocation2 + $0x199] sm:$0xff]  ;;  %v9447_v29 = vld [vmem:[#allocation3 + $0x214] ss:$36 sps:$4 sm:$0xff]  }
 0x1cf   : > { %v5812_v2 = vpop.f32.mrf.mxu1  ;;  %v6053_v4 = vpop.f32.mrf.mxu0  ;;  %v8365_v24 = vpack.c.bf16 %v2767_v37, %v2767_v37  ;;  %v8416_v40 = vpack.c.bf16 %v3088_v26, %v3088_v26  ;;  %3359 = vst [vmem:[#allocation3 + $0x674] sm:$0xf] %v8417_v9  ;;  %v2444_v37 = vld [vmem:[#allocation2 + $0x1b7] sm:$0xff] }
 0x1d0   : > { %v2768_v26 = vld [vmem:[#allocation2 + $0x1b8] sm:$0xff]  ;;  %v8312_v14 = vpack.c.bf16 %v2444_v37, %v2444_v37  ;;  %v5578_v37 = vadd.f32 %v10018_v57, %v9995_v35  ;;  %v9449_v35 = vld [vmem:[#allocation3 + $0x258] ss:$36 sps:$4 sm:$0xff]  }
 0x1d1   : > { %v5813_v62 = vpop.f32.mrf.mxu1  ;;  %v6054_v60 = vpop.f32.mrf.mxu0  ;;  %3037 = vst [vmem:[#allocation3 + $0x6b8] sm:$0xf] %v8365_v24  ;;  %3358 = vst [vmem:[#allocation3 + $0x650] sm:$0xf] %v8416_v40  ;;  %v8313_v24 = vpack.c.bf16 %v2445_v36, %v2445_v36  ;;  %v8366_v40 = vpack.c.bf16 %v2768_v26, %v2768_v26 }
 0x1d2   : > { %v5814_v19 = vadd.f32 %v5813_v62, %v5565_v47  ;;  %v10106_v3 = vadd.f32 %v6054_v60, %v5806_v56  ;;  %2714 = vst [vmem:[#allocation3 + $0x6d8] sm:$0xf] %v8312_v14 }
 0x1d3   : > { %v5815_v2 = vpop.f32.mrf.mxu1  ;;  %v6056_v4 = vpop.f32.mrf.mxu0  ;;  %2715 = vst [vmem:[#allocation3 + $0x6fc] sm:$0xf] %v8313_v24  ;;  %3038 = vst [vmem:[#allocation3 + $0x6dc] sm:$0xf] %v8366_v40  ;;  %v9452_v24 = vld [vmem:[#allocation3 + $0x218] ss:$36 sps:$4 sm:$0xff]  }
 0x1d4   : > { %v3091_v2 = vld [vmem:[#allocation2 + $0x1b1] sm:$0xff] }
 0x1d5   : > { %v5818_v15 = vpop.f32.mrf.mxu1  ;;  %v6059_v58 = vpop.f32.mrf.mxu0  ;;  %6291 = vmatmul.mubr.bf16.gmra.mxu1 %v9441_v17  ;;  %8868 = vmatmul.mubr.bf16.gmra.mxu0 %v9444_v42  ;;  %v8419_v1 = vpack.c.bf16 %v3091_v2, %v3091_v2  ;;  %v2770_v2 = vld [vmem:[#allocation2 + $0x1c8] sm:$0xff] }
 0x1d6   : > { %v5819_v56 = vadd.f32 %v5818_v15, %v5570_v34  ;;  %v10110_v47 = vadd.f32 %v6059_v58, %v5811_v13  ;;  %6298 = vmatprep.mubr.bf16.mxu1 %v9447_v29  ;;  %8871 = vmatprep.mubr.msk.bf16.mxu0 %vm9628_vm0, %v10491_v25  ;;  %v2769_v13 = vld [vmem:[#allocation2 + $0x1c0] sm:$0xff]  ;;  %v3090_v29 = vld [vmem:[#allocation2 + $0x1a9] sm:$0xff] }
 0x1d7   : > { %v5820_v62 = vpop.f32.mrf.mxu1  ;;  %v6061_v60 = vpop.f32.mrf.mxu0  ;;  %v9451_v34 = vld [vmem:[#allocation3 + $0x25c] ss:$36 sps:$4 sm:$0xff]   ;;  %v8367_v15 = vpack.c.bf16 %v2769_v13, %v2769_v13  ;;  %v8418_v58 = vpack.c.bf16 %v3090_v29, %v3090_v29  ;;  %3361 = vst [vmem:[#allocation3 + $0x6bc] sm:$0xf] %v8419_v1  ;;  %v8368_v1 = vpack.c.bf16 %v2770_v2, %v2770_v2 }
 0x1d8   : > { %10492 = vst [vmem:[#allocation23_spill] sm:$0xff] %v10110_v47  ;;  %v9529_v13 = vld [vmem:[%s9746_s18 + $0xe8] sm:$0xff]   ;;  %v9453_v2 = vld [vmem:[#allocation3 + $0x2a0] ss:$36 sps:$4 sm:$0xff]  }
 0x1d9   : > { %v5821_v17 = vpop.f32.mrf.mxu1  ;;  %v6062_v42 = vpop.f32.mrf.mxu0  ;;  %3039 = vst [vmem:[#allocation3 + $0x700] sm:$0xf] %v8367_v15  ;;  %3360 = vst [vmem:[#allocation3 + $0x698] sm:$0xf] %v8418_v58  ;;  %v8599_v40 = vunpack.c.h.bf16 %v9529_v13 }
 0x1da   : > { %v5822_v4 = vadd.f32 %v5821_v17, %v5573_v28  ;;  %v10116_v9 = vadd.f32 %v6062_v42, %v5814_v19  ;;  %v10125_v17 = vld [vmem:[%s9746_s18 + $0xf0] sm:$0xff]   ;;  %3040 = vst [vmem:[#allocation3 + $0x724] sm:$0xf] %v8368_v1 }
 0x1db   : > { %v5823_v62 = vpop.f32.mrf.mxu1  ;;  %v6064_v60 = vpop.f32.mrf.mxu0  ;;  %v8602_v29 = vunpack.c.l.bf16 %v10125_v17  ;;  %449 = vst [vmem:[#allocation2 + $0x1d8] sm:$0xff] %v8599_v40  ;;  %v3094_v1 = vld [vmem:[#allocation2 + $0x1c9] sm:$0xff] }
 0x1dc   : > { %10493 = vst [vmem:[#allocation24_spill] sm:$0xff] %v10116_v9  ;;  %v2771_v60 = vld [vmem:[#allocation2 + $0x1d0] sm:$0xff] }
 0x1dd   : > { %v5826_v36 = vpop.f32.mrf.mxu1  ;;  %v6067_v28 = vpop.f32.mrf.mxu0  ;;  %6299 = vmatmul.mubr.bf16.gmra.mxu1 %v9445_v52  ;;  %8872 = vmatmul.mubr.bf16.gmra.mxu0 %v9448_v10  ;;  %v5581_v52 = vadd.f32 %v10018_v57, %v9999_v59  ;;  %v2446_v10 = vld [vmem:[#allocation2 + $0x1c7] sm:$0xff]  ;;  %450 = vst [vmem:[#allocation2 + $0x1e0] sm:$0xff] %v8602_v29  ;;  %v8369_v13 = vpack.c.bf16 %v2771_v60, %v2771_v60  ;;  %v9522_v60 = vld [vmem:[%s9746_s18 + $0xf0] ss:$0 sps:$4 sm:$0xff]  }
 0x1de   : > { %v5827_v19 = vadd.f32 %v5826_v36, %v5578_v37  ;;  %v10120_v26 = vadd.f32 %v6067_v28, %v5819_v56  ;;  %6306 = vmatprep.mubr.bf16.mxu1 %v9451_v34  ;;  %8875 = vmatprep.mubr.msk.bf16.mxu0 %vm9628_vm0, %v10491_v25  ;;  %v2447_v56 = vld [vmem:[#allocation2 + $0x1cf] sm:$0xff]  ;;  %v8314_v58 = vpack.c.bf16 %v2446_v10, %v2446_v10  ;;  %v3092_v37 = vld [vmem:[#allocation2 + $0x1b9] sm:$0xff]  ;;  %v3093_v36 = vld [vmem:[#allocation2 + $0x1c1] sm:$0xff] }
 0x1df   : > { %v5828_v42 = vpop.f32.mrf.mxu1  ;;  %v6069_v14 = vpop.f32.mrf.mxu0  ;;  %v8315_v62 = vpack.c.bf16 %v2447_v56, %v2447_v56  ;;  %v8421_v47 = vpack.c.bf16 %v3093_v36, %v3093_v36  ;;  %v5586_v10 = vadd.f32 %v10018_v57, %v10003_v0  ;;  %3041 = vst [vmem:[#allocation3 + $0x748] sm:$0xf] %v8369_v13  ;;  %v10142_v0 = vld [vmem:[%s10468_s4] ss:$0 sm:$0xff]  ;;  %3043 = vst [vmem:[#allocation3 + $0x790] sm:$0xf] %v9522_v60 }
 0x1e0   : > { %10494 = vst [vmem:[#allocation25_spill] sm:$0xff] %v10120_v26  ;;  %v9455_v14 = vld [vmem:[#allocation3 + $0x2a4] ss:$36 sps:$4 sm:$0xff]   ;;  %v8420_v26 = vpack.c.bf16 %v3092_v37, %v3092_v37  ;;  %2716 = vst [vmem:[#allocation3 + $0x720] sm:$0xf] %v8314_v58  ;;  %v5589_v57 = vadd.f32 %v10142_v0, %v10007_v22 }
 0x1e1   : > { %v5829_v34 = vpop.f32.mrf.mxu1  ;;  %v6070_v15 = vpop.f32.mrf.mxu0  ;;  %2717 = vst [vmem:[#allocation3 + $0x744] sm:$0xf] %v8315_v62  ;;  %3363 = vst [vmem:[#allocation3 + $0x704] sm:$0xf] %v8421_v47  ;;  %v9456_v47 = vld [vmem:[#allocation3 + $0x260] ss:$36 sps:$4 sm:$0xff]  }
 0x1e2   : > { %v5830_v28 = vadd.f32 %v5829_v34, %v5581_v52  ;;  %v10131_v42 = vadd.f32 %v6070_v15, %v5822_v4  ;;  %3362 = vst [vmem:[#allocation3 + $0x6e0] sm:$0xf] %v8420_v26  ;;  %v2448_v26 = vld [vmem:[#allocation2 + $0x1d7] sm:$0xff]  ;;  %v9521_v62 = vld [vmem:[%s9746_s18 + $0xec] ss:$0 sps:$4 sm:$0xff]  }
 0x1e3   : > { %v5831_v59 = vpop.f32.mrf.mxu1  ;;  %v6072_v9 = vpop.f32.mrf.mxu0  ;;  %v8316_v15 = vpack.c.bf16 %v2448_v26, %v2448_v26  ;;  %v3095_v13 = vld [vmem:[#allocation2 + $0x1d1] sm:$0xff]  ;;  %3042 = vst [vmem:[#allocation3 + $0x76c] sm:$0xf] %v9521_v62 }
 0x1e4   : > { %v8422_v59 = vpack.c.bf16 %v3094_v1, %v3094_v1  ;;  %v9457_v26 = vld [vmem:[#allocation3 + $0x2e8] ss:$36 sps:$4 sm:$0xff]  }
 0x1e5   : > { %v5834_v56 = vpop.f32.mrf.mxu1  ;;  %v6075_v40 = vpop.f32.mrf.mxu0  ;;  %6307 = vmatmul.mubr.bf16.gmra.mxu1 %v9449_v35  ;;  %8876 = vmatmul.mubr.bf16.gmra.mxu0 %v9452_v24  ;;  %v2449_v35 = vld [vmem:[#allocation2 + $0x1df] sm:$0xff]  ;;  %2718 = vst [vmem:[#allocation3 + $0x768] sm:$0xf] %v8316_v15 }
 0x1e6   : > { %v5835_v4 = vadd.f32 %v5834_v56, %v5586_v10  ;;  %v10135_v29 = vadd.f32 %v6075_v40, %v5827_v19  ;;  %6314 = vmatprep.mubr.bf16.mxu1 %v9455_v14  ;;  %8879 = vmatprep.mubr.msk.bf16.mxu0 %vm9628_vm0, %v10491_v25  ;;  %v8603_v19 = vunpack.c.h.bf16 %v10125_v17  ;;  %v8317_v58 = vpack.c.bf16 %v2449_v35, %v2449_v35  ;;  %v9459_v14 = vld [vmem:[#allocation3 + $0x2ec] ss:$36 sps:$4 sm:$0xff]  }
 0x1e7   : > { %v5836_v9 = vpop.f32.mrf.mxu1  ;;  %v6077_v52 = vpop.f32.mrf.mxu0  ;;  %v8423_v17 = vpack.c.bf16 %v3095_v13, %v3095_v13  ;;  %v5594_v56 = vadd.f32 %v10142_v0, %v10011_v38  ;;  %3364 = vst [vmem:[#allocation3 + $0x728] sm:$0xf] %v8422_v59  ;;  %v5597_v38 = vadd.f32 %v10142_v0, %v10020_v39  ;;  %v5602_v39 = vadd.f32 %v10142_v0, %v10026_v53 }
 0x1e8   : > { %451 = vst [vmem:[#allocation2 + $0x1e8] sm:$0xff] %v8603_v19  ;;  %2719 = vst [vmem:[#allocation3 + $0x78c] sm:$0xf] %v8317_v58 }
 0x1e9   : > { %v5837_v24 = vpop.f32.mrf.mxu1  ;;  %v6078_v34 = vpop.f32.mrf.mxu0  ;;  %3365 = vst [vmem:[#allocation3 + $0x74c] sm:$0xf] %v8423_v17 }
 0x1ea   : > { %v5838_v37 = vadd.f32 %v5837_v24, %v5589_v57  ;;  %v10149_v36 = vadd.f32 %v6078_v34, %v5830_v28 }
 0x1eb   : > { %v5839_v22 = vpop.f32.mrf.mxu1  ;;  %v6080_v10 = vpop.f32.mrf.mxu0 }
 0x1ec   : > { %v10495_v10 = vmov 0  }
 0x1ed   : > { %v5842_v40 = vpop.f32.mrf.mxu1  ;;  %v6083_v9 = vpop.f32.mrf.mxu0  ;;  %6315 = vmatmul.mubr.bf16.gmra.mxu1 %v9453_v2  ;;  %8880 = vmatmul.mubr.bf16.gmra.mxu0 %v9456_v47  ;;  %v9460_v2 = vld [vmem:[#allocation3 + $0x2a8] ss:$36 sps:$4 sm:$0xff]   ;;  %6708 = vst [vmem:[%s10170_s7] sm:$0xf] %v10495_v10  ;;  %6709 = vst [vmem:[%s10170_s7 + $0x4] sm:$0xf] %v10495_v10 }
 0x1ee   : > { %v5843_v28 = vadd.f32 %v5842_v40, %v5594_v56  ;;  %v10153_v52 = vadd.f32 %v6083_v9, %v5835_v4  ;;  %6322 = vmatprep.mubr.bf16.mxu1 %v9459_v14  ;;  %8883 = vmatprep.mubr.msk.bf16.mxu0 %vm9628_vm0, %v10491_v25  ;;  %v3096_v47 = vld [vmem:[#allocation2 + $0x1d9] sm:$0xff]  ;;  %v9463_v4 = vld [vmem:[#allocation3 + $0x334] ss:$36 sps:$4 sm:$0xff]   ;;  %6710 = vst [vmem:[%s10170_s7 + $0x8] sm:$0xf] %v10495_v10 }
 0x1ef   : > { %v5844_v57 = vpop.f32.mrf.mxu1  ;;  %v6085_v19 = vpop.f32.mrf.mxu0  ;;  %v3097_v34 = vld [vmem:[#allocation2 + $0x1e1] sm:$0xff]  ;;  %v8424_v62 = vpack.c.bf16 %v3096_v47, %v3096_v47  ;;  %6711 = vst [vmem:[%s10170_s7 + $0xc] sm:$0xf] %v10495_v10  ;;  %6982 = vst [vmem:[%s10170_s7 + $0xe8] sm:$0xf] %v10495_v10  ;;  %v5605_v56 = vadd.f32 %v10142_v0, %v10030_v43 }
 0x1f0   : > { %v8425_v60 = vpack.c.bf16 %v3097_v34, %v3097_v34  ;;  %6983 = vst [vmem:[%s10170_s7 + $0xec] sm:$0xf] %v10495_v10  ;;  %6984 = vst [vmem:[%s10170_s7 + $0xf0] sm:$0xf] %v10495_v10  ;;  %v9464_v57 = vld [vmem:[#allocation3 + $0x2f0] ss:$36 sps:$4 sm:$0xff]  }
 0x1f1   : > { %v5845_v35 = vpop.f32.mrf.mxu1  ;;  %v6086_v24 = vpop.f32.mrf.mxu0  ;;  %3366 = vst [vmem:[#allocation3 + $0x770] sm:$0xf] %v8424_v62  ;;  %6985 = vst [vmem:[%s10170_s7 + $0xf4] sm:$0xf] %v10495_v10  ;;  %v9471_v10 = vld [vmem:[#allocation3 + $0x3c4] ss:$36 sps:$4 sm:$0xff]  }
 0x1f2   : > { %v5846_v15 = vadd.f32 %v5845_v35, %v5597_v38  ;;  %v10159_v58 = vadd.f32 %v6086_v24, %v5838_v37  ;;  %3367 = vst [vmem:[#allocation3 + $0x794] sm:$0xf] %v8425_v60  ;;  %v5613_v60 = vadd.f32 %v10142_v0, %v9915_v27 }
 0x1f3   : > { %v5847_v1 = vpop.f32.mrf.mxu1  ;;  %v6088_v14 = vpop.f32.mrf.mxu0 }
 0x1f5   : > { %v5850_v13 = vpop.f32.mrf.mxu1  ;;  %v6091_v59 = vpop.f32.mrf.mxu0  ;;  %6323 = vmatmul.mubr.bf16.gmra.mxu1 %v9457_v26  ;;  %8884 = vmatmul.mubr.bf16.gmra.mxu0 %v9460_v2  ;;  %v9467_v26 = vld [vmem:[#allocation3 + $0x37c] ss:$36 sps:$4 sm:$0xff]   ;;  %v5610_v2 = vadd.f32 %v10142_v0, %v9911_v18 }
 0x1f6   : > { %v5851_v22 = vadd.f32 %v5850_v13, %v5602_v39  ;;  %v10166_v37 = vadd.f32 %v6091_v59, %v5843_v28  ;;  %6330 = vmatprep.mubr.bf16.mxu1 %v9463_v4  ;;  %8887 = vmatprep.mubr.msk.bf16.mxu0 %vm9628_vm0, %v10491_v25  ;;  %v9461_v28 = vld [vmem:[#allocation3 + $0x330] ss:$36 sps:$4 sm:$0xff]   ;;  %v9465_v39 = vld [vmem:[#allocation3 + $0x378] ss:$36 sps:$4 sm:$0xff]  }
 0x1f7   : > { %v5852_v53 = vpop.f32.mrf.mxu1  ;;  %v6093_v17 = vpop.f32.mrf.mxu0  ;;  %v9468_v18 = vld [vmem:[#allocation3 + $0x338] ss:$36 sps:$4 sm:$0xff]  }
 0x1f8   : > { %v5618_v17 = vadd.f32 %v10142_v0, %v9920_v41  ;;  %v9472_v41 = vld [vmem:[#allocation3 + $0x380] ss:$36 sps:$4 sm:$0xff]  }
 0x1f9   : > { %v5853_v40 = vpop.f32.mrf.mxu1  ;;  %v6094_v9 = vpop.f32.mrf.mxu0 }
 0x1fa   : > { %v5854_v19 = vadd.f32 %v5853_v40, %v5605_v56  ;;  %v10190_v38 = vadd.f32 %v6094_v9, %v5846_v15 }
 0x1fb   : > { %v5855_v35 = vpop.f32.mrf.mxu1  ;;  %v6096_v24 = vpop.f32.mrf.mxu0 }
 0x1fc   : > { %v9469_v24 = vld [vmem:[#allocation3 + $0x3c0] ss:$36 sps:$4 sm:$0xff]  }
 0x1fd   : > { %v5858_v47 = vpop.f32.mrf.mxu1  ;;  %v6099_v34 = vpop.f32.mrf.mxu0  ;;  %6331 = vmatmul.mubr.bf16.gmra.mxu1 %v9461_v28  ;;  %8888 = vmatmul.mubr.bf16.gmra.mxu0 %v9464_v57 }
 0x1fe   : > { %v5859_v4 = vadd.f32 %v5858_v47, %v5610_v2  ;;  %v10194_v62 = vadd.f32 %v6099_v34, %v5851_v22  ;;  %6338 = vmatprep.mubr.bf16.mxu1 %v9467_v26  ;;  %8891 = vmatprep.mubr.msk.bf16.mxu0 %vm9628_vm0, %v10491_v25  ;;  %v9475_v34 = vld [vmem:[#allocation3 + $0x40c] ss:$36 sps:$4 sm:$0xff]  }
 0x1ff   : > { %v5860_v43 = vpop.f32.mrf.mxu1  ;;  %v6101_v15 = vpop.f32.mrf.mxu0 }
 0x200   : > { %v5626_v15 = vadd.f32 %v10142_v0, %v9933_v20  ;;  %v9476_v20 = vld [vmem:[#allocation3 + $0x3c8] ss:$36 sps:$4 sm:$0xff]  }
 0x201   : > { %v5861_v1 = vpop.f32.mrf.mxu1  ;;  %v6102_v14 = vpop.f32.mrf.mxu0 }
 0x202   : > { %v5862_v13 = vadd.f32 %v5861_v1, %v5613_v60  ;;  %v10200_v59 = vadd.f32 %v6102_v14, %v5854_v19  ;;  %v5621_v19 = vadd.f32 %v10142_v0, %v9926_v61 }
 0x203   : > { %v5863_v53 = vpop.f32.mrf.mxu1  ;;  %v6104_v22 = vpop.f32.mrf.mxu0 }
 0x204   : > { %v9473_v22 = vld [vmem:[#allocation3 + $0x408] ss:$36 sps:$4 sm:$0xff]  }
 0x205   : > { %v5866_v56 = vpop.f32.mrf.mxu1  ;;  %v6107_v40 = vpop.f32.mrf.mxu0  ;;  %6339 = vmatmul.mubr.bf16.gmra.mxu1 %v9465_v39  ;;  %8892 = vmatmul.mubr.bf16.gmra.mxu0 %v9468_v18 }
 0x206   : > { %v5867_v9 = vadd.f32 %v5866_v56, %v5618_v17  ;;  %v10204_v28 = vadd.f32 %v6107_v40, %v5859_v4  ;;  %6346 = vmatprep.mubr.bf16.mxu1 %v9471_v10  ;;  %8895 = vmatprep.mubr.msk.bf16.mxu0 %vm9628_vm0, %v10491_v25  ;;  %v9479_v40 = vld [vmem:[#allocation3 + $0x454] ss:$36 sps:$4 sm:$0xff]  }
 0x207   : > { %v5868_v27 = vpop.f32.mrf.mxu1  ;;  %v6109_v57 = vpop.f32.mrf.mxu0 }
 0x208   : > { %v5634_v57 = vadd.f32 %v10142_v0, %v9941_v6  ;;  %v9480_v6 = vld [vmem:[#allocation3 + $0x410] ss:$36 sps:$4 sm:$0xff]  }
 0x209   : > { %v5869_v26 = vpop.f32.mrf.mxu1  ;;  %v6110_v35 = vpop.f32.mrf.mxu0 }
 0x20a   : > { %v5870_v2 = vadd.f32 %v5869_v26, %v5621_v19  ;;  %v10210_v47 = vadd.f32 %v6110_v35, %v5862_v13  ;;  %v5629_v13 = vadd.f32 %v10142_v0, %v9937_v45 }
 0x20b   : > { %v5871_v43 = vpop.f32.mrf.mxu1  ;;  %v6112_v4 = vpop.f32.mrf.mxu0 }
 0x20c   : > { %v9477_v4 = vld [vmem:[#allocation3 + $0x450] ss:$36 sps:$4 sm:$0xff]  }
 0x20d   : > { %v5874_v60 = vpop.f32.mrf.mxu1  ;;  %v6115_v1 = vpop.f32.mrf.mxu0  ;;  %6347 = vmatmul.mubr.bf16.gmra.mxu1 %v9469_v24  ;;  %8896 = vmatmul.mubr.bf16.gmra.mxu0 %v9472_v41 }
 0x20e   : > { %v5875_v14 = vadd.f32 %v5874_v60, %v5626_v15  ;;  %v10214_v39 = vadd.f32 %v6115_v1, %v5867_v9  ;;  %6354 = vmatprep.mubr.bf16.mxu1 %v9475_v34  ;;  %8899 = vmatprep.mubr.msk.bf16.mxu0 %vm9628_vm0, %v10491_v25  ;;  %v9483_v1 = vld [vmem:[#allocation3 + $0x49c] ss:$36 sps:$4 sm:$0xff]  }
 0x20f   : > { %v5876_v61 = vpop.f32.mrf.mxu1  ;;  %v6117_v18 = vpop.f32.mrf.mxu0 }
 0x210   : > { %v5642_v18 = vadd.f32 %v10142_v0, %v9949_v50  ;;  %v9484_v50 = vld [vmem:[#allocation3 + $0x458] ss:$36 sps:$4 sm:$0xff]  }
 0x211   : > { %v5877_v10 = vpop.f32.mrf.mxu1  ;;  %v6118_v53 = vpop.f32.mrf.mxu0 }
 0x212   : > { %v5878_v17 = vadd.f32 %v5877_v10, %v5629_v13  ;;  %v10220_v56 = vadd.f32 %v6118_v53, %v5870_v2  ;;  %v5637_v2 = vadd.f32 %v10142_v0, %v9945_v31 }
 0x213   : > { %v5879_v27 = vpop.f32.mrf.mxu1  ;;  %v6120_v9 = vpop.f32.mrf.mxu0 }
 0x214   : > { %v9481_v9 = vld [vmem:[#allocation3 + $0x498] ss:$36 sps:$4 sm:$0xff]  }
 0x215   : > { %v5882_v19 = vpop.f32.mrf.mxu1  ;;  %v6123_v26 = vpop.f32.mrf.mxu0  ;;  %6355 = vmatmul.mubr.bf16.gmra.mxu1 %v9473_v22  ;;  %8900 = vmatmul.mubr.bf16.gmra.mxu0 %v9476_v20 }
 0x216   : > { %v5883_v35 = vadd.f32 %v5882_v19, %v5634_v57  ;;  %v10224_v24 = vadd.f32 %v6123_v26, %v5875_v14  ;;  %6362 = vmatprep.mubr.bf16.mxu1 %v9479_v40  ;;  %8903 = vmatprep.mubr.msk.bf16.mxu0 %vm9628_vm0, %v10491_v25  ;;  %v9487_v26 = vld [vmem:[#allocation3 + $0x4e4] ss:$36 sps:$4 sm:$0xff]  }
 0x217   : > { %v5884_v45 = vpop.f32.mrf.mxu1  ;;  %v6125_v41 = vpop.f32.mrf.mxu0 }
 0x218   : > { %v5650_v41 = vadd.f32 %v10142_v0, %v9957_v8  ;;  %v9488_v8 = vld [vmem:[#allocation3 + $0x4a0] ss:$36 sps:$4 sm:$0xff]  }
 0x219   : > { %v5885_v34 = vpop.f32.mrf.mxu1  ;;  %v6126_v43 = vpop.f32.mrf.mxu0 }
 0x21a   : > { %v5886_v15 = vadd.f32 %v5885_v34, %v5637_v2  ;;  %v10230_v60 = vadd.f32 %v6126_v43, %v5878_v17  ;;  %v5645_v17 = vadd.f32 %v10142_v0, %v9953_v55 }
 0x21b   : > { %v5887_v61 = vpop.f32.mrf.mxu1  ;;  %v6128_v14 = vpop.f32.mrf.mxu0 }
 0x21c   : > { %v9485_v14 = vld [vmem:[#allocation3 + $0x4e0] ss:$36 sps:$4 sm:$0xff]  }
 0x21d   : > { %v5890_v13 = vpop.f32.mrf.mxu1  ;;  %v6131_v10 = vpop.f32.mrf.mxu0  ;;  %6363 = vmatmul.mubr.bf16.gmra.mxu1 %v9477_v4  ;;  %8904 = vmatmul.mubr.bf16.gmra.mxu0 %v9480_v6 }
 0x21e   : > { %v5891_v53 = vadd.f32 %v5890_v13, %v5642_v18  ;;  %v10234_v22 = vadd.f32 %v6131_v10, %v5883_v35  ;;  %6370 = vmatprep.mubr.bf16.mxu1 %v9483_v1  ;;  %8907 = vmatprep.mubr.msk.bf16.mxu0 %vm9628_vm0, %v10491_v25  ;;  %v9491_v10 = vld [vmem:[#allocation3 + $0x52c] ss:$36 sps:$4 sm:$0xff]  }
 0x21f   : > { %v5892_v31 = vpop.f32.mrf.mxu1  ;;  %v6133_v20 = vpop.f32.mrf.mxu0 }
 0x220   : > { %v5658_v20 = vadd.f32 %v10142_v0, %v9965_v21  ;;  %v9492_v21 = vld [vmem:[#allocation3 + $0x4e8] ss:$36 sps:$4 sm:$0xff]  }
 0x221   : > { %v5893_v40 = vpop.f32.mrf.mxu1  ;;  %v6134_v27 = vpop.f32.mrf.mxu0 }
 0x222   : > { %v5894_v57 = vadd.f32 %v5893_v40, %v5645_v17  ;;  %v10240_v19 = vadd.f32 %v6134_v27, %v5886_v15  ;;  %v5653_v15 = vadd.f32 %v10142_v0, %v9961_v51 }
 0x223   : > { %v5895_v45 = vpop.f32.mrf.mxu1  ;;  %v6136_v35 = vpop.f32.mrf.mxu0 }
 0x224   : > { %v9489_v35 = vld [vmem:[#allocation3 + $0x528] ss:$36 sps:$4 sm:$0xff]  }
 0x225   : > { %v5898_v2 = vpop.f32.mrf.mxu1  ;;  %v6139_v34 = vpop.f32.mrf.mxu0  ;;  %6371 = vmatmul.mubr.bf16.gmra.mxu1 %v9481_v9  ;;  %8908 = vmatmul.mubr.bf16.gmra.mxu0 %v9484_v50 }
 0x226   : > { %v5899_v43 = vadd.f32 %v5898_v2, %v5650_v41  ;;  %v10244_v4 = vadd.f32 %v6139_v34, %v5891_v53  ;;  %6378 = vmatprep.mubr.bf16.mxu1 %v9487_v26  ;;  %8911 = vmatprep.mubr.msk.bf16.mxu0 %vm9628_vm0, %v10491_v25  ;;  %v9495_v34 = vld [vmem:[#allocation3 + $0x574] ss:$36 sps:$4 sm:$0xff]  }
 0x227   : > { %v5900_v55 = vpop.f32.mrf.mxu1  ;;  %v6141_v6 = vpop.f32.mrf.mxu0 }
 0x228   : > { %v10496_v6 = vld [vmem:[#allocation10_spill] sm:$0xff] }
 0x229   : > { %v5901_v1 = vpop.f32.mrf.mxu1  ;;  %v6142_v61 = vpop.f32.mrf.mxu0 }
 0x22a   : > { %v5902_v18 = vadd.f32 %v5901_v1, %v5653_v15  ;;  %v10250_v13 = vadd.f32 %v6142_v61, %v5894_v57  ;;  %v5661_v57 = vadd.f32 %v10142_v0, %v9969_v33  ;;  %v5666_v15 = vadd.f32 %v10142_v0, %v10496_v6 }
 0x22b   : > { %v5903_v31 = vpop.f32.mrf.mxu1  ;;  %v6144_v53 = vpop.f32.mrf.mxu0 }
 0x22d   : > { %v5906_v17 = vpop.f32.mrf.mxu1  ;;  %v6147_v40 = vpop.f32.mrf.mxu0  ;;  %6379 = vmatmul.mubr.bf16.gmra.mxu1 %v9485_v14  ;;  %8912 = vmatmul.mubr.bf16.gmra.mxu0 %v9488_v8 }
 0x22e   : > { %v5907_v27 = vadd.f32 %v5906_v17, %v5658_v20  ;;  %v10254_v9 = vadd.f32 %v6147_v40, %v5899_v43  ;;  %6386 = vmatprep.mubr.bf16.mxu1 %v9491_v10  ;;  %8915 = vmatprep.mubr.msk.bf16.mxu0 %vm9628_vm0, %v10491_v25  ;;  %v10497_v10 = vld [vmem:[#allocation11_spill] sm:$0xff] }
 0x22f   : > { %v5908_v51 = vpop.f32.mrf.mxu1  ;;  %v6149_v50 = vpop.f32.mrf.mxu0  ;;  %v5669_v31 = vadd.f32 %v10142_v0, %v10497_v10  ;;  %v9493_v17 = vld [vmem:[#allocation3 + $0x570] ss:$36 sps:$4 sm:$0xff]   ;;  %v9500_v10 = vld [vmem:[#allocation3 + $0x578] ss:$36 sps:$4 sm:$0xff]  }
 0x230   : > { %v9496_v40 = vld [vmem:[#allocation3 + $0x530] ss:$36 sps:$4 sm:$0xff]  }
 0x231   : > { %v5909_v26 = vpop.f32.mrf.mxu1  ;;  %v6150_v45 = vpop.f32.mrf.mxu0 }
 0x232   : > { %v5910_v41 = vadd.f32 %v5909_v26, %v5661_v57  ;;  %v10260_v2 = vadd.f32 %v6150_v45, %v5902_v18  ;;  %v9499_v57 = vld [vmem:[#allocation3 + $0x5bc] ss:$36 sps:$4 sm:$0xff]  }
 0x233   : > { %v5911_v55 = vpop.f32.mrf.mxu1  ;;  %v6152_v43 = vpop.f32.mrf.mxu0  ;;  %v10498_v45 = vld [vmem:[#allocation12_spill] sm:$0xff] }
 0x235   : > { %v5914_v1 = vpop.f32.mrf.mxu1  ;;  %v6155_v61 = vpop.f32.mrf.mxu0  ;;  %6387 = vmatmul.mubr.bf16.gmra.mxu1 %v9489_v35  ;;  %8916 = vmatmul.mubr.bf16.gmra.mxu0 %v9492_v21  ;;  %v5674_v35 = vadd.f32 %v10142_v0, %v10498_v45 }
 0x236   : > { %v5915_v14 = vadd.f32 %v5914_v1, %v5666_v15  ;;  %v10264_v8 = vadd.f32 %v6155_v61, %v5907_v27  ;;  %6394 = vmatprep.mubr.bf16.mxu1 %v9495_v34  ;;  %8919 = vmatprep.mubr.msk.bf16.mxu0 %vm9628_vm0, %v10491_v25  ;;  %v10499_v15 = vld [vmem:[#allocation13_spill] sm:$0xff] }
 0x237   : > { %v5916_v33 = vpop.f32.mrf.mxu1  ;;  %v6157_v18 = vpop.f32.mrf.mxu0  ;;  %v5677_v1 = vadd.f32 %v10142_v0, %v10499_v15 }
 0x238   : > { %v9497_v18 = vld [vmem:[#allocation3 + $0x5b8] ss:$36 sps:$4 sm:$0xff]  }
 0x239   : > { %v5917_v53 = vpop.f32.mrf.mxu1  ;;  %v6158_v20 = vpop.f32.mrf.mxu0 }
 0x23a   : > { %v5918_v51 = vadd.f32 %v5917_v53, %v5669_v31  ;;  %v10270_v50 = vadd.f32 %v6158_v20, %v5910_v41  ;;  %v9503_v20 = vld [vmem:[#allocation3 + $0x604] ss:$36 sps:$4 sm:$0xff]  }
 0x23b   : > { %v5919_v26 = vpop.f32.mrf.mxu1  ;;  %v6160_v27 = vpop.f32.mrf.mxu0 }
 0x23d   : > { %v5922_v21 = vpop.f32.mrf.mxu1  ;;  %v6163_v34 = vpop.f32.mrf.mxu0  ;;  %6395 = vmatmul.mubr.bf16.gmra.mxu1 %v9493_v17  ;;  %8920 = vmatmul.mubr.bf16.gmra.mxu0 %v9496_v40  ;;  %v10500_v40 = vld [vmem:[#allocation14_spill] sm:$0xff] }
 0x23e   : > { %v5923_v55 = vadd.f32 %v5922_v21, %v5674_v35  ;;  %v10274_v43 = vadd.f32 %v6163_v34, %v5915_v14  ;;  %6402 = vmatprep.mubr.bf16.mxu1 %v9499_v57  ;;  %8923 = vmatprep.mubr.msk.bf16.mxu0 %vm9628_vm0, %v10491_v25  ;;  %v5682_v57 = vadd.f32 %v10142_v0, %v10500_v40  ;;  %v10501_v34 = vld [vmem:[#allocation15_spill] sm:$0xff] }
 0x23f   : > { %v5924_v6 = vpop.f32.mrf.mxu1  ;;  %v6165_v41 = vpop.f32.mrf.mxu0 }
 0x240   : > { %v5685_v6 = vadd.f32 %v10142_v0, %v10501_v34 }
 0x241   : > { %v5925_v61 = vpop.f32.mrf.mxu1  ;;  %v6166_v33 = vpop.f32.mrf.mxu0 }
 0x242   : > { %v5926_v31 = vadd.f32 %v5925_v61, %v5677_v1  ;;  %v10280_v53 = vadd.f32 %v6166_v33, %v5918_v51  ;;  %v9501_v1 = vld [vmem:[#allocation3 + $0x600] ss:$36 sps:$4 sm:$0xff]  }
 0x243   : > { %v5927_v17 = vpop.f32.mrf.mxu1  ;;  %v6168_v14 = vpop.f32.mrf.mxu0  ;;  %v9504_v61 = vld [vmem:[#allocation3 + $0x5c0] ss:$36 sps:$4 sm:$0xff]  }
 0x244   : > { %v10502_v14 = vld [vmem:[#allocation16_spill] sm:$0xff] }
 0x245   : > { %v5930_v26 = vpop.f32.mrf.mxu1  ;;  %v6171_v27 = vpop.f32.mrf.mxu0  ;;  %6403 = vmatmul.mubr.bf16.gmra.mxu1 %v9497_v18  ;;  %8924 = vmatmul.mubr.bf16.gmra.mxu0 %v9500_v10  ;;  %v9507_v18 = vld [vmem:[#allocation3 + $0x64c] ss:$36 sps:$4 sm:$0xff]  }
 0x246   : > { %v5931_v45 = vadd.f32 %v5930_v26, %v5682_v57  ;;  %v10284_v35 = vadd.f32 %v6171_v27, %v5923_v55  ;;  %6410 = vmatprep.mubr.bf16.mxu1 %v9503_v20  ;;  %8927 = vmatprep.mubr.msk.bf16.mxu0 %vm9628_vm0, %v10491_v25  ;;  %v5690_v20 = vadd.f32 %v10142_v0, %v10502_v14 }
 0x247   : > { %v5932_v21 = vpop.f32.mrf.mxu1  ;;  %v6173_v51 = vpop.f32.mrf.mxu0 }
 0x248   : > { %v10504_v51 = vld [vmem:[#allocation17_spill] sm:$0xff] }
 0x249   : > { %v5933_v41 = vpop.f32.mrf.mxu1  ;;  %v6174_v15 = vpop.f32.mrf.mxu0  ;;  %v5693_v34 = vadd.f32 %v10142_v0, %v10504_v51 }
 0x24a   : > { %v5934_v33 = vadd.f32 %v5933_v41, %v5685_v6  ;;  %v10290_v17 = vadd.f32 %v6174_v15, %v5926_v31  ;;  %v9505_v15 = vld [vmem:[#allocation3 + $0x648] ss:$36 sps:$4 sm:$0xff]  }
 0x24b   : > { %v5935_v10 = vpop.f32.mrf.mxu1  ;;  %v6176_v55 = vpop.f32.mrf.mxu0 }
 0x24c   : > { %v9508_v10 = vld [vmem:[#allocation3 + $0x608] ss:$36 sps:$4 sm:$0xff]  }
 0x24d   : > { %v5938_v40 = vpop.f32.mrf.mxu1  ;;  %v6179_v57 = vpop.f32.mrf.mxu0  ;;  %6411 = vmatmul.mubr.bf16.gmra.mxu1 %v9501_v1  ;;  %8928 = vmatmul.mubr.bf16.gmra.mxu0 %v9504_v61  ;;  %v9511_v1 = vld [vmem:[#allocation3 + $0x694] ss:$36 sps:$4 sm:$0xff]  }
 0x24e   : > { %v5939_v26 = vadd.f32 %v5938_v40, %v5690_v20  ;;  %v10294_v27 = vadd.f32 %v6179_v57, %v5931_v45  ;;  %6418 = vmatprep.mubr.bf16.mxu1 %v9507_v18  ;;  %8931 = vmatprep.mubr.msk.bf16.mxu0 %vm9628_vm0, %v10491_v25  ;;  %v10506_v20 = vld [vmem:[#allocation18_spill] sm:$0xff] }
 0x24f   : > { %v5940_v21 = vpop.f32.mrf.mxu1  ;;  %v6181_v31 = vpop.f32.mrf.mxu0  ;;  %v5698_v18 = vadd.f32 %v10142_v0, %v10506_v20  ;;  %v9512_v20 = vld [vmem:[#allocation3 + $0x650] ss:$36 sps:$4 sm:$0xff]  }
 0x250   : > { %10503 = vst [vmem:[#allocation10_spill] sm:$0xff] %v10294_v27 }
 0x251   : > { %v5941_v6 = vpop.f32.mrf.mxu1  ;;  %v6182_v41 = vpop.f32.mrf.mxu0 }
 0x252   : > { %v5942_v55 = vadd.f32 %v5941_v6, %v5693_v34  ;;  %v10300_v14 = vadd.f32 %v6182_v41, %v5934_v33  ;;  %v10508_v34 = vld [vmem:[#allocation19_spill] sm:$0xff] }
 0x253   : > { %v5943_v61 = vpop.f32.mrf.mxu1  ;;  %v6184_v45 = vpop.f32.mrf.mxu0  ;;  %v5701_v6 = vadd.f32 %v10142_v0, %v10508_v34 }
 0x254   : > { %10505 = vst [vmem:[#allocation11_spill] sm:$0xff] %v10300_v14  ;;  %v9509_v45 = vld [vmem:[#allocation3 + $0x690] ss:$36 sps:$4 sm:$0xff]  }
 0x255   : > { %v5946_v40 = vpop.f32.mrf.mxu1  ;;  %v6187_v57 = vpop.f32.mrf.mxu0  ;;  %6419 = vmatmul.mubr.bf16.gmra.mxu1 %v9505_v15  ;;  %8932 = vmatmul.mubr.bf16.gmra.mxu0 %v9508_v10  ;;  %v9515_v15 = vld [vmem:[#allocation3 + $0x6dc] ss:$36 sps:$4 sm:$0xff]  }
 0x256   : > { %v5947_v21 = vadd.f32 %v5946_v40, %v5698_v18  ;;  %v10304_v31 = vadd.f32 %v6187_v57, %v5939_v26  ;;  %6426 = vmatprep.mubr.bf16.mxu1 %v9511_v1  ;;  %8935 = vmatprep.mubr.msk.bf16.mxu0 %vm9628_vm0, %v10491_v25  ;;  %v10510_v18 = vld [vmem:[#allocation20_spill] sm:$0xff] }
 0x257   : > { %v5948_v51 = vpop.f32.mrf.mxu1  ;;  %v6189_v33 = vpop.f32.mrf.mxu0  ;;  %v5706_v1 = vadd.f32 %v10142_v0, %v10510_v18  ;;  %v9516_v18 = vld [vmem:[#allocation3 + $0x698] ss:$36 sps:$4 sm:$0xff]  }
 0x258   : > { %10507 = vst [vmem:[#allocation12_spill] sm:$0xff] %v10304_v31 }
 0x259   : > { %v5949_v41 = vpop.f32.mrf.mxu1  ;;  %v6190_v61 = vpop.f32.mrf.mxu0 }
 0x25a   : > { %v5950_v14 = vadd.f32 %v5949_v41, %v5701_v6  ;;  %v10310_v27 = vadd.f32 %v6190_v61, %v5942_v55  ;;  %v10511_v6 = vld [vmem:[#allocation21_spill] sm:$0xff] }
 0x25b   : > { %v5951_v10 = vpop.f32.mrf.mxu1  ;;  %v6192_v26 = vpop.f32.mrf.mxu0  ;;  %v5709_v41 = vadd.f32 %v10142_v0, %v10511_v6  ;;  %v9517_v6 = vld [vmem:[#allocation3 + $0x720] ss:$36 sps:$4 sm:$0xff]  }
 0x25c   : > { %10509 = vst [vmem:[#allocation13_spill] sm:$0xff] %v10310_v27  ;;  %v9513_v26 = vld [vmem:[#allocation3 + $0x6d8] ss:$36 sps:$4 sm:$0xff]  }
 0x25d   : > { %v5954_v40 = vpop.f32.mrf.mxu1  ;;  %v6195_v57 = vpop.f32.mrf.mxu0  ;;  %6427 = vmatmul.mubr.bf16.gmra.mxu1 %v9509_v45  ;;  %8936 = vmatmul.mubr.bf16.gmra.mxu0 %v9512_v20  ;;  %v9519_v45 = vld [vmem:[#allocation3 + $0x724] ss:$36 sps:$4 sm:$0xff]  }
 0x25e   : > { %v5955_v51 = vadd.f32 %v5954_v40, %v5706_v1  ;;  %v10314_v33 = vadd.f32 %v6195_v57, %v5947_v21  ;;  %6434 = vmatprep.mubr.bf16.mxu1 %v9515_v15  ;;  %8939 = vmatprep.mubr.msk.bf16.mxu0 %vm9628_vm0, %v10491_v25 }
 0x25f   : > { %v5956_v34 = vpop.f32.mrf.mxu1  ;;  %v6197_v55 = vpop.f32.mrf.mxu0 }
 0x261   : > { %v5957_v61 = vpop.f32.mrf.mxu1  ;;  %v6198_v10 = vpop.f32.mrf.mxu0 }
 0x262   : > { %v5958_v27 = vadd.f32 %v5957_v61, %v5709_v41  ;;  %v10320_v31 = vadd.f32 %v6198_v10, %v5950_v14  ;;  %v9520_v14 = vld [vmem:[#allocation3 + $0x6e0] ss:$36 sps:$4 sm:$0xff]   ;;  %v9525_v61 = vld [vmem:[#allocation3 + $0x76c] ss:$36 sps:$4 sm:$0xff]  }
 0x263   : > { %v5959_v20 = vpop.f32.mrf.mxu1  ;;  %v6200_v21 = vpop.f32.mrf.mxu0 }
 0x264   : > { %10512 = vst [vmem:[#allocation14_spill] sm:$0xff] %v10320_v31 }
 0x265   : > { %v6203_v1 = vpop.f32.mrf.mxu0  ;;  %v6244_v15 = vpop.f32.mrf.mxu1  ;;  %6435 = vmatmul.mubr.bf16.gmra.mxu1 %v9513_v26  ;;  %8940 = vmatmul.mubr.bf16.gmra.mxu0 %v9516_v18 }
 0x266   : > { %v10322_v40 = vadd.f32 %v6203_v1, %v5955_v51  ;;  %6442 = vmatprep.mubr.bf16.mxu1 %v9519_v45  ;;  %8943 = vmatprep.mubr.msk.bf16.mxu0 %vm9628_vm0, %v10491_v25  ;;  %v10515_v45 = vld [vmem:[#allocation22_spill] sm:$0xff] }
 0x267   : > { %v6205_v0 = vpop.f32.mrf.mxu0  ;;  %v6246_v57 = vpop.f32.mrf.mxu1  ;;  %v6245_v1 = vadd.f32 %v6244_v15, %v10515_v45  ;;  %v9527_v45 = vld [vmem:[#allocation3 + $0x770] ss:$36 sps:$4 sm:$0xff]  }
 0x268   : > { %10513 = vst [vmem:[#allocation15_spill] sm:$0xff] %v10322_v40 }
 0x269   : > { %v6206_v34 = vpop.f32.mrf.mxu0  ;;  %v6247_v55 = vpop.f32.mrf.mxu1 }
 0x26a   : > { %v10326_v41 = vadd.f32 %v6206_v34, %v5958_v27  ;;  %v6248_v0 = vadd.f32 %v6247_v55, %v10038_v12  ;;  %v9523_v34 = vld [vmem:[#allocation3 + $0x768] ss:$36 sps:$4 sm:$0xff]  }
 0x26b   : > { %v6208_v10 = vpop.f32.mrf.mxu0  ;;  %v6249_v20 = vpop.f32.mrf.mxu1 }
 0x26c   : > { %10514 = vst [vmem:[#allocation16_spill] sm:$0xff] %v10326_v41  ;;  %v9526_v10 = vld [vmem:[#allocation3 + $0x728] ss:$36 sps:$4 sm:$0xff]  }
 0x26d   : > { %v6252_v21 = vpop.f32.mrf.mxu1  ;;  %6443 = vmatmul.mubr.bf16.gmra.mxu1 %v9517_v6  ;;  %v6493_v26 = vpop.f32.mrf.mxu0  ;;  %8944 = vmatmul.mubr.bf16.gmra.mxu0 %v9520_v14 }
 0x26e   : > { %6450 = vmatprep.mubr.bf16.mxu1 %v9525_v61  ;;  %8947 = vmatprep.mubr.msk.bf16.mxu0 %vm9628_vm0, %v10491_v25  ;;  %v6494_v20 = vadd.f32 %v6493_v26, %v6245_v1  ;;  %v6253_v55 = vadd.f32 %v6252_v21, %v10042_v11 }
 0x26f   : > { %v6254_v51 = vpop.f32.mrf.mxu1  ;;  %v8849_v18 = vpop.f32.mrf.mxu0 }
 0x271   : > { %v6255_v27 = vpop.f32.mrf.mxu1  ;;  %v6496_v57 = vpop.f32.mrf.mxu0 }
 0x272   : > { %v6497_v41 = vadd.f32 %v6496_v57, %v6248_v0  ;;  %v6256_v51 = vadd.f32 %v6255_v27, %v10046_v63 }
 0x273   : > { %v6257_v6 = vpop.f32.mrf.mxu1  ;;  %v8850_v40 = vpop.f32.mrf.mxu0 }
 0x274   : > { %v8607_v14 = vpack.c.bf16 %v6497_v41, %v6494_v20 }
 0x275   : > { %v6260_v61 = vpop.f32.mrf.mxu1  ;;  %6451 = vmatmul.mubr.bf16.gmra.mxu1 %v9523_v34  ;;  %v6501_v31 = vpop.f32.mrf.mxu0  ;;  %8948 = vmatmul.mubr.bf16.gmra.mxu0 %v9526_v10 }
 0x276   : > { %8769 = vst [vmem:[%s10170_s7 + $0x10] sm:$0xff] %v8607_v14   ;;  %8951 = vmatprep.mubr.msk.bf16.mxu0 %vm9628_vm0, %v10491_v25  ;;  %v6502_v40 = vadd.f32 %v6501_v31, %v6253_v55  ;;  %v6261_v6 = vadd.f32 %v6260_v61, %v10050_v46 }
 0x277   : > { %v6262_v15 = vpop.f32.mrf.mxu1  ;;  %v8853_v12 = vpop.f32.mrf.mxu0 }
 0x279   : > { %v6263_v26 = vpop.f32.mrf.mxu1  ;;  %v6504_v18 = vpop.f32.mrf.mxu0 }
 0x27a   : > { %v6505_v41 = vadd.f32 %v6504_v18, %v6256_v51  ;;  %v6264_v11 = vadd.f32 %v6263_v26, %v10056_v44 }
 0x27b   : > { %v6265_v1 = vpop.f32.mrf.mxu1  ;;  %v8854_v0 = vpop.f32.mrf.mxu0 }
 0x27c   : > { %v8612_v57 = vpack.c.bf16 %v6505_v41, %v6502_v40 }
 0x27d   : > { %v6268_v34 = vpop.f32.mrf.mxu1  ;;  %v6509_v10 = vpop.f32.mrf.mxu0  ;;  %8952 = vmatmul.mubr.bf16.gmra.mxu0 %v9527_v45 }
 0x27e   : > { %8770 = vst [vmem:[%s10170_s7 + $0x18] sm:$0xff] %v8612_v57   ;;  %v6510_v27 = vadd.f32 %v6509_v10, %v6261_v6  ;;  %v6269_v40 = vadd.f32 %v6268_v34, %v10060_v5 }
 0x27f   : > { %v6270_v25 = vpop.f32.mrf.mxu1  ;;  %v8857_v20 = vpop.f32.mrf.mxu0 }
 0x281   : > { %v6271_v63 = vpop.f32.mrf.mxu1  ;;  %v6512_v21 = vpop.f32.mrf.mxu0 }
 0x282   : > { %v6513_v14 = vadd.f32 %v6512_v21, %v6264_v11  ;;  %v6272_v41 = vadd.f32 %v6271_v63, %v10066_v30 }
 0x283   : > { %v6273_v31 = vpop.f32.mrf.mxu1  ;;  %v8858_v15 = vpop.f32.mrf.mxu0 }
 0x284   : > { %v8617_v12 = vpack.c.bf16 %v6513_v14, %v6510_v27 }
 0x285   : > { %v6276_v55 = vpop.f32.mrf.mxu1  ;;  %v6517_v51 = vpop.f32.mrf.mxu0 }
 0x286   : > { %8771 = vst [vmem:[%s10170_s7 + $0x20] sm:$0xff] %v8617_v12   ;;  %v6518_v44 = vadd.f32 %v6517_v51, %v6269_v40  ;;  %v6277_v11 = vadd.f32 %v6276_v55, %v10070_v49 }
 0x287   : > { %v6278_v18 = vpop.f32.mrf.mxu1  ;;  %v8861_v45 = vpop.f32.mrf.mxu0 }
 0x289   : > { %v6279_v46 = vpop.f32.mrf.mxu1  ;;  %v6520_v61 = vpop.f32.mrf.mxu0 }
 0x28a   : > { %v6521_v26 = vadd.f32 %v6520_v61, %v6272_v41  ;;  %v6280_v21 = vadd.f32 %v6279_v46, %v10076_v54 }
 0x28b   : > { %v6281_v1 = vpop.f32.mrf.mxu1  ;;  %v8862_v0 = vpop.f32.mrf.mxu0 }
 0x28c   : > { %v8622_v57 = vpack.c.bf16 %v6521_v26, %v6518_v44 }
 0x28d   : > { %v6284_v10 = vpop.f32.mrf.mxu1  ;;  %v6525_v25 = vpop.f32.mrf.mxu0 }
 0x28e   : > { %8772 = vst [vmem:[%s10170_s7 + $0x28] sm:$0xff] %v8622_v57   ;;  %v6526_v30 = vadd.f32 %v6525_v25, %v6277_v11  ;;  %v6285_v45 = vadd.f32 %v6284_v10, %v10080_v7 }
 0x28f   : > { %v6286_v20 = vpop.f32.mrf.mxu1  ;;  %v8865_v6 = vpop.f32.mrf.mxu0 }
 0x291   : > { %v6287_v5 = vpop.f32.mrf.mxu1  ;;  %v6528_v34 = vpop.f32.mrf.mxu0 }
 0x292   : > { %v6529_v63 = vadd.f32 %v6528_v34, %v6280_v21  ;;  %v6288_v40 = vadd.f32 %v6287_v5, %v10086_v48 }
 0x293   : > { %v6289_v27 = vpop.f32.mrf.mxu1  ;;  %v8866_v14 = vpop.f32.mrf.mxu0 }
 0x294   : > { %v8627_v31 = vpack.c.bf16 %v6529_v63, %v6526_v30 }
 0x295   : > { %v6292_v15 = vpop.f32.mrf.mxu1  ;;  %v6533_v12 = vpop.f32.mrf.mxu0 }
 0x296   : > { %8773 = vst [vmem:[%s10170_s7 + $0x30] sm:$0xff] %v8627_v31   ;;  %v6534_v54 = vadd.f32 %v6533_v12, %v6285_v45  ;;  %v6293_v25 = vadd.f32 %v6292_v15, %v10090_v16 }
 0x297   : > { %v6294_v51 = vpop.f32.mrf.mxu1  ;;  %v8869_v18 = vpop.f32.mrf.mxu0 }
 0x299   : > { %v6295_v49 = vpop.f32.mrf.mxu1  ;;  %v6536_v55 = vpop.f32.mrf.mxu0 }
 0x29a   : > { %v6537_v41 = vadd.f32 %v6536_v55, %v6288_v40  ;;  %v6296_v20 = vadd.f32 %v6295_v49, %v10096_v32 }
 0x29b   : > { %v6297_v46 = vpop.f32.mrf.mxu1  ;;  %v8870_v61 = vpop.f32.mrf.mxu0 }
 0x29c   : > { %v8632_v44 = vpack.c.bf16 %v6537_v41, %v6534_v54  ;;  %v10516_v41 = vld [vmem:[#allocation23_spill] sm:$0xff]  ;;  %v10517_v61 = vld [vmem:[#allocation24_spill] sm:$0xff] }
 0x29d   : > { %v6300_v26 = vpop.f32.mrf.mxu1  ;;  %v6541_v1 = vpop.f32.mrf.mxu0 }
 0x29e   : > { %8774 = vst [vmem:[%s10170_s7 + $0x38] sm:$0xff] %v8632_v44   ;;  %v6542_v48 = vadd.f32 %v6541_v1, %v6293_v25  ;;  %v6301_v14 = vadd.f32 %v6300_v26, %v10100_v23 }
 0x29f   : > { %v6302_v0 = vpop.f32.mrf.mxu1  ;;  %v8873_v57 = vpop.f32.mrf.mxu0 }
 0x2a1   : > { %v6303_v7 = vpop.f32.mrf.mxu1  ;;  %v6544_v10 = vpop.f32.mrf.mxu0 }
 0x2a2   : > { %v6545_v6 = vadd.f32 %v6544_v10, %v6296_v20  ;;  %v6304_v31 = vadd.f32 %v6303_v7, %v10106_v3 }
 0x2a3   : > { %v6305_v11 = vpop.f32.mrf.mxu1  ;;  %v8874_v21 = vpop.f32.mrf.mxu0 }
 0x2a4   : > { %v8637_v5 = vpack.c.bf16 %v6545_v6, %v6542_v48  ;;  %v10518_v6 = vld [vmem:[#allocation25_spill] sm:$0xff] }
 0x2a5   : > { %v6308_v34 = vpop.f32.mrf.mxu1  ;;  %v6549_v30 = vpop.f32.mrf.mxu0 }
 0x2a6   : > { %8775 = vst [vmem:[%s10170_s7 + $0x40] sm:$0xff] %v8637_v5   ;;  %v6550_v32 = vadd.f32 %v6549_v30, %v6301_v14  ;;  %v6309_v46 = vadd.f32 %v6308_v34, %v10516_v41 }
 0x2a7   : > { %v6310_v63 = vpop.f32.mrf.mxu1  ;;  %v8877_v27 = vpop.f32.mrf.mxu0 }
 0x2a9   : > { %v6311_v16 = vpop.f32.mrf.mxu1  ;;  %v6552_v15 = vpop.f32.mrf.mxu0 }
 0x2aa   : > { %v6553_v12 = vadd.f32 %v6552_v15, %v6304_v31  ;;  %v6312_v44 = vadd.f32 %v6311_v16, %v10517_v61 }
 0x2ab   : > { %v6313_v51 = vpop.f32.mrf.mxu1  ;;  %v8878_v18 = vpop.f32.mrf.mxu0 }
 0x2ac   : > { %v8642_v45 = vpack.c.bf16 %v6553_v12, %v6550_v32 }
 0x2ad   : > { %v6316_v40 = vpop.f32.mrf.mxu1  ;;  %v6557_v49 = vpop.f32.mrf.mxu0 }
 0x2ae   : > { %8776 = vst [vmem:[%s10170_s7 + $0x48] sm:$0xff] %v8642_v45   ;;  %v6558_v3 = vadd.f32 %v6557_v49, %v6309_v46  ;;  %v6317_v11 = vadd.f32 %v6316_v40, %v10518_v6 }
 0x2af   : > { %v6318_v55 = vpop.f32.mrf.mxu1  ;;  %v8881_v54 = vpop.f32.mrf.mxu0 }
 0x2b1   : > { %v6319_v23 = vpop.f32.mrf.mxu1  ;;  %v6560_v26 = vpop.f32.mrf.mxu0 }
 0x2b2   : > { %v6561_v1 = vadd.f32 %v6560_v26, %v6312_v44  ;;  %v6320_v21 = vadd.f32 %v6319_v23, %v10131_v42 }
 0x2b3   : > { %v6321_v0 = vpop.f32.mrf.mxu1  ;;  %v8882_v57 = vpop.f32.mrf.mxu0 }
 0x2b4   : > { %v8647_v25 = vpack.c.bf16 %v6561_v1, %v6558_v3 }
 0x2b5   : > { %v6324_v20 = vpop.f32.mrf.mxu1  ;;  %v6565_v7 = vpop.f32.mrf.mxu0 }
 0x2b6   : > { %8777 = vst [vmem:[%s10170_s7 + $0x50] sm:$0xff] %v8647_v25   ;;  %v6566_v30 = vadd.f32 %v6565_v7, %v6317_v11  ;;  %v6325_v51 = vadd.f32 %v6324_v20, %v10135_v29 }
 0x2b7   : > { %v6326_v10 = vpop.f32.mrf.mxu1  ;;  %v8885_v48 = vpop.f32.mrf.mxu0 }
 0x2b9   : > { %v6327_v5 = vpop.f32.mrf.mxu1  ;;  %v6568_v34 = vpop.f32.mrf.mxu0 }
 0x2ba   : > { %v6569_v63 = vadd.f32 %v6568_v34, %v6320_v21  ;;  %v6328_v18 = vadd.f32 %v6327_v5, %v10149_v36 }
 0x2bb   : > { %v6329_v27 = vpop.f32.mrf.mxu1  ;;  %v8886_v14 = vpop.f32.mrf.mxu0 }
 0x2bc   : > { %v8652_v31 = vpack.c.bf16 %v6569_v63, %v6566_v30 }
 0x2bd   : > { %v6332_v16 = vpop.f32.mrf.mxu1  ;;  %v6573_v15 = vpop.f32.mrf.mxu0 }
 0x2be   : > { %8778 = vst [vmem:[%s10170_s7 + $0x58] sm:$0xff] %v8652_v31   ;;  %v6574_v42 = vadd.f32 %v6573_v15, %v6325_v51  ;;  %v6333_v26 = vadd.f32 %v6332_v16, %v10153_v52 }
 0x2bf   : > { %v6334_v32 = vpop.f32.mrf.mxu1  ;;  %v8889_v12 = vpop.f32.mrf.mxu0 }
 0x2c1   : > { %v6335_v45 = vpop.f32.mrf.mxu1  ;;  %v6576_v40 = vpop.f32.mrf.mxu0 }
 0x2c2   : > { %v6577_v49 = vadd.f32 %v6576_v40, %v6328_v18  ;;  %v6336_v3 = vadd.f32 %v6335_v45, %v10159_v58 }
 0x2c3   : > { %v6337_v55 = vpop.f32.mrf.mxu1  ;;  %v8890_v54 = vpop.f32.mrf.mxu0 }
 0x2c4   : > { %v8657_v41 = vpack.c.bf16 %v6577_v49, %v6574_v42 }
 0x2c5   : > { %v6340_v46 = vpop.f32.mrf.mxu1  ;;  %v6581_v61 = vpop.f32.mrf.mxu0 }
 0x2c6   : > { %8779 = vst [vmem:[%s10170_s7 + $0x60] sm:$0xff] %v8657_v41   ;;  %v6582_v36 = vadd.f32 %v6581_v61, %v6333_v26  ;;  %v6341_v11 = vadd.f32 %v6340_v46, %v10166_v37 }
 0x2c7   : > { %v6342_v44 = vpop.f32.mrf.mxu1  ;;  %v8893_v23 = vpop.f32.mrf.mxu0 }
 0x2c9   : > { %v6343_v29 = vpop.f32.mrf.mxu1  ;;  %v6584_v1 = vpop.f32.mrf.mxu0 }
 0x2ca   : > { %v6585_v0 = vadd.f32 %v6584_v1, %v6336_v3  ;;  %v6344_v21 = vadd.f32 %v6343_v29, %v10190_v38 }
 0x2cb   : > { %v6345_v57 = vpop.f32.mrf.mxu1  ;;  %v8894_v25 = vpop.f32.mrf.mxu0 }
 0x2cc   : > { %v8662_v20 = vpack.c.bf16 %v6585_v0, %v6582_v36 }
 0x2cd   : > { %v6348_v7 = vpop.f32.mrf.mxu1  ;;  %v6589_v10 = vpop.f32.mrf.mxu0 }
 0x2ce   : > { %8780 = vst [vmem:[%s10170_s7 + $0x68] sm:$0xff] %v8662_v20   ;;  %v6590_v58 = vadd.f32 %v6589_v10, %v6341_v11  ;;  %v6349_v32 = vadd.f32 %v6348_v7, %v10194_v62 }
 0x2cf   : > { %v6350_v48 = vpop.f32.mrf.mxu1  ;;  %v8897_v6 = vpop.f32.mrf.mxu0 }
 0x2d1   : > { %v6351_v52 = vpop.f32.mrf.mxu1  ;;  %v6592_v5 = vpop.f32.mrf.mxu0 }
 0x2d2   : > { %v6593_v34 = vadd.f32 %v6592_v5, %v6344_v21  ;;  %v6352_v12 = vadd.f32 %v6351_v52, %v10200_v59 }
 0x2d3   : > { %v6353_v30 = vpop.f32.mrf.mxu1  ;;  %v8898_v63 = vpop.f32.mrf.mxu0 }
 0x2d4   : > { %v8667_v27 = vpack.c.bf16 %v6593_v34, %v6590_v58 }
 0x2d5   : > { %v6356_v14 = vpop.f32.mrf.mxu1  ;;  %v6597_v31 = vpop.f32.mrf.mxu0 }
 0x2d6   : > { %8781 = vst [vmem:[%s10170_s7 + $0x70] sm:$0xff] %v8667_v27   ;;  %v6598_v38 = vadd.f32 %v6597_v31, %v6349_v32  ;;  %v6357_v46 = vadd.f32 %v6356_v14, %v10204_v28 }
 0x2d7   : > { %v6358_v16 = vpop.f32.mrf.mxu1  ;;  %v8901_v15 = vpop.f32.mrf.mxu0 }
 0x2d9   : > { %v6359_v37 = vpop.f32.mrf.mxu1  ;;  %v6600_v51 = vpop.f32.mrf.mxu0 }
 0x2da   : > { %v6601_v18 = vadd.f32 %v6600_v51, %v6352_v12  ;;  %v6360_v61 = vadd.f32 %v6359_v37, %v10210_v47 }
 0x2db   : > { %v6361_v45 = vpop.f32.mrf.mxu1  ;;  %v8902_v40 = vpop.f32.mrf.mxu0 }
 0x2dc   : > { %v8672_v42 = vpack.c.bf16 %v6601_v18, %v6598_v38 }
 0x2dd   : > { %v6364_v49 = vpop.f32.mrf.mxu1  ;;  %v6605_v55 = vpop.f32.mrf.mxu0 }
 0x2de   : > { %8782 = vst [vmem:[%s10170_s7 + $0x78] sm:$0xff] %v8672_v42   ;;  %v6606_v59 = vadd.f32 %v6605_v55, %v6357_v46  ;;  %v6365_v25 = vadd.f32 %v6364_v49, %v10214_v39 }
 0x2df   : > { %v6366_v54 = vpop.f32.mrf.mxu1  ;;  %v8905_v41 = vpop.f32.mrf.mxu0 }
 0x2e1   : > { %v6367_v62 = vpop.f32.mrf.mxu1  ;;  %v6608_v44 = vpop.f32.mrf.mxu0 }
 0x2e2   : > { %v6609_v23 = vadd.f32 %v6608_v44, %v6360_v61  ;;  %v6368_v20 = vadd.f32 %v6367_v62, %v10220_v56 }
 0x2e3   : > { %v6369_v26 = vpop.f32.mrf.mxu1  ;;  %v8906_v3 = vpop.f32.mrf.mxu0 }
 0x2e4   : > { %v8677_v29 = vpack.c.bf16 %v6609_v23, %v6606_v59 }
 0x2e5   : > { %v6372_v1 = vpop.f32.mrf.mxu1  ;;  %v6613_v36 = vpop.f32.mrf.mxu0 }
 0x2e6   : > { %8783 = vst [vmem:[%s10170_s7 + $0x80] sm:$0xff] %v8677_v29   ;;  %v6614_v47 = vadd.f32 %v6613_v36, %v6365_v25  ;;  %v6373_v34 = vadd.f32 %v6372_v1, %v10224_v24 }
 0x2e7   : > { %v6374_v0 = vpop.f32.mrf.mxu1  ;;  %v8909_v57 = vpop.f32.mrf.mxu0 }
 0x2e9   : > { %v6375_v28 = vpop.f32.mrf.mxu1  ;;  %v6616_v7 = vpop.f32.mrf.mxu0 }
 0x2ea   : > { %v6617_v10 = vadd.f32 %v6616_v7, %v6368_v20  ;;  %v6376_v30 = vadd.f32 %v6375_v28, %v10230_v60 }
 0x2eb   : > { %v6377_v48 = vpop.f32.mrf.mxu1  ;;  %v8910_v6 = vpop.f32.mrf.mxu0 }
 0x2ec   : > { %v8682_v11 = vpack.c.bf16 %v6617_v10, %v6614_v47 }
 0x2ed   : > { %v6380_v21 = vpop.f32.mrf.mxu1  ;;  %v6621_v52 = vpop.f32.mrf.mxu0 }
 0x2ee   : > { %8784 = vst [vmem:[%s10170_s7 + $0x88] sm:$0xff] %v8682_v11   ;;  %v6622_v56 = vadd.f32 %v6621_v52, %v6373_v34  ;;  %v6381_v51 = vadd.f32 %v6380_v21, %v10234_v22 }
 0x2ef   : > { %v6382_v5 = vpop.f32.mrf.mxu1  ;;  %v8913_v58 = vpop.f32.mrf.mxu0 }
 0x2f1   : > { %v6383_v39 = vpop.f32.mrf.mxu1  ;;  %v6624_v63 = vpop.f32.mrf.mxu0 }
 0x2f2   : > { %v6625_v27 = vadd.f32 %v6624_v63, %v6376_v30  ;;  %v6384_v38 = vadd.f32 %v6383_v39, %v10240_v19 }
 0x2f3   : > { %v6385_v14 = vpop.f32.mrf.mxu1  ;;  %v8914_v31 = vpop.f32.mrf.mxu0 }
 0x2f4   : > { %v8687_v16 = vpack.c.bf16 %v6625_v27, %v6622_v56 }
 0x2f5   : > { %v6388_v15 = vpop.f32.mrf.mxu1  ;;  %v6629_v32 = vpop.f32.mrf.mxu0 }
 0x2f6   : > { %8785 = vst [vmem:[%s10170_s7 + $0x90] sm:$0xff] %v8687_v16   ;;  %v6630_v60 = vadd.f32 %v6629_v32, %v6381_v51  ;;  %v6389_v61 = vadd.f32 %v6388_v15, %v10244_v4 }
 0x2f7   : > { %v6390_v12 = vpop.f32.mrf.mxu1  ;;  %v8917_v37 = vpop.f32.mrf.mxu0 }
 0x2f9   : > { %v6391_v24 = vpop.f32.mrf.mxu1  ;;  %v6632_v18 = vpop.f32.mrf.mxu0 }
 0x2fa   : > { %v6633_v45 = vadd.f32 %v6632_v18, %v6384_v38  ;;  %v6392_v62 = vadd.f32 %v6391_v24, %v10250_v13 }
 0x2fb   : > { %v6393_v40 = vpop.f32.mrf.mxu1  ;;  %v8918_v42 = vpop.f32.mrf.mxu0 }
 0x2fc   : > { %v8692_v49 = vpack.c.bf16 %v6633_v45, %v6630_v60 }
 0x2fd   : > { %v6396_v55 = vpop.f32.mrf.mxu1  ;;  %v6637_v54 = vpop.f32.mrf.mxu0 }
 0x2fe   : > { %8786 = vst [vmem:[%s10170_s7 + $0x98] sm:$0xff] %v8692_v49   ;;  %v6638_v19 = vadd.f32 %v6637_v54, %v6389_v61  ;;  %v6397_v57 = vadd.f32 %v6396_v55, %v10254_v9 }
 0x2ff   : > { %v6398_v41 = vpop.f32.mrf.mxu1  ;;  %v8921_v46 = vpop.f32.mrf.mxu0 }
 0x301   : > { %v6399_v22 = vpop.f32.mrf.mxu1  ;;  %v6640_v44 = vpop.f32.mrf.mxu0 }
 0x302   : > { %v6641_v59 = vadd.f32 %v6640_v44, %v6392_v62  ;;  %v6400_v25 = vadd.f32 %v6399_v22, %v10260_v2 }
 0x303   : > { %v6401_v23 = vpop.f32.mrf.mxu1  ;;  %v8922_v26 = vpop.f32.mrf.mxu0 }
 0x304   : > { %v8697_v3 = vpack.c.bf16 %v6641_v59, %v6638_v19  ;;  %v10519_v19 = vld [vmem:[#allocation10_spill] sm:$0xff]  ;;  %v10520_v23 = vld [vmem:[#allocation11_spill] sm:$0xff] }
 0x305   : > { %v6404_v29 = vpop.f32.mrf.mxu1  ;;  %v6645_v1 = vpop.f32.mrf.mxu0 }
 0x306   : > { %8787 = vst [vmem:[%s10170_s7 + $0xa0] sm:$0xff] %v8697_v3   ;;  %v6646_v13 = vadd.f32 %v6645_v1, %v6397_v57  ;;  %v6405_v52 = vadd.f32 %v6404_v29, %v10264_v8 }
 0x307   : > { %v6406_v36 = vpop.f32.mrf.mxu1  ;;  %v8925_v0 = vpop.f32.mrf.mxu0 }
 0x309   : > { %v6407_v4 = vpop.f32.mrf.mxu1  ;;  %v6648_v20 = vpop.f32.mrf.mxu0 }
 0x30a   : > { %v6649_v28 = vadd.f32 %v6648_v20, %v6400_v25  ;;  %v6408_v5 = vadd.f32 %v6407_v4, %v10270_v50 }
 0x30b   : > { %v6409_v7 = vpop.f32.mrf.mxu1  ;;  %v8926_v47 = vpop.f32.mrf.mxu0 }
 0x30c   : > { %v8702_v10 = vpack.c.bf16 %v6649_v28, %v6646_v13  ;;  %v10521_v13 = vld [vmem:[#allocation12_spill] sm:$0xff]  ;;  %v10522_v7 = vld [vmem:[#allocation13_spill] sm:$0xff] }
 0x30d   : > { %v6412_v48 = vpop.f32.mrf.mxu1  ;;  %v6653_v6 = vpop.f32.mrf.mxu0 }
 0x30e   : > { %8788 = vst [vmem:[%s10170_s7 + $0xa8] sm:$0xff] %v8702_v10   ;;  %v6654_v2 = vadd.f32 %v6653_v6, %v6405_v52  ;;  %v6413_v16 = vadd.f32 %v6412_v48, %v10274_v43 }
 0x30f   : > { %v6414_v11 = vpop.f32.mrf.mxu1  ;;  %v8929_v21 = vpop.f32.mrf.mxu0 }
 0x311   : > { %v6415_v9 = vpop.f32.mrf.mxu1  ;;  %v6656_v58 = vpop.f32.mrf.mxu0 }
 0x312   : > { %v6657_v34 = vadd.f32 %v6656_v58, %v6408_v5  ;;  %v6416_v15 = vadd.f32 %v6415_v9, %v10280_v53 }
 0x313   : > { %v6417_v30 = vpop.f32.mrf.mxu1  ;;  %v8930_v39 = vpop.f32.mrf.mxu0 }
 0x314   : > { %v8707_v63 = vpack.c.bf16 %v6657_v34, %v6654_v2  ;;  %v10523_v39 = vld [vmem:[#allocation14_spill] sm:$0xff] }
 0x315   : > { %v6420_v56 = vpop.f32.mrf.mxu1  ;;  %v6661_v27 = vpop.f32.mrf.mxu0 }
 0x316   : > { %8789 = vst [vmem:[%s10170_s7 + $0xb0] sm:$0xff] %v8707_v63   ;;  %v6662_v50 = vadd.f32 %v6661_v27, %v6413_v16  ;;  %v6421_v40 = vadd.f32 %v6420_v56, %v10284_v35 }
 0x317   : > { %v6422_v14 = vpop.f32.mrf.mxu1  ;;  %v8933_v31 = vpop.f32.mrf.mxu0 }
 0x319   : > { %v6423_v8 = vpop.f32.mrf.mxu1  ;;  %v6664_v32 = vpop.f32.mrf.mxu0 }
 0x31a   : > { %v6665_v12 = vadd.f32 %v6664_v32, %v6416_v15  ;;  %v6424_v42 = vadd.f32 %v6423_v8, %v10290_v17 }
 0x31b   : > { %v6425_v37 = vpop.f32.mrf.mxu1  ;;  %v8934_v51 = vpop.f32.mrf.mxu0 }
 0x31c   : > { %v8712_v38 = vpack.c.bf16 %v6665_v12, %v6662_v50  ;;  %v10524_v12 = vld [vmem:[#allocation15_spill] sm:$0xff]  ;;  %v10525_v51 = vld [vmem:[#allocation16_spill] sm:$0xff] }
 0x31d   : > { %v6428_v24 = vpop.f32.mrf.mxu1  ;;  %v6669_v18 = vpop.f32.mrf.mxu0 }
 0x31e   : > { %8790 = vst [vmem:[%s10170_s7 + $0xb8] sm:$0xff] %v8712_v38   ;;  %v6670_v53 = vadd.f32 %v6669_v18, %v6421_v40  ;;  %v6429_v59 = vadd.f32 %v6428_v24, %v10519_v19 }
 0x31f   : > { %v6430_v60 = vpop.f32.mrf.mxu1  ;;  %v8937_v45 = vpop.f32.mrf.mxu0 }
 0x321   : > { %v6431_v43 = vpop.f32.mrf.mxu1  ;;  %v6672_v49 = vpop.f32.mrf.mxu0 }
 0x322   : > { %v6673_v55 = vadd.f32 %v6672_v49, %v6424_v42  ;;  %v6432_v26 = vadd.f32 %v6431_v43, %v10520_v23 }
 0x323   : > { %v6433_v54 = vpop.f32.mrf.mxu1  ;;  %v8938_v41 = vpop.f32.mrf.mxu0 }
 0x324   : > { %v8717_v46 = vpack.c.bf16 %v6673_v55, %v6670_v53 }
 0x325   : > { %v6436_v61 = vpop.f32.mrf.mxu1  ;;  %v6677_v62 = vpop.f32.mrf.mxu0 }
 0x326   : > { %8791 = vst [vmem:[%s10170_s7 + $0xc0] sm:$0xff] %v8717_v46   ;;  %v6678_v17 = vadd.f32 %v6677_v62, %v6429_v59  ;;  %v6437_v28 = vadd.f32 %v6436_v61, %v10521_v13 }
 0x327   : > { %v6438_v22 = vpop.f32.mrf.mxu1  ;;  %v8941_v44 = vpop.f32.mrf.mxu0 }
 0x329   : > { %v6439_v35 = vpop.f32.mrf.mxu1  ;;  %v6680_v3 = vpop.f32.mrf.mxu0 }
 0x32a   : > { %v6681_v29 = vadd.f32 %v6680_v3, %v6432_v26  ;;  %v6440_v47 = vadd.f32 %v6439_v35, %v10522_v7 }
 0x32b   : > { %v6441_v1 = vpop.f32.mrf.mxu1  ;;  %v8942_v36 = vpop.f32.mrf.mxu0 }
 0x32c   : > { %v8722_v0 = vpack.c.bf16 %v6681_v29, %v6678_v17 }
 0x32d   : > { %v6444_v57 = vpop.f32.mrf.mxu1  ;;  %v6685_v25 = vpop.f32.mrf.mxu0 }
 0x32e   : > { %8792 = vst [vmem:[%s10170_s7 + $0xc8] sm:$0xff] %v8722_v0   ;;  %v6686_v6 = vadd.f32 %v6685_v25, %v6437_v28  ;;  %v6445_v30 = vadd.f32 %v6444_v57, %v10314_v33 }
 0x32f   : > { %v6446_v4 = vpop.f32.mrf.mxu1  ;;  %v8945_v20 = vpop.f32.mrf.mxu0 }
 0x331   : > { %v6447_v10 = vpop.f32.mrf.mxu1  ;;  %v6688_v48 = vpop.f32.mrf.mxu0 }
 0x332   : > { %v6689_v11 = vadd.f32 %v6688_v48, %v6440_v47  ;;  %v6448_v63 = vadd.f32 %v6447_v10, %v10523_v39 }
 0x333   : > { %v6449_v21 = vpop.f32.mrf.mxu1  ;;  %v8946_v52 = vpop.f32.mrf.mxu0 }
 0x334   : > { %v8727_v5 = vpack.c.bf16 %v6689_v11, %v6686_v6 }
 0x335   : > { %v6452_v9 = vpop.f32.mrf.mxu1  ;;  %v6693_v58 = vpop.f32.mrf.mxu0 }
 0x336   : > { %8793 = vst [vmem:[%s10170_s7 + $0xd0] sm:$0xff] %v8727_v5   ;;  %v6694_v14 = vadd.f32 %v6693_v58, %v6445_v30  ;;  %v6453_v37 = vadd.f32 %v6452_v9, %v10524_v12 }
 0x337   : > { %v6454_v2 = vpop.f32.mrf.mxu1  ;;  %v8949_v34 = vpop.f32.mrf.mxu0 }
 0x339   : > { %v6455_v56 = vpop.f32.mrf.mxu1  ;;  %v6696_v27 = vpop.f32.mrf.mxu0 }
 0x33a   : > { %v6697_v31 = vadd.f32 %v6696_v27, %v6448_v63  ;;  %v6456_v33 = vadd.f32 %v6455_v56, %v10525_v51 }
 0x33b   : > { %v8950_v16 = vpop.f32.mrf.mxu0  ;;  %v6457_v15 = vpop.f32.mrf.mxu1 }
 0x33c   : > { %v8732_v8 = vpack.c.bf16 %v6697_v31, %v6694_v14 }
 0x33d   : > { %v6701_v32 = vpop.f32.mrf.mxu0 }
 0x33e   : > { %8794 = vst [vmem:[%s10170_s7 + $0xd8] sm:$0xff] %v8732_v8   ;;  %v6702_v24 = vadd.f32 %v6701_v32, %v6453_v37 }
 0x33f   : > { %v8953_v50 = vpop.f32.mrf.mxu0 }
 0x341   : > { %v6704_v38 = vpop.f32.mrf.mxu0 }
 0x342   : > { %v6705_v18 = vadd.f32 %v6704_v38, %v6456_v33 }
 0x343   : > { %v8954_v60 = vpop.f32.mrf.mxu0 }
 0x344   : > { %v8737_v45 = vpack.c.bf16 %v6705_v18, %v6702_v24 }
 0x346   : > { %8795 = vst [vmem:[%s10170_s7 + $0xe0] sm:$0xff] %v8737_v45  }
 0x347   : > { %9570 = shalt.err (!%p9567_p0)
}
 0x348   : > { %s9571_s17 = scalar_lea.hbm %s10417_s12, 3968  ;;  %s9575_s20 = scalar_lea.hbm %s10470_s6, 7936 }
 0x349   : > { %p9572_p1 = scmp.ne.s32.totalorder %s10417_s12, %s9571_s17  ;;  %p9576_p4 = scmp.lt.s32.totalorder %s10417_s12, %s10470_s6 }
 0x34a   : > { %p9577_p7 = scmp.lt.s32.totalorder %s9575_s20, %s9571_s17 }
 0x34b   : > { %p9573_p2 = pnand %p9572_p1, %p9705_p5 }
 0x34c   : > { %p9578_p6 = por %p9577_p7, %p9576_p4 }
 0x34d   : > { %p9574_p3 = pneg %p9573_p2 }
 0x34f   : > { %p9579_p8 = pnand %p9578_p6, %p9574_p3 }
 0x351   : > { %9582 = shalt.err (!%p9579_p8)
}
 0x352   : > { %s9630_s26 = smov 64   ;;  %s9631_s30 = smov 4  }
 0x353   : > { %8994 = dma.vmem_to_hbm [thread:$0]  (%p9705_p5), %s10419_s9, 3968, %s10417_s12, %s10424_s3, %s9630_s26, %s9630_s26, %s9631_s30  }
 0x354 PF: > { %p9006_p9 = scmp.ge.s32.totalorder %s9621_s23, 2  ;;  %s7015_s7 = sand.u32 1, %s9609_s21  }
 0x355   : > { %p10526_p10 = scmp.ne.s32.totalorder %s10476_s29, 0  ;;  %s7016_s8 = scalar_lea.sflag [#allocation6], %s7015_s7 }
 0x357   : > { %p9001_p11 = pnand %p9006_p9, %p10526_p10 }
 0x359   : > { %p9002_p12 = pneg %p9001_p11 }
 0x35b   : > { %9604 = dma.done.wait (%p9002_p12), %s7016_s8, 3968  }
 0x35c   : > { %9606 = vsyncadd (%p9002_p12), %s7016_s8, 4294963328  ;;  %p17_p13 = scmp.ge.s32.totalorder %s9692_s24, 4   ;;  %s10527_s21 = smov %s9613_s22 }
 0x35d   : > { %s10528_s22 = smov %s9617_s2  ;;  %s10529_s2 = smov %s9703_s27 }
 0x35e   : > { %s10530_s23 = smov %s9692_s24  ;;  %19 = sbr.rel (!%p17_p13) target bundleno = 4 (0x4), region = 84 }
 0x363   :  { %7021 = vsyncpa [#allocation5], 1 }
 0x364   :  { %7023 = vsyncpa [#allocation5 + $0x1], 1 }
 0x365   :  { %7024 = vsyncpa [#allocation6], 1 }
 0x366   :  { %7026 = vsyncpa [#allocation6 + $0x1], 1 }

</bundles_post_ra>
